<compile_context>
chip_gen: v7x
topology: tpu7x:2x2x1
jax: 0.10.0
libtpu: 0.0.40
codegen_flags: <defaults>
</compile_context>

<pallas_src>
import functools

import numpy as np
import jax
import jax.numpy as jnp
from jax import lax
from jax.experimental import pallas as pl
from jax.experimental.pallas import tpu as pltpu

_BN_EPS = 1e-5
_LRELU_SLOPE = 0.1


def _round_up(x, m):
    return ((x + m - 1) // m) * m


def _tpu_vmem_info():
    """Returns (vmem_capacity, per-call vmem limit) in bytes."""
    try:
        cap = int(pltpu.get_tpu_info().vmem_capacity_bytes)
    except Exception:                      # older jax / interpret mode: be safe
        cap = 64 * 1024 * 1024             # v7x-sized conservative fallback
    limit = max(32 * 1024 * 1024, min(cap - 16 * 1024 * 1024, 110 * 1024 * 1024))
    return cap, limit


# ----------------------------- Pallas kernels ------------------------------ #

def _pack_im2col(x_ref, col_ref, row0, *, th, wp, cin):
    """Pack the (th*wp, 9*cin) bf16 im2col tile for image rows [row0, row0+th).

    x_ref  : (1, Hp+2, Wp+2, Cin) f32, whole padded image resident in VMEM.
    col_ref: (th*wp, 9*cin) bf16 VMEM scratch.
    """
    for t in range(9):
        kh, kw = divmod(t, 3)
        a = x_ref[0, pl.ds(row0 + kh, th), pl.ds(kw, wp), :]      # (th, wp, cin)
        col_ref[:, pl.ds(t * cin, cin)] = (
            a.reshape(th * wp, cin).astype(jnp.bfloat16))


def _conv_stats_kernel(x_ref, w_ref, s_ref, col_ref, *,
                       th, wp, h_img, w_img, needs_mask):
    """Conv tile (single K=9*Cin MXU matmul) + per-tile BN partial statistics.

    w_ref : (9*Cin, Cout_pad) bf16 packed weights.
    s_ref : (1, 1, 8, Cout_pad) f32; row 0 = sum, row 1 = M2 about tile mean.
    """
    hi = pl.program_id(1)
    row0 = hi * th
    cout_pad = s_ref.shape[-1]

    _pack_im2col(x_ref, col_ref, row0, th=th, wp=wp, cin=x_ref.shape[-1])
    acc = jnp.dot(col_ref[...], w_ref[...],
                  preferred_element_type=jnp.float32)             # (th*wp, Cp)

    # Pixels that only exist because of H/W tile padding are masked out of the
    # statistics (conv over zero-padding is garbage there).
    if needs_mask:
        pix = lax.broadcasted_iota(jnp.int32, (th * wp, 1), 0)
        rows = row0 + pix // wp
        cols = pix % wp
        valid = (rows < h_img) & (cols < w_img)
        ym = jnp.where(valid, acc, 0.0)
        n_valid = (jnp.minimum(th, h_img - row0) * w_img).astype(jnp.float32)
    else:
        ym = acc
        n_valid = float(th * wp)

    s = jnp.sum(ym, axis=0, keepdims=True)                        # (1, Cp)
    mean_t = s / n_valid
    if needs_mask:
        d = jnp.where(valid, acc - mean_t, 0.0)
    else:
        d = acc - mean_t
    m2 = jnp.sum(d * d, axis=0, keepdims=True)                    # (1, Cp)

    # Single full (8, Cout_pad) store — no masked sublane-partial writes.
    s_ref[0, 0] = jnp.concatenate(
        [s, m2, jnp.zeros((6, cout_pad), jnp.float32)], axis=0)


def _conv_bn_lrelu_kernel(x_ref, w_ref, scale_ref, shift_ref, o_ref, col_ref,
                          *, th, wp):
    """Recompute the conv tile and fuse BN scale/shift + LeakyReLU(0.1)."""
    hi = pl.program_id(1)
    row0 = hi * th
    _pack_im2col(x_ref, col_ref, row0, th=th, wp=wp, cin=x_ref.shape[-1])
    acc = jnp.dot(col_ref[...], w_ref[...],
                  preferred_element_type=jnp.float32)
    z = acc * scale_ref[...] + shift_ref[...]
    o_ref[0] = jnp.where(z > 0, z, _LRELU_SLOPE * z)


# ------------------------------ Host wrapper ------------------------------- #

@jax.jit
def conv_bn_relu(x_nchw, w_oihw, gamma, beta):
    """Forward of Conv_BN_Relu. x: (N, Cin, H, W) -> (N, Cout, H, W) float32."""
    n, cin, h, w = x_nchw.shape
    cout = w_oihw.shape[0]
    vmem_cap, vmem_limit = _tpu_vmem_info()

    # ---- tile / padding choices (no divisibility asserts) -------------------
    lane_mult = 128 if cout <= 128 else 256     # 256 fills the v6e/v7x MXU width
    cout_pad = _round_up(cout, lane_mult)
    wp = _round_up(w, 16)
    rows_target = 1024 if vmem_cap > 64 * 1024 * 1024 else 512
    th = max(1, min(h, rows_target // wp))      # image rows per tile
    hp = _round_up(h, th)
    ht = hp // th
    kdim = 9 * cin
    needs_mask = (hp != h) or (wp != w)

    # ---- glue: layout + zero padding (plain XLA) ----------------------------
    x_nhwc = jnp.transpose(x_nchw.astype(jnp.float32), (0, 2, 3, 1))
    x_pad = jnp.pad(x_nhwc, ((0, 0), (1, 1 + hp - h), (1, 1 + wp - w), (0, 0)))
    # (N, Hp+2, Wp+2, Cin) f32: x is the small tensor (Cin << Cout_pad), so f32
    # residency costs little; MXU operands are repacked to bf16 in-kernel.

    # Packed weights: (kh, kw, cin) flattened -> (9*Cin, Cout_pad) bf16.
    w_mat = jnp.transpose(w_oihw.astype(jnp.float32), (2, 3, 1, 0))
    w_mat = w_mat.reshape(kdim, cout)
    w_mat = jnp.pad(w_mat, ((0, 0), (0, cout_pad - cout))).astype(jnp.bfloat16)

    x_spec = pl.BlockSpec((1, hp + 2, wp + 2, cin), lambda ni, hi: (ni, 0, 0, 0))
    w_spec = pl.BlockSpec((kdim, cout_pad), lambda ni, hi: (0, 0))
    vec_spec = pl.BlockSpec((1, cout_pad), lambda ni, hi: (0, 0))
    col_scratch = pltpu.VMEM((th * wp, kdim), jnp.bfloat16)
    cparams = pltpu.CompilerParams(
        dimension_semantics=("parallel", "parallel"),
        vmem_limit_bytes=vmem_limit)

    # ---- pass 1: per-tile BN partial statistics (sum, M2 about tile mean) ---
    stats = pl.pallas_call(
        functools.partial(_conv_stats_kernel, th=th, wp=wp,
                          h_img=h, w_img=w, needs_mask=needs_mask),
        out_shape=jax.ShapeDtypeStruct((n, ht, 8, cout_pad), jnp.float32),
        grid_spec=pltpu.PrefetchScalarGridSpec(
            num_scalar_prefetch=0,
            grid=(n, ht),
            in_specs=[x_spec, w_spec],
            out_specs=pl.BlockSpec((1, 1, 8, cout_pad),
                                   lambda ni, hi: (ni, hi, 0, 0)),
            scratch_shapes=[col_scratch]),
        compiler_params=cparams,
    )(x_pad, w_mat)

    # ---- finish BN statistics (stable parallel-variance combine) ------------
    tile_sum = stats[:, :, 0, :]                                   # (n, ht, Cp)
    tile_m2 = stats[:, :, 1, :]
    n_i = (np.minimum(th, h - np.arange(ht) * th) * w).astype(np.float32)
    count = float(n * h * w)
    mean = jnp.sum(tile_sum, axis=(0, 1)) / count                  # (Cp,)
    mean_i = tile_sum / n_i[None, :, None]
    m2_between = jnp.sum(
        n_i[None, :, None] * (mean_i - mean[None, None, :]) ** 2, axis=(0, 1))
    var = jnp.maximum((jnp.sum(tile_m2, axis=(0, 1)) + m2_between) / count, 0.0)

    gamma_p = jnp.pad(gamma.astype(jnp.float32), (0, cout_pad - cout))
    beta_p = jnp.pad(beta.astype(jnp.float32), (0, cout_pad - cout))
    scale = gamma_p * lax.rsqrt(var + _BN_EPS)
    shift = beta_p - mean * scale

    # ---- pass 2: recomputed conv + scale/shift + LeakyReLU, written once ----
    out_flat = pl.pallas_call(
        functools.partial(_conv_bn_lrelu_kernel, th=th, wp=wp),
        out_shape=jax.ShapeDtypeStruct((n, hp * wp, cout_pad), jnp.float32),
        grid_spec=pltpu.PrefetchScalarGridSpec(
            num_scalar_prefetch=0,
            grid=(n, ht),
            in_specs=[x_spec, w_spec, vec_spec, vec_spec],
            out_specs=pl.BlockSpec((1, th * wp, cout_pad),
                                   lambda ni, hi: (ni, hi, 0)),
            scratch_shapes=[col_scratch]),
        compiler_params=cparams,
    )(x_pad, w_mat, scale.reshape(1, cout_pad), shift.reshape(1, cout_pad))

    # ---- glue: strip padding, back to NCHW -----------------------------------
    out = out_flat.reshape(n, hp, wp, cout_pad)[:, :h, :w, :cout]
    return jnp.transpose(out, (0, 3, 1, 2))


# ------------------------------ Reference (jnp) ---------------------------- #

def _reference(x_nchw, w_oihw, gamma, beta):
    y = lax.conv_general_dilated(
        x_nchw.astype(jnp.float32), w_oihw.astype(jnp.float32),
        window_strides=(1, 1), padding=((1, 1), (1, 1)),
        dimension_numbers=("NCHW", "OIHW", "NCHW"))
    mean = jnp.mean(y, axis=(0, 2, 3), keepdims=True)
    var = jnp.mean((y - mean) ** 2, axis=(0, 2, 3), keepdims=True)
    z = (y - mean) * lax.rsqrt(var + _BN_EPS)
    z = z * gamma.reshape(1, -1, 1, 1) + beta.reshape(1, -1, 1, 1)
    return jnp.where(z > 0, z, _LRELU_SLOPE * z)


# ----------------------------------- main ----------------------------------- #

if __name__ == "__main__":
    key = jax.random.PRNGKey(0)

    # (N, Cin, Cout, H, W); the second case exercises the H/W padding and the
    # masked-statistics path.
    cases = [(2, 4, 8, 16, 16), (2, 3, 8, 10, 12)]
    for idx, (N, CIN, COUT, H, W) in enumerate(cases):
        k_x, k_w, k_g, k_b, key = jax.random.split(key, 5)
        x = jax.random.normal(k_x, (N, CIN, H, W), dtype=jnp.float32)
        # Conv2d weight shape (out_channels, in_channels, 3, 3).
        wgt = jax.random.normal(k_w, (COUT, CIN, 3, 3), dtype=jnp.float32) * 0.1
        gamma = 1.0 + 0.1 * jax.random.normal(k_g, (COUT,), dtype=jnp.float32)
        beta = 0.1 * jax.random.normal(k_b, (COUT,), dtype=jnp.float32)

        out = jax.block_until_ready(conv_bn_relu(x, wgt, gamma, beta))
        ref = jax.block_until_ready(_reference(x, wgt, gamma, beta))

        assert out.shape == (N, COUT, H, W)
        err = float(jnp.max(jnp.abs(out - ref)))
        assert jnp.allclose(out, ref, rtol=2e-2, atol=2e-2), (
            f"case {idx}: mismatch vs reference, max abs err = {err}")

    print("KERNEL_OK")
</pallas_src>

<mosaic_0001>
module attributes {stable_mosaic.version = 11 : i64} {
  func.func @_conv_stats_kernel(%arg0: i32, %arg1: i32, %arg2: memref<1x18x18x4xf32, #tpu.memory_space<vmem>>, %arg3: memref<36x128xbf16, #tpu.memory_space<vmem>>, %arg4: memref<1x1x8x128xf32, #tpu.memory_space<vmem>>, %arg5: memref<256x36xbf16, #tpu.memory_space<vmem>>) attributes {dimension_semantics = [#tpu.dimension_semantics<parallel>, #tpu.dimension_semantics<parallel>], iteration_bounds = array<i64: 2, 1>, scalar_prefetch = 0 : i64, scratch_operands = 1 : i64, tpu.core_type = #tpu.core_type<tc>, window_params = [{transform_indices = @transform_0, window_bounds = array<i64: 1, 18, 18, 4>}, {pipeline_mode = #tpu.pipeline_mode<synchronous>, transform_indices = @transform_1, window_bounds = array<i64: 36, 128>}, {transform_indices = @transform_2, window_bounds = array<i64: 1, 1, 8, 128>}]} {
    %c16_i32 = arith.constant 16 : i32
    %0 = arith.muli %arg1, %c16_i32 : i32
    %c0_i32 = arith.constant 0 : i32
    %1 = arith.addi %0, %c0_i32 : i32
    %c0 = arith.constant 0 : index
    %2 = arith.index_cast %1 : i32 to index
    %c0_0 = arith.constant 0 : index
    %c0_1 = arith.constant 0 : index
    %3 = vector.load %arg2[%c0, %2, %c0_0, %c0_1] : memref<1x18x18x4xf32, #tpu.memory_space<vmem>>, vector<1x16x16x4xf32>
    %4 = vector.shape_cast %3 : vector<1x16x16x4xf32> to vector<16x16x4xf32>
    %5 = vector.shape_cast %4 : vector<16x16x4xf32> to vector<256x4xf32>
    %6 = arith.truncf %5 : vector<256x4xf32> to vector<256x4xbf16>
    %c0_2 = arith.constant 0 : index
    %c0_3 = arith.constant 0 : index
    %7 = vector.load %arg5[%c0_2, %c0_3] : memref<256x36xbf16, #tpu.memory_space<vmem>>, vector<256x4xbf16>
    tpu.vector_store %arg5[%c0_2, %c0_3], %6 {strides = array<i32>} : memref<256x36xbf16, #tpu.memory_space<vmem>>, vector<256x4xbf16>,
    %c0_i32_4 = arith.constant 0 : i32
    %8 = arith.addi %0, %c0_i32_4 : i32
    %c0_5 = arith.constant 0 : index
    %9 = arith.index_cast %8 : i32 to index
    %c1 = arith.constant 1 : index
    %c0_6 = arith.constant 0 : index
    %10 = vector.load %arg2[%c0_5, %9, %c1, %c0_6] : memref<1x18x18x4xf32, #tpu.memory_space<vmem>>, vector<1x16x16x4xf32>
    %11 = vector.shape_cast %10 : vector<1x16x16x4xf32> to vector<16x16x4xf32>
    %12 = vector.shape_cast %11 : vector<16x16x4xf32> to vector<256x4xf32>
    %13 = arith.truncf %12 : vector<256x4xf32> to vector<256x4xbf16>
    %c0_7 = arith.constant 0 : index
    %c4 = arith.constant 4 : index
    %14 = vector.load %arg5[%c0_7, %c4] : memref<256x36xbf16, #tpu.memory_space<vmem>>, vector<256x4xbf16>
    tpu.vector_store %arg5[%c0_7, %c4], %13 {strides = array<i32>} : memref<256x36xbf16, #tpu.memory_space<vmem>>, vector<256x4xbf16>,
    %c0_i32_8 = arith.constant 0 : i32
    %15 = arith.addi %0, %c0_i32_8 : i32
    %c0_9 = arith.constant 0 : index
    %16 = arith.index_cast %15 : i32 to index
    %c2 = arith.constant 2 : index
    %c0_10 = arith.constant 0 : index
    %17 = vector.load %arg2[%c0_9, %16, %c2, %c0_10] : memref<1x18x18x4xf32, #tpu.memory_space<vmem>>, vector<1x16x16x4xf32>
    %18 = vector.shape_cast %17 : vector<1x16x16x4xf32> to vector<16x16x4xf32>
    %19 = vector.shape_cast %18 : vector<16x16x4xf32> to vector<256x4xf32>
    %20 = arith.truncf %19 : vector<256x4xf32> to vector<256x4xbf16>
    %c0_11 = arith.constant 0 : index
    %c8 = arith.constant 8 : index
    %21 = vector.load %arg5[%c0_11, %c8] : memref<256x36xbf16, #tpu.memory_space<vmem>>, vector<256x4xbf16>
    tpu.vector_store %arg5[%c0_11, %c8], %20 {strides = array<i32>} : memref<256x36xbf16, #tpu.memory_space<vmem>>, vector<256x4xbf16>,
    %c1_i32 = arith.constant 1 : i32
    %22 = arith.addi %0, %c1_i32 : i32
    %c0_12 = arith.constant 0 : index
    %23 = arith.index_cast %22 : i32 to index
    %c0_13 = arith.constant 0 : index
    %c0_14 = arith.constant 0 : index
    %24 = vector.load %arg2[%c0_12, %23, %c0_13, %c0_14] : memref<1x18x18x4xf32, #tpu.memory_space<vmem>>, vector<1x16x16x4xf32>
    %25 = vector.shape_cast %24 : vector<1x16x16x4xf32> to vector<16x16x4xf32>
    %26 = vector.shape_cast %25 : vector<16x16x4xf32> to vector<256x4xf32>
    %27 = arith.truncf %26 : vector<256x4xf32> to vector<256x4xbf16>
    %c0_15 = arith.constant 0 : index
    %c12 = arith.constant 12 : index
    %28 = vector.load %arg5[%c0_15, %c12] : memref<256x36xbf16, #tpu.memory_space<vmem>>, vector<256x4xbf16>
    tpu.vector_store %arg5[%c0_15, %c12], %27 {strides = array<i32>} : memref<256x36xbf16, #tpu.memory_space<vmem>>, vector<256x4xbf16>,
    %c1_i32_16 = arith.constant 1 : i32
    %29 = arith.addi %0, %c1_i32_16 : i32
    %c0_17 = arith.constant 0 : index
    %30 = arith.index_cast %29 : i32 to index
    %c1_18 = arith.constant 1 : index
    %c0_19 = arith.constant 0 : index
    %31 = vector.load %arg2[%c0_17, %30, %c1_18, %c0_19] : memref<1x18x18x4xf32, #tpu.memory_space<vmem>>, vector<1x16x16x4xf32>
    %32 = vector.shape_cast %31 : vector<1x16x16x4xf32> to vector<16x16x4xf32>
    %33 = vector.shape_cast %32 : vector<16x16x4xf32> to vector<256x4xf32>
    %34 = arith.truncf %33 : vector<256x4xf32> to vector<256x4xbf16>
    %c0_20 = arith.constant 0 : index
    %c16 = arith.constant 16 : index
    %35 = vector.load %arg5[%c0_20, %c16] : memref<256x36xbf16, #tpu.memory_space<vmem>>, vector<256x4xbf16>
    tpu.vector_store %arg5[%c0_20, %c16], %34 {strides = array<i32>} : memref<256x36xbf16, #tpu.memory_space<vmem>>, vector<256x4xbf16>,
    %c1_i32_21 = arith.constant 1 : i32
    %36 = arith.addi %0, %c1_i32_21 : i32
    %c0_22 = arith.constant 0 : index
    %37 = arith.index_cast %36 : i32 to index
    %c2_23 = arith.constant 2 : index
    %c0_24 = arith.constant 0 : index
    %38 = vector.load %arg2[%c0_22, %37, %c2_23, %c0_24] : memref<1x18x18x4xf32, #tpu.memory_space<vmem>>, vector<1x16x16x4xf32>
    %39 = vector.shape_cast %38 : vector<1x16x16x4xf32> to vector<16x16x4xf32>
    %40 = vector.shape_cast %39 : vector<16x16x4xf32> to vector<256x4xf32>
    %41 = arith.truncf %40 : vector<256x4xf32> to vector<256x4xbf16>
    %c0_25 = arith.constant 0 : index
    %c20 = arith.constant 20 : index
    %42 = vector.load %arg5[%c0_25, %c20] : memref<256x36xbf16, #tpu.memory_space<vmem>>, vector<256x4xbf16>
    tpu.vector_store %arg5[%c0_25, %c20], %41 {strides = array<i32>} : memref<256x36xbf16, #tpu.memory_space<vmem>>, vector<256x4xbf16>,
    %c2_i32 = arith.constant 2 : i32
    %43 = arith.addi %0, %c2_i32 : i32
    %c0_26 = arith.constant 0 : index
    %44 = arith.index_cast %43 : i32 to index
    %c0_27 = arith.constant 0 : index
    %c0_28 = arith.constant 0 : index
    %45 = vector.load %arg2[%c0_26, %44, %c0_27, %c0_28] : memref<1x18x18x4xf32, #tpu.memory_space<vmem>>, vector<1x16x16x4xf32>
    %46 = vector.shape_cast %45 : vector<1x16x16x4xf32> to vector<16x16x4xf32>
    %47 = vector.shape_cast %46 : vector<16x16x4xf32> to vector<256x4xf32>
    %48 = arith.truncf %47 : vector<256x4xf32> to vector<256x4xbf16>
    %c0_29 = arith.constant 0 : index
    %c24 = arith.constant 24 : index
    %49 = vector.load %arg5[%c0_29, %c24] : memref<256x36xbf16, #tpu.memory_space<vmem>>, vector<256x4xbf16>
    tpu.vector_store %arg5[%c0_29, %c24], %48 {strides = array<i32>} : memref<256x36xbf16, #tpu.memory_space<vmem>>, vector<256x4xbf16>,
    %c2_i32_30 = arith.constant 2 : i32
    %50 = arith.addi %0, %c2_i32_30 : i32
    %c0_31 = arith.constant 0 : index
    %51 = arith.index_cast %50 : i32 to index
    %c1_32 = arith.constant 1 : index
    %c0_33 = arith.constant 0 : index
    %52 = vector.load %arg2[%c0_31, %51, %c1_32, %c0_33] : memref<1x18x18x4xf32, #tpu.memory_space<vmem>>, vector<1x16x16x4xf32>
    %53 = vector.shape_cast %52 : vector<1x16x16x4xf32> to vector<16x16x4xf32>
    %54 = vector.shape_cast %53 : vector<16x16x4xf32> to vector<256x4xf32>
    %55 = arith.truncf %54 : vector<256x4xf32> to vector<256x4xbf16>
    %c0_34 = arith.constant 0 : index
    %c28 = arith.constant 28 : index
    %56 = vector.load %arg5[%c0_34, %c28] : memref<256x36xbf16, #tpu.memory_space<vmem>>, vector<256x4xbf16>
    tpu.vector_store %arg5[%c0_34, %c28], %55 {strides = array<i32>} : memref<256x36xbf16, #tpu.memory_space<vmem>>, vector<256x4xbf16>,
    %c2_i32_35 = arith.constant 2 : i32
    %57 = arith.addi %0, %c2_i32_35 : i32
    %c0_36 = arith.constant 0 : index
    %58 = arith.index_cast %57 : i32 to index
    %c2_37 = arith.constant 2 : index
    %c0_38 = arith.constant 0 : index
    %59 = vector.load %arg2[%c0_36, %58, %c2_37, %c0_38] : memref<1x18x18x4xf32, #tpu.memory_space<vmem>>, vector<1x16x16x4xf32>
    %60 = vector.shape_cast %59 : vector<1x16x16x4xf32> to vector<16x16x4xf32>
    %61 = vector.shape_cast %60 : vector<16x16x4xf32> to vector<256x4xf32>
    %62 = arith.truncf %61 : vector<256x4xf32> to vector<256x4xbf16>
    %c0_39 = arith.constant 0 : index
    %c32 = arith.constant 32 : index
    %63 = vector.load %arg5[%c0_39, %c32] : memref<256x36xbf16, #tpu.memory_space<vmem>>, vector<256x4xbf16>
    tpu.vector_store %arg5[%c0_39, %c32], %62 {strides = array<i32>} : memref<256x36xbf16, #tpu.memory_space<vmem>>, vector<256x4xbf16>,
    %c0_40 = arith.constant 0 : index
    %c0_41 = arith.constant 0 : index
    %64 = vector.load %arg5[%c0_40, %c0_41] : memref<256x36xbf16, #tpu.memory_space<vmem>>, vector<256x36xbf16>
    %c0_42 = arith.constant 0 : index
    %c0_43 = arith.constant 0 : index
    %65 = vector.load %arg3[%c0_42, %c0_43] : memref<36x128xbf16, #tpu.memory_space<vmem>>, vector<36x128xbf16>
    %cst = arith.constant dense<0.000000e+00> : vector<256x128xf32>
    %66 = tpu.matmul %64, %65, %cst {dimension_numbers = #tpu.dot_dimension_numbers<[1], [0], [0], [1], [0, 0, 1, 1], [], []>} : vector<256x36xbf16>, vector<36x128xbf16>, vector<256x128xf32> -> vector<256x128xf32>
    %cst_44 = arith.constant dense<0.000000e+00> : vector<128xf32>
    %67 = vector.multi_reduction <add>, %66, %cst_44 [0] : vector<256x128xf32> to vector<128xf32>
    %68 = vector.shape_cast %67 : vector<128xf32> to vector<1x128xf32>
    %cst_45 = arith.constant 2.560000e+02 : f32
    %69 = vector.broadcast %cst_45 : f32 to vector<1x128xf32>
    %70 = arith.divf %68, %69 : vector<1x128xf32>
    %71 = vector.broadcast %70 : vector<1x128xf32> to vector<256x128xf32>
    %72 = arith.subf %66, %71 : vector<256x128xf32>
    %73 = arith.mulf %72, %72 : vector<256x128xf32>
    %cst_46 = arith.constant dense<0.000000e+00> : vector<128xf32>
    %74 = vector.multi_reduction <add>, %73, %cst_46 [0] : vector<256x128xf32> to vector<128xf32>
    %75 = vector.shape_cast %74 : vector<128xf32> to vector<1x128xf32>
    %cst_47 = arith.constant 0.000000e+00 : f32
    %76 = vector.broadcast %cst_47 : f32 to vector<6x128xf32>
    %77 = tpu.concatenate %68, %75, %76 in 0 : vector<1x128xf32>, vector<1x128xf32>, vector<6x128xf32> -> vector<8x128xf32>
    %c0_48 = arith.constant 0 : index
    %c0_49 = arith.constant 0 : index
    %c0_50 = arith.constant 0 : index
    %c0_51 = arith.constant 0 : index
    %78 = vector.load %arg4[%c0_48, %c0_49, %c0_50, %c0_51] : memref<1x1x8x128xf32, #tpu.memory_space<vmem>>, vector<1x1x8x128xf32>
    %79 = vector.shape_cast %78 : vector<1x1x8x128xf32> to vector<8x128xf32>
    %80 = vector.shape_cast %77 : vector<8x128xf32> to vector<1x1x8x128xf32>
    tpu.vector_store %arg4[%c0_48, %c0_49, %c0_50, %c0_51], %80 {strides = array<i32>} : memref<1x1x8x128xf32, #tpu.memory_space<vmem>>, vector<1x1x8x128xf32>,
    return
  }
  func.func @transform_0(%arg0: i32, %arg1: i32) -> (i32, i32, i32, i32) {
    %c0_i32 = arith.constant 0 : i32
    %c0_i32_0 = arith.constant 0 : i32
    %c0_i32_1 = arith.constant 0 : i32
    %c0_i32_2 = arith.constant 0 : i32
    return %arg0, %c0_i32, %c0_i32_0, %c0_i32_1 : i32, i32, i32, i32
  }
  func.func @transform_1(%arg0: i32, %arg1: i32) -> (i32, i32) {
    %c0_i32 = arith.constant 0 : i32
    %c0_i32_0 = arith.constant 0 : i32
    %c0_i32_1 = arith.constant 0 : i32
    return %c0_i32, %c0_i32_0 : i32, i32
  }
  func.func @transform_2(%arg0: i32, %arg1: i32) -> (i32, i32, i32, i32) {
    %c0_i32 = arith.constant 0 : i32
    %c0_i32_0 = arith.constant 0 : i32
    %c0_i32_1 = arith.constant 0 : i32
    return %arg0, %arg1, %c0_i32, %c0_i32_0 : i32, i32, i32, i32
  }
}

module attributes {stable_mosaic.version = 11 : i64} {
  func.func @_conv_bn_lrelu_kernel(%arg0: i32, %arg1: i32, %arg2: memref<1x18x18x4xf32, #tpu.memory_space<vmem>>, %arg3: memref<36x128xbf16, #tpu.memory_space<vmem>>, %arg4: memref<1x128xf32, #tpu.memory_space<vmem>>, %arg5: memref<1x128xf32, #tpu.memory_space<vmem>>, %arg6: memref<1x256x128xf32, #tpu.memory_space<vmem>>, %arg7: memref<256x36xbf16, #tpu.memory_space<vmem>>) attributes {dimension_semantics = [#tpu.dimension_semantics<parallel>, #tpu.dimension_semantics<parallel>], iteration_bounds = array<i64: 2, 1>, scalar_prefetch = 0 : i64, scratch_operands = 1 : i64, tpu.core_type = #tpu.core_type<tc>, window_params = [{transform_indices = @transform_0, window_bounds = array<i64: 1, 18, 18, 4>}, {pipeline_mode = #tpu.pipeline_mode<synchronous>, transform_indices = @transform_1, window_bounds = array<i64: 36, 128>}, {pipeline_mode = #tpu.pipeline_mode<synchronous>, transform_indices = @transform_2, window_bounds = array<i64: 1, 128>}, {pipeline_mode = #tpu.pipeline_mode<synchronous>, transform_indices = @transform_3, window_bounds = array<i64: 1, 128>}, {transform_indices = @transform_4, window_bounds = array<i64: 1, 256, 128>}]} {
    %c16_i32 = arith.constant 16 : i32
    %0 = arith.muli %arg1, %c16_i32 : i32
    %c0_i32 = arith.constant 0 : i32
    %1 = arith.addi %0, %c0_i32 : i32
    %c0 = arith.constant 0 : index
    %2 = arith.index_cast %1 : i32 to index
    %c0_0 = arith.constant 0 : index
    %c0_1 = arith.constant 0 : index
    %3 = vector.load %arg2[%c0, %2, %c0_0, %c0_1] : memref<1x18x18x4xf32, #tpu.memory_space<vmem>>, vector<1x16x16x4xf32>
    %4 = vector.shape_cast %3 : vector<1x16x16x4xf32> to vector<16x16x4xf32>
    %5 = vector.shape_cast %4 : vector<16x16x4xf32> to vector<256x4xf32>
    %6 = arith.truncf %5 : vector<256x4xf32> to vector<256x4xbf16>
    %c0_2 = arith.constant 0 : index
    %c0_3 = arith.constant 0 : index
    %7 = vector.load %arg7[%c0_2, %c0_3] : memref<256x36xbf16, #tpu.memory_space<vmem>>, vector<256x4xbf16>
    tpu.vector_store %arg7[%c0_2, %c0_3], %6 {strides = array<i32>} : memref<256x36xbf16, #tpu.memory_space<vmem>>, vector<256x4xbf16>,
    %c0_i32_4 = arith.constant 0 : i32
    %8 = arith.addi %0, %c0_i32_4 : i32
    %c0_5 = arith.constant 0 : index
    %9 = arith.index_cast %8 : i32 to index
    %c1 = arith.constant 1 : index
    %c0_6 = arith.constant 0 : index
    %10 = vector.load %arg2[%c0_5, %9, %c1, %c0_6] : memref<1x18x18x4xf32, #tpu.memory_space<vmem>>, vector<1x16x16x4xf32>
    %11 = vector.shape_cast %10 : vector<1x16x16x4xf32> to vector<16x16x4xf32>
    %12 = vector.shape_cast %11 : vector<16x16x4xf32> to vector<256x4xf32>
    %13 = arith.truncf %12 : vector<256x4xf32> to vector<256x4xbf16>
    %c0_7 = arith.constant 0 : index
    %c4 = arith.constant 4 : index
    %14 = vector.load %arg7[%c0_7, %c4] : memref<256x36xbf16, #tpu.memory_space<vmem>>, vector<256x4xbf16>
    tpu.vector_store %arg7[%c0_7, %c4], %13 {strides = array<i32>} : memref<256x36xbf16, #tpu.memory_space<vmem>>, vector<256x4xbf16>,
    %c0_i32_8 = arith.constant 0 : i32
    %15 = arith.addi %0, %c0_i32_8 : i32
    %c0_9 = arith.constant 0 : index
    %16 = arith.index_cast %15 : i32 to index
    %c2 = arith.constant 2 : index
    %c0_10 = arith.constant 0 : index
    %17 = vector.load %arg2[%c0_9, %16, %c2, %c0_10] : memref<1x18x18x4xf32, #tpu.memory_space<vmem>>, vector<1x16x16x4xf32>
    %18 = vector.shape_cast %17 : vector<1x16x16x4xf32> to vector<16x16x4xf32>
    %19 = vector.shape_cast %18 : vector<16x16x4xf32> to vector<256x4xf32>
    %20 = arith.truncf %19 : vector<256x4xf32> to vector<256x4xbf16>
    %c0_11 = arith.constant 0 : index
    %c8 = arith.constant 8 : index
    %21 = vector.load %arg7[%c0_11, %c8] : memref<256x36xbf16, #tpu.memory_space<vmem>>, vector<256x4xbf16>
    tpu.vector_store %arg7[%c0_11, %c8], %20 {strides = array<i32>} : memref<256x36xbf16, #tpu.memory_space<vmem>>, vector<256x4xbf16>,
    %c1_i32 = arith.constant 1 : i32
    %22 = arith.addi %0, %c1_i32 : i32
    %c0_12 = arith.constant 0 : index
    %23 = arith.index_cast %22 : i32 to index
    %c0_13 = arith.constant 0 : index
    %c0_14 = arith.constant 0 : index
    %24 = vector.load %arg2[%c0_12, %23, %c0_13, %c0_14] : memref<1x18x18x4xf32, #tpu.memory_space<vmem>>, vector<1x16x16x4xf32>
    %25 = vector.shape_cast %24 : vector<1x16x16x4xf32> to vector<16x16x4xf32>
    %26 = vector.shape_cast %25 : vector<16x16x4xf32> to vector<256x4xf32>
    %27 = arith.truncf %26 : vector<256x4xf32> to vector<256x4xbf16>
    %c0_15 = arith.constant 0 : index
    %c12 = arith.constant 12 : index
    %28 = vector.load %arg7[%c0_15, %c12] : memref<256x36xbf16, #tpu.memory_space<vmem>>, vector<256x4xbf16>
    tpu.vector_store %arg7[%c0_15, %c12], %27 {strides = array<i32>} : memref<256x36xbf16, #tpu.memory_space<vmem>>, vector<256x4xbf16>,
    %c1_i32_16 = arith.constant 1 : i32
    %29 = arith.addi %0, %c1_i32_16 : i32
    %c0_17 = arith.constant 0 : index
    %30 = arith.index_cast %29 : i32 to index
    %c1_18 = arith.constant 1 : index
    %c0_19 = arith.constant 0 : index
    %31 = vector.load %arg2[%c0_17, %30, %c1_18, %c0_19] : memref<1x18x18x4xf32, #tpu.memory_space<vmem>>, vector<1x16x16x4xf32>
    %32 = vector.shape_cast %31 : vector<1x16x16x4xf32> to vector<16x16x4xf32>
    %33 = vector.shape_cast %32 : vector<16x16x4xf32> to vector<256x4xf32>
    %34 = arith.truncf %33 : vector<256x4xf32> to vector<256x4xbf16>
    %c0_20 = arith.constant 0 : index
    %c16 = arith.constant 16 : index
    %35 = vector.load %arg7[%c0_20, %c16] : memref<256x36xbf16, #tpu.memory_space<vmem>>, vector<256x4xbf16>
    tpu.vector_store %arg7[%c0_20, %c16], %34 {strides = array<i32>} : memref<256x36xbf16, #tpu.memory_space<vmem>>, vector<256x4xbf16>,
    %c1_i32_21 = arith.constant 1 : i32
    %36 = arith.addi %0, %c1_i32_21 : i32
    %c0_22 = arith.constant 0 : index
    %37 = arith.index_cast %36 : i32 to index
    %c2_23 = arith.constant 2 : index
    %c0_24 = arith.constant 0 : index
    %38 = vector.load %arg2[%c0_22, %37, %c2_23, %c0_24] : memref<1x18x18x4xf32, #tpu.memory_space<vmem>>, vector<1x16x16x4xf32>
    %39 = vector.shape_cast %38 : vector<1x16x16x4xf32> to vector<16x16x4xf32>
    %40 = vector.shape_cast %39 : vector<16x16x4xf32> to vector<256x4xf32>
    %41 = arith.truncf %40 : vector<256x4xf32> to vector<256x4xbf16>
    %c0_25 = arith.constant 0 : index
    %c20 = arith.constant 20 : index
    %42 = vector.load %arg7[%c0_25, %c20] : memref<256x36xbf16, #tpu.memory_space<vmem>>, vector<256x4xbf16>
    tpu.vector_store %arg7[%c0_25, %c20], %41 {strides = array<i32>} : memref<256x36xbf16, #tpu.memory_space<vmem>>, vector<256x4xbf16>,
    %c2_i32 = arith.constant 2 : i32
    %43 = arith.addi %0, %c2_i32 : i32
    %c0_26 = arith.constant 0 : index
    %44 = arith.index_cast %43 : i32 to index
    %c0_27 = arith.constant 0 : index
    %c0_28 = arith.constant 0 : index
    %45 = vector.load %arg2[%c0_26, %44, %c0_27, %c0_28] : memref<1x18x18x4xf32, #tpu.memory_space<vmem>>, vector<1x16x16x4xf32>
    %46 = vector.shape_cast %45 : vector<1x16x16x4xf32> to vector<16x16x4xf32>
    %47 = vector.shape_cast %46 : vector<16x16x4xf32> to vector<256x4xf32>
    %48 = arith.truncf %47 : vector<256x4xf32> to vector<256x4xbf16>
    %c0_29 = arith.constant 0 : index
    %c24 = arith.constant 24 : index
    %49 = vector.load %arg7[%c0_29, %c24] : memref<256x36xbf16, #tpu.memory_space<vmem>>, vector<256x4xbf16>
    tpu.vector_store %arg7[%c0_29, %c24], %48 {strides = array<i32>} : memref<256x36xbf16, #tpu.memory_space<vmem>>, vector<256x4xbf16>,
    %c2_i32_30 = arith.constant 2 : i32
    %50 = arith.addi %0, %c2_i32_30 : i32
    %c0_31 = arith.constant 0 : index
    %51 = arith.index_cast %50 : i32 to index
    %c1_32 = arith.constant 1 : index
    %c0_33 = arith.constant 0 : index
    %52 = vector.load %arg2[%c0_31, %51, %c1_32, %c0_33] : memref<1x18x18x4xf32, #tpu.memory_space<vmem>>, vector<1x16x16x4xf32>
    %53 = vector.shape_cast %52 : vector<1x16x16x4xf32> to vector<16x16x4xf32>
    %54 = vector.shape_cast %53 : vector<16x16x4xf32> to vector<256x4xf32>
    %55 = arith.truncf %54 : vector<256x4xf32> to vector<256x4xbf16>
    %c0_34 = arith.constant 0 : index
    %c28 = arith.constant 28 : index
    %56 = vector.load %arg7[%c0_34, %c28] : memref<256x36xbf16, #tpu.memory_space<vmem>>, vector<256x4xbf16>
    tpu.vector_store %arg7[%c0_34, %c28], %55 {strides = array<i32>} : memref<256x36xbf16, #tpu.memory_space<vmem>>, vector<256x4xbf16>,
    %c2_i32_35 = arith.constant 2 : i32
    %57 = arith.addi %0, %c2_i32_35 : i32
    %c0_36 = arith.constant 0 : index
    %58 = arith.index_cast %57 : i32 to index
    %c2_37 = arith.constant 2 : index
    %c0_38 = arith.constant 0 : index
    %59 = vector.load %arg2[%c0_36, %58, %c2_37, %c0_38] : memref<1x18x18x4xf32, #tpu.memory_space<vmem>>, vector<1x16x16x4xf32>
    %60 = vector.shape_cast %59 : vector<1x16x16x4xf32> to vector<16x16x4xf32>
    %61 = vector.shape_cast %60 : vector<16x16x4xf32> to vector<256x4xf32>
    %62 = arith.truncf %61 : vector<256x4xf32> to vector<256x4xbf16>
    %c0_39 = arith.constant 0 : index
    %c32 = arith.constant 32 : index
    %63 = vector.load %arg7[%c0_39, %c32] : memref<256x36xbf16, #tpu.memory_space<vmem>>, vector<256x4xbf16>
    tpu.vector_store %arg7[%c0_39, %c32], %62 {strides = array<i32>} : memref<256x36xbf16, #tpu.memory_space<vmem>>, vector<256x4xbf16>,
    %c0_40 = arith.constant 0 : index
    %c0_41 = arith.constant 0 : index
    %64 = vector.load %arg7[%c0_40, %c0_41] : memref<256x36xbf16, #tpu.memory_space<vmem>>, vector<256x36xbf16>
    %c0_42 = arith.constant 0 : index
    %c0_43 = arith.constant 0 : index
    %65 = vector.load %arg3[%c0_42, %c0_43] : memref<36x128xbf16, #tpu.memory_space<vmem>>, vector<36x128xbf16>
    %cst = arith.constant dense<0.000000e+00> : vector<256x128xf32>
    %66 = tpu.matmul %64, %65, %cst {dimension_numbers = #tpu.dot_dimension_numbers<[1], [0], [0], [1], [0, 0, 1, 1], [], []>} : vector<256x36xbf16>, vector<36x128xbf16>, vector<256x128xf32> -> vector<256x128xf32>
    %c0_44 = arith.constant 0 : index
    %c0_45 = arith.constant 0 : index
    %67 = vector.load %arg4[%c0_44, %c0_45] : memref<1x128xf32, #tpu.memory_space<vmem>>, vector<1x128xf32>
    %68 = vector.broadcast %67 : vector<1x128xf32> to vector<256x128xf32>
    %69 = arith.mulf %66, %68 : vector<256x128xf32>
    %c0_46 = arith.constant 0 : index
    %c0_47 = arith.constant 0 : index
    %70 = vector.load %arg5[%c0_46, %c0_47] : memref<1x128xf32, #tpu.memory_space<vmem>>, vector<1x128xf32>
    %71 = vector.broadcast %70 : vector<1x128xf32> to vector<256x128xf32>
    %72 = arith.addf %69, %71 : vector<256x128xf32>
    %cst_48 = arith.constant 0.000000e+00 : f32
    %73 = vector.broadcast %cst_48 : f32 to vector<256x128xf32>
    %74 = arith.cmpf ogt, %72, %73 : vector<256x128xf32>
    %cst_49 = arith.constant 1.000000e-01 : f32
    %75 = vector.broadcast %cst_49 : f32 to vector<256x128xf32>
    %76 = arith.mulf %75, %72 : vector<256x128xf32>
    %77 = arith.select %74, %72, %76 : vector<256x128xi1>, vector<256x128xf32>
    %c0_50 = arith.constant 0 : index
    %c0_51 = arith.constant 0 : index
    %c0_52 = arith.constant 0 : index
    %78 = vector.load %arg6[%c0_50, %c0_51, %c0_52] : memref<1x256x128xf32, #tpu.memory_space<vmem>>, vector<1x256x128xf32>
    %79 = vector.shape_cast %78 : vector<1x256x128xf32> to vector<256x128xf32>
    %80 = vector.shape_cast %77 : vector<256x128xf32> to vector<1x256x128xf32>
    tpu.vector_store %arg6[%c0_50, %c0_51, %c0_52], %80 {strides = array<i32>} : memref<1x256x128xf32, #tpu.memory_space<vmem>>, vector<1x256x128xf32>,
    return
  }
  func.func @transform_0(%arg0: i32, %arg1: i32) -> (i32, i32, i32, i32) {
    %c0_i32 = arith.constant 0 : i32
    %c0_i32_0 = arith.constant 0 : i32
    %c0_i32_1 = arith.constant 0 : i32
    %c0_i32_2 = arith.constant 0 : i32
    return %arg0, %c0_i32, %c0_i32_0, %c0_i32_1 : i32, i32, i32, i32
  }
  func.func @transform_1(%arg0: i32, %arg1: i32) -> (i32, i32) {
    %c0_i32 = arith.constant 0 : i32
    %c0_i32_0 = arith.constant 0 : i32
    %c0_i32_1 = arith.constant 0 : i32
    return %c0_i32, %c0_i32_0 : i32, i32
  }
  func.func @transform_2(%arg0: i32, %arg1: i32) -> (i32, i32) {
    %c0_i32 = arith.constant 0 : i32
    %c0_i32_0 = arith.constant 0 : i32
    %c0_i32_1 = arith.constant 0 : i32
    return %c0_i32, %c0_i32_0 : i32, i32
  }
  func.func @transform_3(%arg0: i32, %arg1: i32) -> (i32, i32) {
    %c0_i32 = arith.constant 0 : i32
    %c0_i32_0 = arith.constant 0 : i32
    %c0_i32_1 = arith.constant 0 : i32
    return %c0_i32, %c0_i32_0 : i32, i32
  }
  func.func @transform_4(%arg0: i32, %arg1: i32) -> (i32, i32, i32) {
    %c0_i32 = arith.constant 0 : i32
    %c0_i32_0 = arith.constant 0 : i32
    return %arg0, %arg1, %c0_i32 : i32, i32, i32
  }
}

</mosaic_0001>

<bundles_post_ra>
// kernel: conv_bn_relu.3
= control target key start
LH: loop header
LB: loop body
LE: loop exit
PB: predicated region body
PF: predicated region fallthrough
CT: control target
= control target key end

     0   :  { %s2257_s15 = smov 0   ;;  %s2259_s16 = smov 0   ;;  %s2966_s0 = inlined_call_operand.vmem [shape: f32[2,18,18,4], index: 0, kind: input, shape index: {}]   ;;  %s2967_s1 = inlined_call_operand.vmem [shape: bf16[36,128], index: 1, kind: input, shape index: {}]   ;;  %s2968_s2 = inlined_call_operand.vmem [shape: f32[1,128], index: 2, kind: input, shape index: {}]   ;;  %s2969_s3 = inlined_call_operand.vmem [shape: f32[1,128], index: 3, kind: input, shape index: {}]   ;;  %s2970_s4 = inlined_call_operand.vmem [shape: f32[2,256,128], index: 4, kind: output, shape index: {}]  }
   0x1   :  { %s2261_s17 = smov 0  }
   0x2 LB: > { %s26_s18 = sadd.s32 1, %s2218_s16  ;;  %p1879_p0 = scmp.ge.s32.totalorder %s2222_s17, 1  ;;  %s2222_s17 = sphi %s2261_s17, %s14_s17   ;;  %s2218_s16 = sphi %s2259_s16, %s2972_s16   ;;  %s2214_s15 = sphi %s2257_s15, %s2971_s15  }
   0x3   : > { %p28_p1 = scmp.ge.s32.totalorder %s26_s18, 2  ;;  %p176_p2 = scmp.lt.s32.totalorder %s2222_s17, 3 }
   0x5   : > { %s2974_s18 = smov (%p28_p1, %s26_s18), 0  ;;  %p177_p3 = pnand %p1879_p0, %p176_p2 }
   0x6   : > { %p206_p4 = scmp.lt.s32.totalorder (!%p177_p3), %s2214_s15, 1  ;;  %s2224_s23 = smov (!%p177_p3), 4   ;;  %vm273_vm0 = vcmask (!%p177_p3), 31744   ;;  %vm1413_vm1 = vcmask (!%p177_p3), 1041408   ;;  %vm402_vm2 = vcmask (!%p177_p3), 64544   ;;  %vm531_vm3 = vcmask (!%p177_p3), 97344  }
   0x7   : > { %180 = sbr.rel (%p177_p3) target bundleno = 624 (0x270), region = 36  ;;  %s2225_s24 = smov (!%p177_p3), 8   ;;  %vm663_vm4 = vcmask (!%p177_p3), 130144   ;;  %vm792_vm5 = vcmask (!%p177_p3), 162944   ;;  %vm921_vm6 = vcmask (!%p177_p3), 195744   ;;  %vm1053_vm7 = vcmask (!%p177_p3), 228544  }
   0x8   : > { %s2226_s25 = smov (!%p177_p3), 12   ;;  %s2227_s26 = smov (!%p177_p3), 16   ;;  %vm1182_vm8 = vcmask (!%p177_p3), 261344   ;;  %vm1311_vm9 = vcmask (!%p177_p3), 294144   ;;  %vm1364_vm10 = vcmask (!%p177_p3), 293888  }
   0x9   : > { %s2228_s27 = smov (!%p177_p3), 20   ;;  %s2229_s28 = smov (!%p177_p3), 24  }
   0xa   : > { %s2230_s5 = smov (!%p177_p3), 28   ;;  %s2231_s10 = smov (!%p177_p3), 32  }
   0xe   : > { %s2976_s15 = smov (!%p206_p4, %s2214_s15), 1 }
   0xf   : > { %s2164_s19 = smul.u32 432, %s2976_s15 }
  0x11   : > { %s2281_s22 = scalar_lea.vmem %s2966_s0, %s2164_s19  ;;  %s2098_s19 = sshll.u32 %s2976_s15, 8 }
  0x12   : > { %v292_v0 = vld [vmem:[%s2281_s22 + $0x19] sm:$0xff]  ;;  %v293_v1 = vld [vmem:[%s2281_s22 + $0x21] sm:$0xff]  ;;  %v291_v4 = vld [vmem:[%s2281_s22 + $0x9] sm:$0xff]  ;;  %s2869_s21 = scalar_lea.vmem %s2970_s4, %s2098_s19 }
  0x13   : > { %v290_v2 = vld [vmem:[%s2281_s22 + $0x1] sm:$0xff]  ;;  %v2286_v3 = vpack.c.bf16 %v293_v1, %v292_v0  ;;  %v308_v5 = vld [vmem:[%s2281_s22 + $0xd9] sm:$0xff]  ;;  %v307_v9 = vld [vmem:[%s2281_s22 + $0xc9] sm:$0xff] }
  0x14   : > { %v309_v6 = vld [vmem:[%s2281_s22 + $0xe1] sm:$0xff]  ;;  %v322_v7 = vpack.c.bf16 %v291_v4, %v290_v2  ;;  %v436_v13 = vld [vmem:[%s2281_s22 + $0xca] sm:$0xff]  ;;  %v1899_v16 = vld [vmem:[%s2281_s22 + $0xd8] sm:$0xff] }
  0x15   : > { %v306_v8 = vld [vmem:[%s2281_s22 + $0xc1] sm:$0xff]  ;;  %356 = vrot.lane.b32.xlu1 %v2286_v3, %s2224_s23  ;;  %v2295_v10 = vpack.c.bf16 %v309_v6, %v308_v5  ;;  %v420_v15 = vld [vmem:[%s2281_s22 + $0xa] sm:$0xff]  ;;  %v1883_v19 = vld [vmem:[%s2281_s22 + $0x18] sm:$0xff] }
  0x16   : > { %354 = vrot.lane.b32.xlu0 %v322_v7, %s2224_s23  ;;  %v330_v11 = vpack.c.bf16 %v307_v9, %v306_v8  ;;  %v435_v12 = vld [vmem:[%s2281_s22 + $0xc2] sm:$0xff]  ;;  %v1901_v21 = vld [vmem:[%s2281_s22 + $0xf0] sm:$0xff]  ;;  %v1902_v24 = vld [vmem:[%s2281_s22 + $0xf8] sm:$0xff] }
  0x17   : > { %v419_v14 = vld [vmem:[%s2281_s22 + $0x2] sm:$0xff]  ;;  %v459_v22 = vpack.c.bf16 %v436_v13, %v435_v12  ;;  %v1885_v25 = vld [vmem:[%s2281_s22 + $0x30] sm:$0xff]  ;;  %v1886_v26 = vld [vmem:[%s2281_s22 + $0x38] sm:$0xff]  ;;  %v2315_v30 = vpack.c.bf16 %v1902_v24, %v1901_v21 }
  0x18   : > { %v1900_v17 = vld [vmem:[%s2281_s22 + $0xe0] sm:$0xff]  ;;  %v451_v27 = vpack.c.bf16 %v420_v15, %v419_v14  ;;  %v2317_v31 = vpack.c.bf16 %v1886_v26, %v1885_v25  ;;  %v1997_v34 = vld [vmem:[%s2281_s22 + $0x108] sm:$0xff]  ;;  %v1998_v36 = vld [vmem:[%s2281_s22 + $0x110] sm:$0xff] }
  0x19   : > { %v591_v18 = vpack.c.bf16 %v1900_v17, %v1899_v16  ;;  %v1884_v20 = vld [vmem:[%s2281_s22 + $0x20] sm:$0xff]  ;;  %372 = vrot.lane.b32.xlu1 %v2295_v10, %s2224_s23  ;;  %284 = vst.msk [vmem:[#allocation2 + $0x50] sm:$0xff] %vm273_vm0, %v2315_v30  ;;  %v1981_v37 = vld [vmem:[%s2281_s22 + $0x48] sm:$0xff]  ;;  %v1982_v38 = vld [vmem:[%s2281_s22 + $0x50] sm:$0xff]  ;;  %v2335_v40 = vpack.c.bf16 %v1998_v36, %v1997_v34 }
  0x1a   : > { %v583_v23 = vpack.c.bf16 %v1884_v20, %v1883_v19  ;;  %370 = vrot.lane.b32.xlu0 %v330_v11, %s2224_s23  ;;  %v437_v28 = vld [vmem:[%s2281_s22 + $0xda] sm:$0xff]  ;;  %v438_v29 = vld [vmem:[%s2281_s22 + $0xe2] sm:$0xff]  ;;  %276 = vst.msk [vmem:[#allocation2 + $0x10] sm:$0xff] %vm273_vm0, %v2317_v31  ;;  %v2337_v41 = vpack.c.bf16 %v1982_v38, %v1981_v37  ;;  %v1933_v59 = vld [vmem:[%s2281_s22 + $0xf1] sm:$0xff] }
  0x1b   : > { %283 = vst.msk [vmem:[#allocation2 + $0x48] sm:$0xff] %vm273_vm0, %v591_v18  ;;  %v421_v32 = vld [vmem:[%s2281_s22 + $0x1a] sm:$0xff]  ;;  %v422_v33 = vld [vmem:[%s2281_s22 + $0x22] sm:$0xff]  ;;  %v2329_v35 = vpack.c.bf16 %v438_v29, %v437_v28  ;;  %285 = vst.msk [vmem:[#allocation2 + $0x58] sm:$0xff] %vm273_vm0, %v2335_v40 }
  0x1c   : > { %275 = vst.msk [vmem:[#allocation2 + $0x8] sm:$0xff] %vm273_vm0, %v583_v23  ;;  %v452_v39 = vpack.c.bf16 %v422_v33, %v421_v32  ;;  %v1905_v42 = vld [vmem:[%s2281_s22 + $0x120] sm:$0xff]  ;;  %277 = vst.msk [vmem:[#allocation2 + $0x18] sm:$0xff] %vm273_vm0, %v2337_v41  ;;  %v1906_v43 = vld [vmem:[%s2281_s22 + $0x128] sm:$0xff] }
  0x1d   : > { %499 = vrot.lane.b32.xlu1 %v459_v22, %s2225_s24  ;;  %v1889_v44 = vld [vmem:[%s2281_s22 + $0x60] sm:$0xff]  ;;  %v1890_v45 = vld [vmem:[%s2281_s22 + $0x68] sm:$0xff]  ;;  %v2350_v46 = vpack.c.bf16 %v1906_v43, %v1905_v42  ;;  %v2001_v48 = vld [vmem:[%s2281_s22 + $0x138] sm:$0xff] }
  0x1e   : > { %483 = vrot.lane.b32.xlu0 %v451_v27, %s2225_s24  ;;  %v2352_v47 = vpack.c.bf16 %v1890_v45, %v1889_v44  ;;  %v2002_v49 = vld [vmem:[%s2281_s22 + $0x140] sm:$0xff]  ;;  %v1985_v50 = vld [vmem:[%s2281_s22 + $0x78] sm:$0xff]  ;;  %v226_v55 = vld [vmem:[%s2281_s22 + $0x8] sm:$0xff] }
  0x1f   : > { %286 = vst.msk [vmem:[#allocation2 + $0x60] sm:$0xff] %vm273_vm0, %v2350_v46  ;;  %v1986_v51 = vld [vmem:[%s2281_s22 + $0x80] sm:$0xff]  ;;  %v2364_v52 = vpack.c.bf16 %v2002_v49, %v2001_v48  ;;  %v242_v58 = vld [vmem:[%s2281_s22 + $0xc8] sm:$0xff]  ;;  %v1909_v62 = vld [vmem:[%s2281_s22 + $0x150] sm:$0xff] }
  0x20   : > { %278 = vst.msk [vmem:[#allocation2 + $0x20] sm:$0xff] %vm273_vm0, %v2352_v47  ;;  %v2366_v53 = vpack.c.bf16 %v1986_v51, %v1985_v50  ;;  %v225_v54 = vld [vmem:[%s2281_s22] sm:$0xff]  ;;  %v1910_v63 = vld [vmem:[%s2281_s22 + $0x158] sm:$0xff]  ;;  %v1893_v0 = vld [vmem:[%s2281_s22 + $0x90] sm:$0xff] }
  0x21   : > { %501 = vrot.lane.b32.xlu1 %v2329_v35, %s2225_s24  ;;  %v257_v56 = vpack.c.bf16 %v226_v55, %v225_v54  ;;  %v241_v57 = vld [vmem:[%s2281_s22 + $0xc0] sm:$0xff]  ;;  %287 = vst.msk [vmem:[#allocation2 + $0x68] sm:$0xff] %vm273_vm0, %v2364_v52  ;;  %v1917_v1 = vld [vmem:[%s2281_s22 + $0x31] sm:$0xff]  ;;  %v2392_v4 = vpack.c.bf16 %v1910_v63, %v1909_v62  ;;  %v2005_v14 = vld [vmem:[%s2281_s22 + $0x168] sm:$0xff] }
  0x22   : > { %485 = vrot.lane.b32.xlu0 %v452_v39, %s2225_s24  ;;  %279 = vst.msk [vmem:[#allocation2 + $0x28] sm:$0xff] %vm273_vm0, %v2366_v53  ;;  %v1934_v60 = vld [vmem:[%s2281_s22 + $0xf9] sm:$0xff]  ;;  %v2381_v61 = vpack.c.bf16 %v242_v58, %v241_v57  ;;  %v2006_v15 = vld [vmem:[%s2281_s22 + $0x170] sm:$0xff]  ;;  %v1989_v16 = vld [vmem:[%s2281_s22 + $0xa8] sm:$0xff] }
  0x23   : > { %274 = vst.msk [vmem:[#allocation2] sm:$0xff] %vm273_vm0, %v257_v56  ;;  %v1918_v2 = vld [vmem:[%s2281_s22 + $0x39] sm:$0xff]  ;;  %v2399_v7 = vpack.c.bf16 %v1934_v60, %v1933_v59  ;;  %288 = vst.msk [vmem:[#allocation2 + $0x70] sm:$0xff] %vm273_vm0, %v2392_v4  ;;  %v2429_v17 = vpack.c.bf16 %v2006_v15, %v2005_v14  ;;  %v2029_v20 = vld [vmem:[%s2281_s22 + $0x109] sm:$0xff] }
  0x24   : > { %282 = vst.msk [vmem:[#allocation2 + $0x40] sm:$0xff] %vm273_vm0, %v2381_v61  ;;  %v1894_v5 = vld [vmem:[%s2281_s22 + $0x98] sm:$0xff]  ;;  %v2405_v8 = vpack.c.bf16 %v1918_v2, %v1917_v1  ;;  %v2013_v22 = vld [vmem:[%s2281_s22 + $0x49] sm:$0xff]  ;;  %v2197_v24 = vld [vmem:[%s2967_s1] sm:$0xff]  }
  0x25   : > { %631 = vrot.lane.b32.xlu1 %v591_v18, %s2226_s25  ;;  %v2395_v6 = vpack.c.bf16 %v1894_v5, %v1893_v0  ;;  %v1965_v9 = vld [vmem:[%s2281_s22 + $0xf2] sm:$0xff]  ;;  %v1950_v12 = vld [vmem:[%s2281_s22 + $0x3a] sm:$0xff]  ;;  %289 = vst.msk [vmem:[#allocation2 + $0x78] sm:$0xff] %vm273_vm0, %v2429_v17  ;;  %2118 = vmatprep.subr.bf16.mxu0 %v2197_v24  ;;  %v2198_v27 = vld [vmem:[%s2967_s1 + $0x8] sm:$0xff]  }
  0x26   : > { %615 = vrot.lane.b32.xlu0 %v583_v23, %s2226_s25  ;;  %v1949_v11 = vld [vmem:[%s2281_s22 + $0x32] sm:$0xff]  ;;  %2156 = vmatprep.subr.bf16.mxu1 %v2197_v24  ;;  %v2199_v28 = vld [vmem:[%s2967_s1 + $0x10] ss:$0 sps:$4 sm:$0x33]   ;;  %v1937_v36 = vld [vmem:[%s2281_s22 + $0x121] sm:$0xff] }
  0x27   : > { %280 = vst.msk [vmem:[#allocation2 + $0x30] sm:$0xff] %vm273_vm0, %v2395_v6  ;;  %v842_v13 = vpack.c.bf16 %v1950_v12, %v1949_v11  ;;  %v1990_v18 = vld [vmem:[%s2281_s22 + $0xb0] sm:$0xff]  ;;  %2119 = vmatpush3.bf16.msra.mxu0 %v2197_v24  ;;  %2159 = vmatpush3.bf16.msra.mxu1 %v2197_v24  ;;  %v1415_v29 = vsel %vm1413_vm1, %v2199_v28, 0  ;;  %v1921_v38 = vld [vmem:[%s2281_s22 + $0x61] sm:$0xff]  ;;  %v2033_v50 = vld [vmem:[%s2281_s22 + $0x139] sm:$0xff] }
  0x28   : > { %v2434_v19 = vpack.c.bf16 %v1990_v18, %v1989_v16  ;;  %v2030_v21 = vld [vmem:[%s2281_s22 + $0x111] sm:$0xff]  ;;  %2120 = vmatprep.subr.bf16.mxu0 %v2198_v27  ;;  %2157 = vmatprep.subr.bf16.mxu1 %v2198_v27  ;;  %v1938_v37 = vld [vmem:[%s2281_s22 + $0x129] sm:$0xff]  ;;  %v2034_v51 = vld [vmem:[%s2281_s22 + $0x141] sm:$0xff] }
  0x29   : > { %633 = vrot.lane.b32.xlu1 %v2315_v30, %s2226_s25  ;;  %v2014_v23 = vld [vmem:[%s2281_s22 + $0x51] sm:$0xff]  ;;  %v1111_v25 = vpack.c.bf16 %v2030_v21, %v2029_v20  ;;  %v723_v42 = vpack.c.bf16 %v1938_v37, %v1937_v36  ;;  %v1953_v44 = vld [vmem:[%s2281_s22 + $0x62] sm:$0xff]  ;;  %v2017_v54 = vld [vmem:[%s2281_s22 + $0x79] sm:$0xff]  ;;  %v2516_v56 = vpack.c.bf16 %v2034_v51, %v2033_v50 }
  0x2a   : > { %617 = vrot.lane.b32.xlu0 %v2317_v31, %s2226_s25  ;;  %281 = vst.msk [vmem:[#allocation2 + $0x38] sm:$0xff] %vm273_vm0, %v2434_v19  ;;  %v1103_v26 = vpack.c.bf16 %v2014_v23, %v2013_v22  ;;  %v2045_v32 = vld [vmem:[%s2281_s22 + $0x4a] sm:$0xff]  ;;  %v2046_v33 = vld [vmem:[%s2281_s22 + $0x52] sm:$0xff]  ;;  %v2018_v55 = vld [vmem:[%s2281_s22 + $0x81] sm:$0xff] }
  0x2b   : > { %2121 = vmatpush3.bf16.msra.mxu0 %v2198_v27  ;;  %2160 = vmatpush3.bf16.msra.mxu1 %v2198_v27  ;;  %v1970_v43 = vld [vmem:[%s2281_s22 + $0x12a] sm:$0xff]  ;;  %v2065_v60 = vld [vmem:[%s2281_s22 + $0x13a] sm:$0xff]  ;;  %v2066_v62 = vld [vmem:[%s2281_s22 + $0x142] sm:$0xff] }
  0x2c   : > { %2162 = vmatprep.subr.msk.bf16.mxu0 %vm1413_vm1, %v2199_v28  ;;  %2163 = vmatprep.subr.msk.bf16.mxu1 %vm1413_vm1, %v2199_v28  ;;  %v1954_v45 = vld [vmem:[%s2281_s22 + $0x6a] sm:$0xff]  ;;  %v2049_v0 = vld [vmem:[%s2281_s22 + $0x7a] sm:$0xff]  ;;  %v2050_v1 = vld [vmem:[%s2281_s22 + $0x82] sm:$0xff]  ;;  %v2538_v5 = vpack.c.bf16 %v2066_v62, %v2065_v60 }
  0x2d   : > { %760 = vrot.lane.b32.xlu1 %v2295_v10, %s2227_s26  ;;  %v1966_v10 = vld [vmem:[%s2281_s22 + $0xfa] sm:$0xff]  ;;  %v844_v49 = vpack.c.bf16 %v1954_v45, %v1953_v44  ;;  %v1941_v21 = vld [vmem:[%s2281_s22 + $0x151] sm:$0xff] }
  0x2e   : > { %744 = vrot.lane.b32.xlu0 %v2286_v3, %s2227_s26  ;;  %v850_v3 = vpack.c.bf16 %v1966_v10, %v1965_v9  ;;  %v1942_v22 = vld [vmem:[%s2281_s22 + $0x159] sm:$0xff]  ;;  %v2038_v44 = vld [vmem:[%s2281_s22 + $0x171] sm:$0xff] }
  0x2f   : > { %2123 = vmatpush3.bf16.msra.mxu0 %v1415_v29  ;;  %2161 = vmatpush3.bf16.msra.mxu1 %v1415_v29  ;;  %v1926_v24 = vld [vmem:[%s2281_s22 + $0x99] sm:$0xff]  ;;  %v2053_v62 = vld [vmem:[%s2281_s22 + $0xaa] sm:$0xff] }
  0x30   : > { %v1973_v29 = vld [vmem:[%s2281_s22 + $0x152] sm:$0xff] }
  0x31   : > { %762 = vrot.lane.b32.xlu1 %v2399_v7, %s2227_s26 }
  0x32   : > { %746 = vrot.lane.b32.xlu0 %v2405_v8, %s2227_s26 }
  0x35   : > { %889 = vrot.lane.b32.xlu1 %v2329_v35, %s2228_s27  ;;  %v1232_v35 = vpack.c.bf16 %v2046_v33, %v2045_v32  ;;  %v1957_v32 = vld [vmem:[%s2281_s22 + $0x92] sm:$0xff]  ;;  %v1958_v33 = vld [vmem:[%s2281_s22 + $0x9a] sm:$0xff] }
  0x36   : > { %873 = vrot.lane.b32.xlu0 %v452_v39, %s2228_s27  ;;  %v1922_v39 = vld [vmem:[%s2281_s22 + $0x69] sm:$0xff]  ;;  %v2609_v36 = vpack.c.bf16 %v1958_v33, %v1957_v32 }
  0x37   : > { %v1961_v32 = vld [vmem:[%s2281_s22 + $0xc2] sm:$0xff]  ;;  %v1962_v33 = vld [vmem:[%s2281_s22 + $0xca] sm:$0xff] }
  0x39   : > { %891 = vrot.lane.b32.xlu1 %v850_v3, %s2228_s27 }
  0x3a   : > { %875 = vrot.lane.b32.xlu0 %v842_v13, %s2228_s27 }
  0x3d   : > { %1021 = vrot.lane.b32.xlu1 %v2315_v30, %s2229_s28  ;;  %v2061_v30 = vld [vmem:[%s2281_s22 + $0x10a] sm:$0xff] }
  0x3e   : > { %1005 = vrot.lane.b32.xlu0 %v2317_v31, %s2229_s28  ;;  %v2062_v31 = vld [vmem:[%s2281_s22 + $0x112] sm:$0xff] }
  0x3f   : > { %v1240_v34 = vpack.c.bf16 %v2062_v31, %v2061_v30  ;;  %v1974_v30 = vld [vmem:[%s2281_s22 + $0x15a] sm:$0xff] }
  0x41   : > { %1023 = vrot.lane.b32.xlu1 %v2335_v40, %s2229_s28 }
  0x42   : > { %1007 = vrot.lane.b32.xlu0 %v2337_v41, %s2229_s28 }
  0x45   : > { %1150 = vrot.lane.b32.xlu1 %v2399_v7, %s2230_s5 }
  0x46   : > { %1134 = vrot.lane.b32.xlu0 %v2405_v8, %s2230_s5 }
  0x49   : > { %1152 = vrot.lane.b32.xlu1 %v1111_v25, %s2230_s5 }
  0x4a   : > { %1136 = vrot.lane.b32.xlu0 %v1103_v26, %s2230_s5 }
  0x4d   : > { %1279 = vrot.lane.b32.xlu1 %v850_v3, %s2231_s10 }
  0x4e   : > { %1263 = vrot.lane.b32.xlu0 %v842_v13, %s2231_s10 }
  0x51   : > { %374 = vrot.lane.b32.xlu1 %v2399_v7, %s2224_s23  ;;  %v2541_v7 = vpack.c.bf16 %v2050_v1, %v2049_v0 }
  0x52   : > { %358 = vrot.lane.b32.xlu0 %v2405_v8, %s2224_s23 }
  0x55   : > { %1281 = vrot.lane.b32.xlu1 %v1240_v34, %s2231_s10 }
  0x56   : > { %1265 = vrot.lane.b32.xlu0 %v1232_v35, %s2231_s10 }
  0x59   : > { %376 = vrot.lane.b32.xlu1 %v1111_v25, %s2224_s23 }
  0x5a   : > { %360 = vrot.lane.b32.xlu0 %v1103_v26, %s2224_s23 }
  0x5d   : > { %503 = vrot.lane.b32.xlu1 %v850_v3, %s2225_s24 }
  0x5e   : > { %487 = vrot.lane.b32.xlu0 %v842_v13, %s2225_s24 }
  0x61   : > { %505 = vrot.lane.b32.xlu1 %v1240_v34, %s2225_s24 }
  0x62   : > { %489 = vrot.lane.b32.xlu0 %v1232_v35, %s2225_s24 }
  0x65   : > { %635 = vrot.lane.b32.xlu1 %v2335_v40, %s2226_s25  ;;  %v715_v40 = vpack.c.bf16 %v1922_v39, %v1921_v38 }
  0x66   : > { %619 = vrot.lane.b32.xlu0 %v2337_v41, %s2226_s25  ;;  %v1969_v41 = vld [vmem:[%s2281_s22 + $0x122] sm:$0xff] }
  0x67   : > { %v852_v48 = vpack.c.bf16 %v1970_v43, %v1969_v41  ;;  %v2037_v43 = vld [vmem:[%s2281_s22 + $0x169] sm:$0xff] }
  0x69   : > { %637 = vrot.lane.b32.xlu1 %v2350_v46, %s2226_s25 }
  0x6a   : > { %621 = vrot.lane.b32.xlu0 %v2352_v47, %s2226_s25 }
  0x6d   : > { %764 = vrot.lane.b32.xlu1 %v1111_v25, %s2227_s26  ;;  %v2585_v25 = vpack.c.bf16 %v1942_v22, %v1941_v21 }
  0x6e   : > { %748 = vrot.lane.b32.xlu0 %v1103_v26, %s2227_s26 }
  0x71   : > { %766 = vrot.lane.b32.xlu1 %v723_v42, %s2227_s26 }
  0x72   : > { %750 = vrot.lane.b32.xlu0 %v715_v40, %s2227_s26 }
  0x75   : > { %893 = vrot.lane.b32.xlu1 %v1240_v34, %s2228_s27 }
  0x76   : > { %877 = vrot.lane.b32.xlu0 %v1232_v35, %s2228_s27  ;;  %v2605_v35 = vpack.c.bf16 %v1974_v30, %v1973_v29  ;;  %v1977_v29 = vld [vmem:[%s2281_s22 + $0x182] sm:$0xff]  ;;  %v1978_v30 = vld [vmem:[%s2281_s22 + $0x18a] sm:$0xff] }
  0x79   : > { %895 = vrot.lane.b32.xlu1 %v852_v48, %s2228_s27 }
  0x7a   : > { %879 = vrot.lane.b32.xlu0 %v844_v49, %s2228_s27 }
  0x7d   : > { %1025 = vrot.lane.b32.xlu1 %v2350_v46, %s2229_s28  ;;  %v2519_v46 = vpack.c.bf16 %v2018_v55, %v2017_v54 }
  0x7e   : > { %1009 = vrot.lane.b32.xlu0 %v2352_v47, %s2229_s28 }
  0x81   : > { %1027 = vrot.lane.b32.xlu1 %v2364_v52, %s2229_s28 }
  0x82   : > { %1011 = vrot.lane.b32.xlu0 %v2366_v53, %s2229_s28 }
  0x85   : > { %1154 = vrot.lane.b32.xlu1 %v723_v42, %s2230_s5 }
  0x86   : > { %1138 = vrot.lane.b32.xlu0 %v715_v40, %s2230_s5 }
  0x87   : > { %v357_v47 = vpop.permute.xlu1 %356 }
  0x88   : > { %404 = vst.msk [vmem:[#allocation2 + $0x8] sm:$0xff] %vm402_vm2, %v357_v47  ;;  %v355_v57 = vpop.permute.xlu0 %354 }
  0x89   : > { %403 = vst.msk [vmem:[#allocation2] sm:$0xff] %vm402_vm2, %v355_v57  ;;  %1156 = vrot.lane.b32.xlu1 %v2516_v56, %s2230_s5  ;;  %v2069_v57 = vld [vmem:[%s2281_s22 + $0x16a] sm:$0xff] }
  0x8a   : > { %1140 = vrot.lane.b32.xlu0 %v2519_v46, %s2230_s5 }
  0x8b   : > { %v373_v58 = vpop.permute.xlu1 %372 }
  0x8c   : > { %412 = vst.msk [vmem:[#allocation2 + $0x48] sm:$0xff] %vm402_vm2, %v373_v58  ;;  %v371_v59 = vpop.permute.xlu0 %370  ;;  %v2070_v58 = vld [vmem:[%s2281_s22 + $0x172] sm:$0xff] }
  0x8d   : > { %411 = vst.msk [vmem:[#allocation2 + $0x40] sm:$0xff] %vm402_vm2, %v371_v59  ;;  %1283 = vrot.lane.b32.xlu1 %v852_v48, %s2231_s10 }
  0x8e   : > { %1267 = vrot.lane.b32.xlu0 %v844_v49, %s2231_s10 }
  0x8f   : > { %v500_v63 = vpop.permute.xlu1 %499 }
  0x90   : > { %540 = vst.msk [vmem:[#allocation2 + $0x40] sm:$0xff] %vm531_vm3, %v500_v63  ;;  %v484_v2 = vpop.permute.xlu0 %483  ;;  %v2054_v63 = vld [vmem:[%s2281_s22 + $0xb2] sm:$0xff] }
  0x91   : > { %532 = vst.msk [vmem:[#allocation2] sm:$0xff] %vm531_vm3, %v484_v2  ;;  %378 = vrot.lane.b32.xlu1 %v723_v42, %s2224_s23  ;;  %v2667_v2 = vpack.c.bf16 %v2070_v58, %v2069_v57 }
  0x92   : > { %362 = vrot.lane.b32.xlu0 %v715_v40, %s2224_s23 }
  0x93   : > { %v502_v8 = vpop.permute.xlu1 %501 }
  0x94   : > { %541 = vst.msk [vmem:[#allocation2 + $0x48] sm:$0xff] %vm531_vm3, %v502_v8  ;;  %v486_v9 = vpop.permute.xlu0 %485 }
  0x95   : > { %533 = vst.msk [vmem:[#allocation2 + $0x8] sm:$0xff] %vm531_vm3, %v486_v9  ;;  %1285 = vrot.lane.b32.xlu1 %v2538_v5, %s2231_s10 }
  0x96   : > { %1269 = vrot.lane.b32.xlu0 %v2541_v7, %s2231_s10 }
  0x97   : > { %v632_v10 = vpop.permute.xlu1 %631 }
  0x98   : > { %672 = vst.msk [vmem:[#allocation2 + $0x40] sm:$0xff] %vm663_vm4, %v632_v10  ;;  %v616_v11 = vpop.permute.xlu0 %615 }
  0x99   : > { %664 = vst.msk [vmem:[#allocation2] sm:$0xff] %vm663_vm4, %v616_v11  ;;  %380 = vrot.lane.b32.xlu1 %v2516_v56, %s2224_s23 }
  0x9a   : > { %364 = vrot.lane.b32.xlu0 %v2519_v46, %s2224_s23 }
  0x9b   : > { %v634_v12 = vpop.permute.xlu1 %633 }
  0x9c   : > { %673 = vst.msk [vmem:[#allocation2 + $0x48] sm:$0xff] %vm663_vm4, %v634_v12  ;;  %v618_v3 = vpop.permute.xlu0 %617 }
  0x9d   : > { %665 = vst.msk [vmem:[#allocation2 + $0x8] sm:$0xff] %vm663_vm4, %v618_v3  ;;  %507 = vrot.lane.b32.xlu1 %v852_v48, %s2225_s24  ;;  %v2022_v48 = vld [vmem:[%s2281_s22 + $0xb1] sm:$0xff] }
  0x9e   : > { %491 = vrot.lane.b32.xlu0 %v844_v49, %s2225_s24  ;;  %v2637_v49 = vpack.c.bf16 %v2038_v44, %v2037_v43  ;;  %v1994_v43 = vld [vmem:[%s2281_s22 + $0xe0] sm:$0xff] }
  0x9f   : > { %v761_v13 = vpop.permute.xlu1 %760 }
  0xa0   : > { %801 = vst.msk [vmem:[#allocation2 + $0x40] sm:$0xff] %vm792_vm5, %v761_v13  ;;  %v745_v14 = vpop.permute.xlu0 %744 }
  0xa1   : > { %793 = vst.msk [vmem:[#allocation2] sm:$0xff] %vm792_vm5, %v745_v14  ;;  %509 = vrot.lane.b32.xlu1 %v2538_v5, %s2225_s24  ;;  %v1913_v14 = vld [vmem:[%s2281_s22 + $0x180] sm:$0xff] }
  0xa2   : > { %493 = vrot.lane.b32.xlu0 %v2541_v7, %s2225_s24 }
  0xa3   : > { %v763_v15 = vpop.permute.xlu1 %762 }
  0xa4   : > { %802 = vst.msk [vmem:[#allocation2 + $0x48] sm:$0xff] %vm792_vm5, %v763_v15  ;;  %v747_v16 = vpop.permute.xlu0 %746  ;;  %v1914_v15 = vld [vmem:[%s2281_s22 + $0x188] sm:$0xff] }
  0xa5   : > { %794 = vst.msk [vmem:[#allocation2 + $0x8] sm:$0xff] %vm792_vm5, %v747_v16  ;;  %639 = vrot.lane.b32.xlu1 %v2364_v52, %s2226_s25  ;;  %v1925_v52 = vld [vmem:[%s2281_s22 + $0x91] sm:$0xff] }
  0xa6   : > { %623 = vrot.lane.b32.xlu0 %v2366_v53, %s2226_s25  ;;  %v2589_v26 = vpack.c.bf16 %v1926_v24, %v1925_v52  ;;  %v1946_v52 = vld [vmem:[%s2281_s22 + $0x189] sm:$0xff] }
  0xa7   : > { %v890_v18 = vpop.permute.xlu1 %889 }
  0xa8   : > { %930 = vst.msk [vmem:[#allocation2 + $0x40] sm:$0xff] %vm921_vm6, %v890_v18  ;;  %v874_v20 = vpop.permute.xlu0 %873 }
  0xa9   : > { %922 = vst.msk [vmem:[#allocation2] sm:$0xff] %vm921_vm6, %v874_v20  ;;  %641 = vrot.lane.b32.xlu1 %v2392_v4, %s2226_s25  ;;  %v598_v20 = vpack.c.bf16 %v1914_v15, %v1913_v14 }
  0xaa   : > { %625 = vrot.lane.b32.xlu0 %v2395_v6, %s2226_s25 }
  0xab   : > { %v892_v23 = vpop.permute.xlu1 %891 }
  0xac   : > { %931 = vst.msk [vmem:[#allocation2 + $0x48] sm:$0xff] %vm921_vm6, %v892_v23  ;;  %v876_v53 = vpop.permute.xlu0 %875  ;;  %v1945_v23 = vld [vmem:[%s2281_s22 + $0x181] sm:$0xff] }
  0xad   : > { %923 = vst.msk [vmem:[#allocation2 + $0x8] sm:$0xff] %vm921_vm6, %v876_v53  ;;  %768 = vrot.lane.b32.xlu1 %v2516_v56, %s2227_s26  ;;  %v1930_v53 = vld [vmem:[%s2281_s22 + $0xc9] sm:$0xff] }
  0xae   : > { %752 = vrot.lane.b32.xlu0 %v2519_v46, %s2227_s26 }
  0xaf   : > { %v1022_v27 = vpop.permute.xlu1 %1021 }
  0xb0   : > { %1062 = vst.msk [vmem:[#allocation2 + $0x40] sm:$0xff] %vm1053_vm7, %v1022_v27  ;;  %v1006_v28 = vpop.permute.xlu0 %1005 }
  0xb1   : > { %1054 = vst.msk [vmem:[#allocation2] sm:$0xff] %vm1053_vm7, %v1006_v28  ;;  %770 = vrot.lane.b32.xlu1 %v2585_v25, %s2227_s26 }
  0xb2   : > { %754 = vrot.lane.b32.xlu0 %v2589_v26, %s2227_s26 }
  0xb3   : > { %v1024_v31 = vpop.permute.xlu1 %1023 }
  0xb4   : > { %1063 = vst.msk [vmem:[#allocation2 + $0x48] sm:$0xff] %vm1053_vm7, %v1024_v31  ;;  %v1008_v34 = vpop.permute.xlu0 %1007 }
  0xb5   : > { %1055 = vst.msk [vmem:[#allocation2 + $0x8] sm:$0xff] %vm1053_vm7, %v1008_v34  ;;  %897 = vrot.lane.b32.xlu1 %v2538_v5, %s2228_s27  ;;  %v2671_v5 = vpack.c.bf16 %v2054_v63, %v2053_v62  ;;  %v2074_v62 = vld [vmem:[%s2281_s22 + $0x1a2] sm:$0xff] }
  0xb6   : > { %881 = vrot.lane.b32.xlu0 %v2541_v7, %s2228_s27 }
  0xb7   : > { %v1151_v37 = vpop.permute.xlu1 %1150 }
  0xb8   : > { %1191 = vst.msk [vmem:[#allocation2 + $0x40] sm:$0xff] %vm1182_vm8, %v1151_v37  ;;  %v1135_v38 = vpop.permute.xlu0 %1134 }
  0xb9   : > { %1183 = vst.msk [vmem:[#allocation2] sm:$0xff] %vm1182_vm8, %v1135_v38  ;;  %899 = vrot.lane.b32.xlu1 %v2605_v35, %s2228_s27 }
  0xba   : > { %883 = vrot.lane.b32.xlu0 %v2609_v36, %s2228_s27 }
  0xbb   : > { %v1153_v39 = vpop.permute.xlu1 %1152 }
  0xbc   : > { %1192 = vst.msk [vmem:[#allocation2 + $0x48] sm:$0xff] %vm1182_vm8, %v1153_v39  ;;  %v1137_v42 = vpop.permute.xlu0 %1136  ;;  %v2009_v39 = vld [vmem:[%s2281_s22 + $0x198] sm:$0xff] }
  0xbd   : > { %1184 = vst.msk [vmem:[#allocation2 + $0x8] sm:$0xff] %vm1182_vm8, %v1137_v42  ;;  %1029 = vrot.lane.b32.xlu1 %v2392_v4, %s2229_s28  ;;  %v2021_v4 = vld [vmem:[%s2281_s22 + $0xa9] sm:$0xff]  ;;  %v2010_v42 = vld [vmem:[%s2281_s22 + $0x1a0] sm:$0xff] }
  0xbe   : > { %1013 = vrot.lane.b32.xlu0 %v2395_v6, %s2229_s28  ;;  %v2641_v50 = vpack.c.bf16 %v2022_v48, %v2021_v4 }
  0xbf   : > { %v1280_v40 = vpop.permute.xlu1 %1279 }
  0xc0   : > { %1320 = vst.msk [vmem:[#allocation2 + $0x40] sm:$0xff] %vm1311_vm9, %v1280_v40  ;;  %v1264_v41 = vpop.permute.xlu0 %1263 }
  0xc1   : > { %1312 = vst.msk [vmem:[#allocation2] sm:$0xff] %vm1311_vm9, %v1264_v41  ;;  %1031 = vrot.lane.b32.xlu1 %v2429_v17, %s2229_s28  ;;  %v1993_v41 = vld [vmem:[%s2281_s22 + $0xd8] sm:$0xff] }
  0xc2   : > { %1015 = vrot.lane.b32.xlu0 %v2434_v19, %s2229_s28  ;;  %v980_v4 = vpack.c.bf16 %v1994_v43, %v1993_v41 }
  0xc3   : > { %v375_v45 = vpop.permute.xlu1 %374 }
  0xc4   : > { %413 = vst.msk [vmem:[#allocation2 + $0x50] sm:$0xff] %vm402_vm2, %v375_v45  ;;  %v359_v6 = vpop.permute.xlu0 %358  ;;  %v988_v45 = vpack.c.bf16 %v2010_v42, %v2009_v39 }
  0xc5   : > { %405 = vst.msk [vmem:[#allocation2 + $0x10] sm:$0xff] %vm402_vm2, %v359_v6  ;;  %1158 = vrot.lane.b32.xlu1 %v2585_v25, %s2230_s5 }
  0xc6   : > { %1142 = vrot.lane.b32.xlu0 %v2589_v26, %s2230_s5 }
  0xc7   : > { %v1282_v51 = vpop.permute.xlu1 %1281  ;;  %v1336_v54 = vld [vmem:[#allocation2 + $0x40] sm:$0xff] }
  0xc8   : > { %1321 = vst.msk [vmem:[#allocation2 + $0x48] sm:$0xff] %vm1311_vm9, %v1282_v51  ;;  %v1266_v55 = vpop.permute.xlu0 %1265  ;;  %v1328_v56 = vld [vmem:[#allocation2] sm:$0xff]  ;;  %2140 = vmatprep.mubr.msk.bf16.mxu1 %vm1364_vm10, %v1336_v54 }
  0xc9   : > { %1313 = vst.msk [vmem:[#allocation2 + $0x8] sm:$0xff] %vm1311_vm9, %v1266_v55  ;;  %2124 = vmatprep.mubr.msk.bf16.mxu0 %vm1364_vm10, %v1328_v56  ;;  %1160 = vrot.lane.b32.xlu1 %v2637_v49, %s2230_s5  ;;  %v2025_v54 = vld [vmem:[%s2281_s22 + $0xd9] sm:$0xff]  ;;  %v2026_v55 = vld [vmem:[%s2281_s22 + $0xe1] sm:$0xff] }
  0xca   : > { %1144 = vrot.lane.b32.xlu0 %v2641_v50, %s2230_s5 }
  0xcb   : > { %v377_v46 = vpop.permute.xlu1 %376 }
  0xcc   : > { %414 = vst.msk [vmem:[#allocation2 + $0x58] sm:$0xff] %vm402_vm2, %v377_v46  ;;  %v361_v47 = vpop.permute.xlu0 %360  ;;  %v1109_v46 = vpack.c.bf16 %v2026_v55, %v2025_v54 }
  0xcd   : > { %406 = vst.msk [vmem:[#allocation2 + $0x18] sm:$0xff] %vm402_vm2, %v361_v47  ;;  %1287 = vrot.lane.b32.xlu1 %v2605_v35, %s2231_s10 }
  0xce   : > { %1271 = vrot.lane.b32.xlu0 %v2609_v36, %s2231_s10 }
  0xcf   : > { %v504_v59 = vpop.permute.xlu1 %503  ;;  %v1337_v60 = vld [vmem:[#allocation2 + $0x48] sm:$0xff] }
  0xd0   : > { %542 = vst.msk [vmem:[#allocation2 + $0x50] sm:$0xff] %vm531_vm3, %v504_v59  ;;  %v488_v0 = vpop.permute.xlu0 %487  ;;  %v1329_v1 = vld [vmem:[#allocation2 + $0x8] sm:$0xff]  ;;  %2141 = vmatmul.mubr.msk.bf16.vlgmr.msra.gmra.mrb[0].mxu1 %vm1364_vm10, %v1337_v60  ;;  %v2073_v60 = vld [vmem:[%s2281_s22 + $0x19a] sm:$0xff] }
  0xd1   : > { %534 = vst.msk [vmem:[#allocation2 + $0x10] sm:$0xff] %vm531_vm3, %v488_v0  ;;  %2125 = vmatmul.mubr.msk.bf16.vlgmr.msra.gmra.mrb[0].mxu0 %vm1364_vm10, %v1329_v1  ;;  %382 = vrot.lane.b32.xlu1 %v2585_v25, %s2224_s23  ;;  %v727_v25 = vpack.c.bf16 %v1946_v52, %v1945_v23  ;;  %v2057_v0 = vld [vmem:[%s2281_s22 + $0xda] sm:$0xff]  ;;  %v2058_v1 = vld [vmem:[%s2281_s22 + $0xe2] sm:$0xff] }
  0xd2   : > { %366 = vrot.lane.b32.xlu0 %v2589_v26, %s2224_s23 }
  0xd3   : > { %v506_v7 = vpop.permute.xlu1 %505 }
  0xd4   : > { %543 = vst.msk [vmem:[#allocation2 + $0x58] sm:$0xff] %vm531_vm3, %v506_v7  ;;  %v490_v8 = vpop.permute.xlu0 %489  ;;  %v1238_v7 = vpack.c.bf16 %v2058_v1, %v2057_v0 }
  0xd5   : > { %535 = vst.msk [vmem:[#allocation2 + $0x18] sm:$0xff] %vm531_vm3, %v490_v8  ;;  %1289 = vrot.lane.b32.xlu1 %v2667_v2, %s2231_s10 }
  0xd6   : > { %1273 = vrot.lane.b32.xlu0 %v2671_v5, %s2231_s10 }
  0xd7   : > { %v636_v9 = vpop.permute.xlu1 %635 }
  0xd8   : > { %674 = vst.msk [vmem:[#allocation2 + $0x50] sm:$0xff] %vm663_vm4, %v636_v9  ;;  %v620_v10 = vpop.permute.xlu0 %619 }
  0xd9   : > { %666 = vst.msk [vmem:[#allocation2 + $0x10] sm:$0xff] %vm663_vm4, %v620_v10  ;;  %384 = vrot.lane.b32.xlu1 %v2637_v49, %s2224_s23 }
  0xda   : > { %368 = vrot.lane.b32.xlu0 %v2641_v50, %s2224_s23 }
  0xdb   : > { %v638_v11 = vpop.permute.xlu1 %637 }
  0xdc   : > { %675 = vst.msk [vmem:[#allocation2 + $0x58] sm:$0xff] %vm663_vm4, %v638_v11  ;;  %v622_v12 = vpop.permute.xlu0 %621 }
  0xdd   : > { %667 = vst.msk [vmem:[#allocation2 + $0x18] sm:$0xff] %vm663_vm4, %v622_v12  ;;  %511 = vrot.lane.b32.xlu1 %v2605_v35, %s2225_s24  ;;  %v856_v35 = vpack.c.bf16 %v1978_v30, %v1977_v29 }
  0xde   : > { %495 = vrot.lane.b32.xlu0 %v2609_v36, %s2225_s24  ;;  %v848_v36 = vpack.c.bf16 %v1962_v33, %v1961_v32 }
  0xdf   : > { %v765_v3 = vpop.permute.xlu1 %764 }
  0xe0   : > { %803 = vst.msk [vmem:[#allocation2 + $0x50] sm:$0xff] %vm792_vm5, %v765_v3  ;;  %v749_v13 = vpop.permute.xlu0 %748 }
  0xe1   : > { %795 = vst.msk [vmem:[#allocation2 + $0x10] sm:$0xff] %vm792_vm5, %v749_v13  ;;  %513 = vrot.lane.b32.xlu1 %v2667_v2, %s2225_s24 }
  0xe2   : > { %497 = vrot.lane.b32.xlu0 %v2671_v5, %s2225_s24 }
  0xe3   : > { %v767_v16 = vpop.permute.xlu1 %766 }
  0xe4   : > { %804 = vst.msk [vmem:[#allocation2 + $0x58] sm:$0xff] %vm792_vm5, %v767_v16  ;;  %v751_v18 = vpop.permute.xlu0 %750 }
  0xe5   : > { %796 = vst.msk [vmem:[#allocation2 + $0x18] sm:$0xff] %vm792_vm5, %v751_v18  ;;  %643 = vrot.lane.b32.xlu1 %v2429_v17, %s2226_s25  ;;  %v1929_v17 = vld [vmem:[%s2281_s22 + $0xc1] sm:$0xff] }
  0xe6   : > { %627 = vrot.lane.b32.xlu0 %v2434_v19, %s2226_s25  ;;  %v719_v26 = vpack.c.bf16 %v1930_v53, %v1929_v17 }
  0xe7   : > { %v894_v21 = vpop.permute.xlu1 %893 }
  0xe8   : > { %932 = vst.msk [vmem:[#allocation2 + $0x50] sm:$0xff] %vm921_vm6, %v894_v21  ;;  %v878_v22 = vpop.permute.xlu0 %877 }
  0xe9   : > { %924 = vst.msk [vmem:[#allocation2 + $0x10] sm:$0xff] %vm921_vm6, %v878_v22  ;;  %645 = vrot.lane.b32.xlu1 %v598_v20, %s2226_s25 }
  0xea   : > { %629 = vrot.lane.b32.xlu0 %v2381_v61, %s2226_s25 }
  0xeb   : > { %v896_v24 = vpop.permute.xlu1 %895 }
  0xec   : > { %933 = vst.msk [vmem:[#allocation2 + $0x58] sm:$0xff] %vm921_vm6, %v896_v24  ;;  %v880_v19 = vpop.permute.xlu0 %879 }
  0xed   : > { %925 = vst.msk [vmem:[#allocation2 + $0x18] sm:$0xff] %vm921_vm6, %v880_v19  ;;  %772 = vrot.lane.b32.xlu1 %v2637_v49, %s2227_s26  ;;  %v2041_v49 = vld [vmem:[%s2281_s22 + $0x199] sm:$0xff] }
  0xee   : > { %756 = vrot.lane.b32.xlu0 %v2641_v50, %s2227_s26  ;;  %v2042_v50 = vld [vmem:[%s2281_s22 + $0x1a1] sm:$0xff] }
  0xef   : > { %v1026_v27 = vpop.permute.xlu1 %1025 }
  0xf0   : > { %1064 = vst.msk [vmem:[#allocation2 + $0x50] sm:$0xff] %vm1053_vm7, %v1026_v27  ;;  %v1010_v28 = vpop.permute.xlu0 %1009 }
  0xf1   : > { %1056 = vst.msk [vmem:[#allocation2 + $0x10] sm:$0xff] %vm1053_vm7, %v1010_v28  ;;  %774 = vrot.lane.b32.xlu1 %v727_v25, %s2227_s26 }
  0xf2   : > { %758 = vrot.lane.b32.xlu0 %v719_v26, %s2227_s26 }
  0xf3   : > { %v1028_v31 = vpop.permute.xlu1 %1027 }
  0xf4   : > { %1065 = vst.msk [vmem:[#allocation2 + $0x58] sm:$0xff] %vm1053_vm7, %v1028_v31  ;;  %v1012_v34 = vpop.permute.xlu0 %1011 }
  0xf5   : > { %1057 = vst.msk [vmem:[#allocation2 + $0x18] sm:$0xff] %vm1053_vm7, %v1012_v34  ;;  %901 = vrot.lane.b32.xlu1 %v2667_v2, %s2228_s27 }
  0xf6   : > { %885 = vrot.lane.b32.xlu0 %v2671_v5, %s2228_s27  ;;  %v1246_v5 = vpack.c.bf16 %v2074_v62, %v2073_v60 }
  0xf7   : > { %v1155_v37 = vpop.permute.xlu1 %1154 }
  0xf8   : > { %1193 = vst.msk [vmem:[#allocation2 + $0x50] sm:$0xff] %vm1182_vm8, %v1155_v37  ;;  %v1139_v38 = vpop.permute.xlu0 %1138 }
  0xf9   : > { %1185 = vst.msk [vmem:[#allocation2 + $0x10] sm:$0xff] %vm1182_vm8, %v1139_v38  ;;  %903 = vrot.lane.b32.xlu1 %v856_v35, %s2228_s27 }
  0xfa   : > { %887 = vrot.lane.b32.xlu0 %v848_v36, %s2228_s27 }
  0xfb   : > { %v1157_v40 = vpop.permute.xlu1 %1156 }
  0xfc   : > { %1194 = vst.msk [vmem:[#allocation2 + $0x58] sm:$0xff] %vm1182_vm8, %v1157_v40  ;;  %v1141_v44 = vpop.permute.xlu0 %1140 }
  0xfd   : > { %1186 = vst.msk [vmem:[#allocation2 + $0x18] sm:$0xff] %vm1182_vm8, %v1141_v44  ;;  %1033 = vrot.lane.b32.xlu1 %v598_v20, %s2229_s28 }
  0xfe   : > { %1017 = vrot.lane.b32.xlu0 %v2381_v61, %s2229_s28  ;;  %v1117_v61 = vpack.c.bf16 %v2042_v50, %v2041_v49 }
  0xff   : > { %v1284_v48 = vpop.permute.xlu1 %1283 }
 0x100   : > { %1322 = vst.msk [vmem:[#allocation2 + $0x50] sm:$0xff] %vm1311_vm9, %v1284_v48  ;;  %v1268_v6 = vpop.permute.xlu0 %1267 }
 0x101   : > { %1314 = vst.msk [vmem:[#allocation2 + $0x10] sm:$0xff] %vm1311_vm9, %v1268_v6  ;;  %1035 = vrot.lane.b32.xlu1 %v988_v45, %s2229_s28 }
 0x102   : > { %1019 = vrot.lane.b32.xlu0 %v980_v4, %s2229_s28 }
 0x103   : > { %v379_v51 = vpop.permute.xlu1 %378 }
 0x104   : > { %415 = vst.msk [vmem:[#allocation2 + $0x60] sm:$0xff] %vm402_vm2, %v379_v51  ;;  %v363_v56 = vpop.permute.xlu0 %362 }
 0x105   : > { %407 = vst.msk [vmem:[#allocation2 + $0x20] sm:$0xff] %vm402_vm2, %v363_v56  ;;  %1162 = vrot.lane.b32.xlu1 %v727_v25, %s2230_s5 }
 0x106   : > { %1146 = vrot.lane.b32.xlu0 %v719_v26, %s2230_s5 }
 0x107   : > { %v1286_v47 = vpop.permute.xlu1 %1285  ;;  %v1338_v57 = vld [vmem:[#allocation2 + $0x50] sm:$0xff] }
 0x108   : > { %1323 = vst.msk [vmem:[#allocation2 + $0x58] sm:$0xff] %vm1311_vm9, %v1286_v47  ;;  %v1270_v58 = vpop.permute.xlu0 %1269  ;;  %v1330_v59 = vld [vmem:[#allocation2 + $0x10] sm:$0xff]  ;;  %2144 = vmatprep.mubr.msk.bf16.mxu1 %vm1364_vm10, %v1338_v57 }
 0x109   : > { %1315 = vst.msk [vmem:[#allocation2 + $0x18] sm:$0xff] %vm1311_vm9, %v1270_v58  ;;  %2128 = vmatprep.mubr.msk.bf16.mxu0 %vm1364_vm10, %v1330_v59  ;;  %1164 = vrot.lane.b32.xlu1 %v1117_v61, %s2230_s5 }
 0x10a   : > { %1148 = vrot.lane.b32.xlu0 %v1109_v46, %s2230_s5 }
 0x10b   : > { %v381_v63 = vpop.permute.xlu1 %380 }
 0x10c   : > { %416 = vst.msk [vmem:[#allocation2 + $0x68] sm:$0xff] %vm402_vm2, %v381_v63  ;;  %v365_v2 = vpop.permute.xlu0 %364 }
 0x10d   : > { %408 = vst.msk [vmem:[#allocation2 + $0x28] sm:$0xff] %vm402_vm2, %v365_v2  ;;  %1291 = vrot.lane.b32.xlu1 %v856_v35, %s2231_s10 }
 0x10e   : > { %1275 = vrot.lane.b32.xlu0 %v848_v36, %s2231_s10 }
 0x10f   : > { %v508_v8 = vpop.permute.xlu1 %507  ;;  %v1339_v9 = vld [vmem:[#allocation2 + $0x58] sm:$0xff] }
 0x110   : > { %544 = vst.msk [vmem:[#allocation2 + $0x60] sm:$0xff] %vm531_vm3, %v508_v8  ;;  %v492_v10 = vpop.permute.xlu0 %491  ;;  %v1331_v11 = vld [vmem:[#allocation2 + $0x18] sm:$0xff]  ;;  %2145 = vmatmul.mubr.msk.bf16.gmra.mrb[4].mxu1 %vm1364_vm10, %v1339_v9 }
 0x111   : > { %536 = vst.msk [vmem:[#allocation2 + $0x20] sm:$0xff] %vm531_vm3, %v492_v10  ;;  %2129 = vmatmul.mubr.msk.bf16.gmra.mrb[4].mxu0 %vm1364_vm10, %v1331_v11  ;;  %1293 = vrot.lane.b32.xlu1 %v1246_v5, %s2231_s10 }
 0x112   : > { %1277 = vrot.lane.b32.xlu0 %v1238_v7, %s2231_s10 }
 0x113   : > { %v510_v12 = vpop.permute.xlu1 %509 }
 0x114   : > { %545 = vst.msk [vmem:[#allocation2 + $0x68] sm:$0xff] %vm531_vm3, %v510_v12  ;;  %v494_v3 = vpop.permute.xlu0 %493 }
 0x115   : > { %537 = vst.msk [vmem:[#allocation2 + $0x28] sm:$0xff] %vm531_vm3, %v494_v3 }
 0x117   : > { %v640_v13 = vpop.permute.xlu1 %639 }
 0x118   : > { %676 = vst.msk [vmem:[#allocation2 + $0x60] sm:$0xff] %vm663_vm4, %v640_v13  ;;  %v624_v14 = vpop.permute.xlu0 %623  ;;  %v2848_v13 = vld [vmem:[%s2968_s2] ss:$0 sm:$0xff] }
 0x119   : > { %668 = vst.msk [vmem:[#allocation2 + $0x20] sm:$0xff] %vm663_vm4, %v624_v14  ;;  %v2853_v14 = vld [vmem:[%s2969_s3] ss:$0 sm:$0xff] }
 0x11b   : > { %v642_v15 = vpop.permute.xlu1 %641 }
 0x11c   : > { %677 = vst.msk [vmem:[#allocation2 + $0x68] sm:$0xff] %vm663_vm4, %v642_v15  ;;  %v626_v16 = vpop.permute.xlu0 %625 }
 0x11d   : > { %669 = vst.msk [vmem:[#allocation2 + $0x28] sm:$0xff] %vm663_vm4, %v626_v16 }
 0x11f   : > { %v769_v18 = vpop.permute.xlu1 %768 }
 0x120   : > { %805 = vst.msk [vmem:[#allocation2 + $0x60] sm:$0xff] %vm792_vm5, %v769_v18  ;;  %v753_v20 = vpop.permute.xlu0 %752 }
 0x121   : > { %797 = vst.msk [vmem:[#allocation2 + $0x20] sm:$0xff] %vm792_vm5, %v753_v20 }
 0x123   : > { %v771_v21 = vpop.permute.xlu1 %770 }
 0x124   : > { %806 = vst.msk [vmem:[#allocation2 + $0x68] sm:$0xff] %vm792_vm5, %v771_v21  ;;  %v755_v22 = vpop.permute.xlu0 %754 }
 0x125   : > { %798 = vst.msk [vmem:[#allocation2 + $0x28] sm:$0xff] %vm792_vm5, %v755_v22 }
 0x127   : > { %v898_v23 = vpop.permute.xlu1 %897 }
 0x128   : > { %934 = vst.msk [vmem:[#allocation2 + $0x60] sm:$0xff] %vm921_vm6, %v898_v23  ;;  %v882_v52 = vpop.permute.xlu0 %881 }
 0x129   : > { %926 = vst.msk [vmem:[#allocation2 + $0x20] sm:$0xff] %vm921_vm6, %v882_v52 }
 0x12b   : > { %v900_v24 = vpop.permute.xlu1 %899 }
 0x12c   : > { %935 = vst.msk [vmem:[#allocation2 + $0x68] sm:$0xff] %vm921_vm6, %v900_v24  ;;  %v884_v17 = vpop.permute.xlu0 %883 }
 0x12d   : > { %927 = vst.msk [vmem:[#allocation2 + $0x28] sm:$0xff] %vm921_vm6, %v884_v17 }
 0x12f   : > { %v1030_v53 = vpop.permute.xlu1 %1029 }
 0x130   : > { %1066 = vst.msk [vmem:[#allocation2 + $0x60] sm:$0xff] %vm1053_vm7, %v1030_v53  ;;  %v1014_v19 = vpop.permute.xlu0 %1013 }
 0x131   : > { %1058 = vst.msk [vmem:[#allocation2 + $0x20] sm:$0xff] %vm1053_vm7, %v1014_v19 }
 0x133   : > { %v1032_v25 = vpop.permute.xlu1 %1031 }
 0x134   : > { %1067 = vst.msk [vmem:[#allocation2 + $0x68] sm:$0xff] %vm1053_vm7, %v1032_v25  ;;  %v1016_v26 = vpop.permute.xlu0 %1015 }
 0x135   : > { %1059 = vst.msk [vmem:[#allocation2 + $0x28] sm:$0xff] %vm1053_vm7, %v1016_v26 }
 0x137   : > { %v1159_v27 = vpop.permute.xlu1 %1158 }
 0x138   : > { %1195 = vst.msk [vmem:[#allocation2 + $0x60] sm:$0xff] %vm1182_vm8, %v1159_v27  ;;  %v1143_v28 = vpop.permute.xlu0 %1142 }
 0x139   : > { %1187 = vst.msk [vmem:[#allocation2 + $0x20] sm:$0xff] %vm1182_vm8, %v1143_v28 }
 0x13b   : > { %v1161_v29 = vpop.permute.xlu1 %1160 }
 0x13c   : > { %1196 = vst.msk [vmem:[#allocation2 + $0x68] sm:$0xff] %vm1182_vm8, %v1161_v29  ;;  %v1145_v30 = vpop.permute.xlu0 %1144 }
 0x13d   : > { %1188 = vst.msk [vmem:[#allocation2 + $0x28] sm:$0xff] %vm1182_vm8, %v1145_v30 }
 0x13f   : > { %v1288_v31 = vpop.permute.xlu1 %1287 }
 0x140   : > { %1324 = vst.msk [vmem:[#allocation2 + $0x60] sm:$0xff] %vm1311_vm9, %v1288_v31  ;;  %v1272_v32 = vpop.permute.xlu0 %1271 }
 0x141   : > { %1316 = vst.msk [vmem:[#allocation2 + $0x20] sm:$0xff] %vm1311_vm9, %v1272_v32 }
 0x143   : > { %v383_v33 = vpop.permute.xlu1 %382 }
 0x144   : > { %417 = vst.msk [vmem:[#allocation2 + $0x70] sm:$0xff] %vm402_vm2, %v383_v33  ;;  %v367_v34 = vpop.permute.xlu0 %366 }
 0x145   : > { %409 = vst.msk [vmem:[#allocation2 + $0x30] sm:$0xff] %vm402_vm2, %v367_v34 }
 0x147   : > { %v1290_v35 = vpop.permute.xlu1 %1289  ;;  %v1340_v36 = vld [vmem:[#allocation2 + $0x60] sm:$0xff] }
 0x148   : > { %1325 = vst.msk [vmem:[#allocation2 + $0x68] sm:$0xff] %vm1311_vm9, %v1290_v35  ;;  %v1274_v37 = vpop.permute.xlu0 %1273  ;;  %v1332_v38 = vld [vmem:[#allocation2 + $0x20] sm:$0xff]  ;;  %2148 = vmatprep.mubr.msk.bf16.mxu1 %vm1364_vm10, %v1340_v36 }
 0x149   : > { %1317 = vst.msk [vmem:[#allocation2 + $0x28] sm:$0xff] %vm1311_vm9, %v1274_v37  ;;  %2132 = vmatprep.mubr.msk.bf16.mxu0 %vm1364_vm10, %v1332_v38 }
 0x14b   : > { %v385_v39 = vpop.permute.xlu1 %384 }
 0x14c   : > { %418 = vst.msk [vmem:[#allocation2 + $0x78] sm:$0xff] %vm402_vm2, %v385_v39  ;;  %v369_v42 = vpop.permute.xlu0 %368 }
 0x14d   : > { %410 = vst.msk [vmem:[#allocation2 + $0x38] sm:$0xff] %vm402_vm2, %v369_v42 }
 0x14f   : > { %v512_v40 = vpop.permute.xlu1 %511  ;;  %v1341_v41 = vld [vmem:[#allocation2 + $0x68] sm:$0xff] }
 0x150   : > { %546 = vst.msk [vmem:[#allocation2 + $0x70] sm:$0xff] %vm531_vm3, %v512_v40  ;;  %v496_v43 = vpop.permute.xlu0 %495  ;;  %v1333_v44 = vld [vmem:[#allocation2 + $0x28] sm:$0xff]  ;;  %2149 = vmatmul.mubr.msk.bf16.gmra.mrb[8].mxu1 %vm1364_vm10, %v1341_v41 }
 0x151   : > { %538 = vst.msk [vmem:[#allocation2 + $0x30] sm:$0xff] %vm531_vm3, %v496_v43  ;;  %2133 = vmatmul.mubr.msk.bf16.gmra.mrb[8].mxu0 %vm1364_vm10, %v1333_v44 }
 0x153   : > { %v514_v45 = vpop.permute.xlu1 %513 }
 0x154   : > { %547 = vst.msk [vmem:[#allocation2 + $0x78] sm:$0xff] %vm531_vm3, %v514_v45  ;;  %v498_v4 = vpop.permute.xlu0 %497 }
 0x155   : > { %539 = vst.msk [vmem:[#allocation2 + $0x38] sm:$0xff] %vm531_vm3, %v498_v4 }
 0x157   : > { %v644_v48 = vpop.permute.xlu1 %643 }
 0x158   : > { %678 = vst.msk [vmem:[#allocation2 + $0x70] sm:$0xff] %vm663_vm4, %v644_v48  ;;  %v628_v6 = vpop.permute.xlu0 %627 }
 0x159   : > { %670 = vst.msk [vmem:[#allocation2 + $0x30] sm:$0xff] %vm663_vm4, %v628_v6 }
 0x15b   : > { %v646_v49 = vpop.permute.xlu1 %645 }
 0x15c   : > { %679 = vst.msk [vmem:[#allocation2 + $0x78] sm:$0xff] %vm663_vm4, %v646_v49  ;;  %v630_v50 = vpop.permute.xlu0 %629 }
 0x15d   : > { %671 = vst.msk [vmem:[#allocation2 + $0x38] sm:$0xff] %vm663_vm4, %v630_v50 }
 0x15f   : > { %v773_v51 = vpop.permute.xlu1 %772 }
 0x160   : > { %807 = vst.msk [vmem:[#allocation2 + $0x70] sm:$0xff] %vm792_vm5, %v773_v51  ;;  %v757_v54 = vpop.permute.xlu0 %756 }
 0x161   : > { %799 = vst.msk [vmem:[#allocation2 + $0x30] sm:$0xff] %vm792_vm5, %v757_v54 }
 0x163   : > { %v775_v55 = vpop.permute.xlu1 %774 }
 0x164   : > { %808 = vst.msk [vmem:[#allocation2 + $0x78] sm:$0xff] %vm792_vm5, %v775_v55  ;;  %v759_v56 = vpop.permute.xlu0 %758 }
 0x165   : > { %800 = vst.msk [vmem:[#allocation2 + $0x38] sm:$0xff] %vm792_vm5, %v759_v56 }
 0x167   : > { %v902_v61 = vpop.permute.xlu1 %901 }
 0x168   : > { %936 = vst.msk [vmem:[#allocation2 + $0x70] sm:$0xff] %vm921_vm6, %v902_v61  ;;  %v886_v46 = vpop.permute.xlu0 %885 }
 0x169   : > { %928 = vst.msk [vmem:[#allocation2 + $0x30] sm:$0xff] %vm921_vm6, %v886_v46 }
 0x16b   : > { %v904_v47 = vpop.permute.xlu1 %903 }
 0x16c   : > { %937 = vst.msk [vmem:[#allocation2 + $0x78] sm:$0xff] %vm921_vm6, %v904_v47  ;;  %v888_v57 = vpop.permute.xlu0 %887 }
 0x16d   : > { %929 = vst.msk [vmem:[#allocation2 + $0x38] sm:$0xff] %vm921_vm6, %v888_v57 }
 0x16f   : > { %v1034_v58 = vpop.permute.xlu1 %1033 }
 0x170   : > { %1068 = vst.msk [vmem:[#allocation2 + $0x70] sm:$0xff] %vm1053_vm7, %v1034_v58  ;;  %v1018_v59 = vpop.permute.xlu0 %1017 }
 0x171   : > { %1060 = vst.msk [vmem:[#allocation2 + $0x30] sm:$0xff] %vm1053_vm7, %v1018_v59 }
 0x173   : > { %v1036_v60 = vpop.permute.xlu1 %1035 }
 0x174   : > { %1069 = vst.msk [vmem:[#allocation2 + $0x78] sm:$0xff] %vm1053_vm7, %v1036_v60  ;;  %v1020_v62 = vpop.permute.xlu0 %1019 }
 0x175   : > { %1061 = vst.msk [vmem:[#allocation2 + $0x38] sm:$0xff] %vm1053_vm7, %v1020_v62 }
 0x177   : > { %v1163_v63 = vpop.permute.xlu1 %1162 }
 0x178   : > { %1197 = vst.msk [vmem:[#allocation2 + $0x70] sm:$0xff] %vm1182_vm8, %v1163_v63  ;;  %v1147_v0 = vpop.permute.xlu0 %1146 }
 0x179   : > { %1189 = vst.msk [vmem:[#allocation2 + $0x30] sm:$0xff] %vm1182_vm8, %v1147_v0 }
 0x17b   : > { %v1165_v1 = vpop.permute.xlu1 %1164 }
 0x17c   : > { %1198 = vst.msk [vmem:[#allocation2 + $0x78] sm:$0xff] %vm1182_vm8, %v1165_v1  ;;  %v1149_v2 = vpop.permute.xlu0 %1148 }
 0x17d   : > { %1190 = vst.msk [vmem:[#allocation2 + $0x38] sm:$0xff] %vm1182_vm8, %v1149_v2 }
 0x17f   : > { %v1292_v5 = vpop.permute.xlu1 %1291 }
 0x180   : > { %1326 = vst.msk [vmem:[#allocation2 + $0x70] sm:$0xff] %vm1311_vm9, %v1292_v5  ;;  %v1276_v7 = vpop.permute.xlu0 %1275 }
 0x181   : > { %1318 = vst.msk [vmem:[#allocation2 + $0x30] sm:$0xff] %vm1311_vm9, %v1276_v7 }
 0x183   : > { %v1294_v8 = vpop.permute.xlu1 %1293 }
 0x184   : > { %1327 = vst.msk [vmem:[#allocation2 + $0x78] sm:$0xff] %vm1311_vm9, %v1294_v8  ;;  %v1278_v9 = vpop.permute.xlu0 %1277 }
 0x185   : > { %1319 = vst.msk [vmem:[#allocation2 + $0x38] sm:$0xff] %vm1311_vm9, %v1278_v9 }
 0x187   : > { %v1342_v10 = vld [vmem:[#allocation2 + $0x70] sm:$0xff] }
 0x188   : > { %v1334_v11 = vld [vmem:[#allocation2 + $0x30] sm:$0xff]  ;;  %2152 = vmatprep.mubr.msk.bf16.mxu1 %vm1364_vm10, %v1342_v10 }
 0x189   : > { %2136 = vmatprep.mubr.msk.bf16.mxu0 %vm1364_vm10, %v1334_v11 }
 0x18b   : > { %v1343_v12 = vld [vmem:[#allocation2 + $0x78] sm:$0xff] }
 0x18c   : > { %v1335_v3 = vld [vmem:[#allocation2 + $0x38] sm:$0xff]  ;;  %2153 = vmatmul.mubr.msk.bf16.gmra.mrb[12].mxu1 %vm1364_vm10, %v1343_v12 }
 0x18d   : > { %2137 = vmatmul.mubr.msk.bf16.gmra.mrb[12].mxu0 %vm1364_vm10, %v1335_v3 }
 0x1a3   : > { %v2142_v15 = vpop.f32.mrb[0].mxu1 }
 0x1a4   : > { %v2126_v16 = vpop.f32.mrb[0].mxu0  ;;  %v1603_v18 = vmul.f32 %v2142_v15, %v2848_v13  ;;  %v1515_v20 = vpop.f32.mrb[1].mxu1 }
 0x1a5   : > { %v1587_v21 = vmul.f32 %v2126_v16, %v2848_v13  ;;  %v1451_v22 = vpop.f32.mrb[1].mxu0  ;;  %v1601_v23 = vmul.f32 %v2848_v13, %v1515_v20  ;;  %v2143_v52 = vpop.f32.mrb[2].mxu1 }
 0x1a6   : > { %v1642_v24 = vadd.f32 %v2853_v14, %v1603_v18  ;;  %v1585_v17 = vmul.f32 %v2848_v13, %v1451_v22  ;;  %v2127_v53 = vpop.f32.mrb[2].mxu0  ;;  %v1604_v19 = vmul.f32 %v2143_v52, %v2848_v13  ;;  %v1518_v25 = vpop.f32.mrb[3].mxu1 }
 0x1a7   : > { %v1626_v26 = vadd.f32 %v2853_v14, %v1587_v21  ;;  %v1640_v27 = vadd.f32 %v2853_v14, %v1601_v23  ;;  %v1588_v28 = vmul.f32 %v2127_v53, %v2848_v13  ;;  %v1454_v29 = vpop.f32.mrb[3].mxu0  ;;  %v1602_v30 = vmul.f32 %v2848_v13, %v1518_v25 }
 0x1a8   : > { %vm1674_vm11 = vcmp.gt.f32.partialorder %v1642_v24, 0.0  ;;  %v1706_v31 = vmul.f32 0.1, %v1642_v24  ;;  %v1624_v32 = vadd.f32 %v2853_v14, %v1585_v17  ;;  %v1643_v33 = vadd.f32 %v2853_v14, %v1604_v19 }
 0x1a9   : > { %vm1658_vm12 = vcmp.gt.f32.partialorder %v1626_v26, 0.0  ;;  %v1690_v34 = vmul.f32 0.1, %v1626_v26  ;;  %vm1672_vm13 = vcmp.gt.f32.partialorder %v1640_v27, 0.0  ;;  %v1704_v35 = vmul.f32 0.1, %v1640_v27 }
 0x1aa   : > { %v1738_v36 = vsel %vm1674_vm11, %v1642_v24, %v1706_v31  ;;  %vm1656_vm14 = vcmp.gt.f32.partialorder %v1624_v32, 0.0  ;;  %v1688_v37 = vmul.f32 0.1, %v1624_v32  ;;  %v1627_v38 = vadd.f32 %v2853_v14, %v1588_v28 }
 0x1ab   : > { %v1722_v39 = vsel %vm1658_vm12, %v1626_v26, %v1690_v34  ;;  %1770 = vst [vmem:[%s2869_s21 + $0x90] sm:$0xff] %v1738_v36  ;;  %v1736_v42 = vsel %vm1672_vm13, %v1640_v27, %v1704_v35  ;;  %vm1675_vm15 = vcmp.gt.f32.partialorder %v1643_v33, 0.0  ;;  %v1707_v40 = vmul.f32 0.1, %v1643_v33 }
 0x1ac   : > { %1754 = vst [vmem:[%s2869_s21 + $0x10] sm:$0xff] %v1722_v39  ;;  %v1720_v41 = vsel %vm1656_vm14, %v1624_v32, %v1688_v37  ;;  %1768 = vst [vmem:[%s2869_s21 + $0x80] sm:$0xff] %v1736_v42  ;;  %vm1659_vm0 = vcmp.gt.f32.partialorder %v1627_v38, 0.0  ;;  %v1691_v43 = vmul.f32 0.1, %v1627_v38  ;;  %v1586_v44 = vmul.f32 %v2848_v13, %v1454_v29 }
 0x1ad   : > { %1752 = vst [vmem:[%s2869_s21] sm:$0xff] %v1720_v41  ;;  %v1739_v45 = vsel %vm1675_vm15, %v1643_v33, %v1707_v40  ;;  %v1641_v4 = vadd.f32 %v2853_v14, %v1602_v30 }
 0x1ae   : > { %v1723_v48 = vsel %vm1659_vm0, %v1627_v38, %v1691_v43  ;;  %1771 = vst [vmem:[%s2869_s21 + $0x98] sm:$0xff] %v1739_v45  ;;  %v1625_v6 = vadd.f32 %v2853_v14, %v1586_v44 }
 0x1af   : > { %1755 = vst [vmem:[%s2869_s21 + $0x18] sm:$0xff] %v1723_v48  ;;  %vm1673_vm1 = vcmp.gt.f32.partialorder %v1641_v4, 0.0  ;;  %v1705_v49 = vmul.f32 0.1, %v1641_v4 }
 0x1b0   : > { %vm1657_vm2 = vcmp.gt.f32.partialorder %v1625_v6, 0.0  ;;  %v1689_v50 = vmul.f32 0.1, %v1625_v6 }
 0x1b1   : > { %v1737_v51 = vsel %vm1673_vm1, %v1641_v4, %v1705_v49 }
 0x1b2   : > { %v1721_v54 = vsel %vm1657_vm2, %v1625_v6, %v1689_v50  ;;  %1769 = vst [vmem:[%s2869_s21 + $0x88] sm:$0xff] %v1737_v51 }
 0x1b3   : > { %1753 = vst [vmem:[%s2869_s21 + $0x8] sm:$0xff] %v1721_v54 }
 0x1e3   : > { %v2146_v55 = vpop.f32.mrb[4].mxu1 }
 0x1e4   : > { %v2130_v56 = vpop.f32.mrb[4].mxu0  ;;  %v1607_v61 = vmul.f32 %v2146_v55, %v2848_v13  ;;  %v1531_v46 = vpop.f32.mrb[5].mxu1 }
 0x1e5   : > { %v1591_v47 = vmul.f32 %v2130_v56, %v2848_v13  ;;  %v1467_v57 = vpop.f32.mrb[5].mxu0  ;;  %v1605_v58 = vmul.f32 %v2848_v13, %v1531_v46  ;;  %v2147_v59 = vpop.f32.mrb[6].mxu1 }
 0x1e6   : > { %v1646_v60 = vadd.f32 %v2853_v14, %v1607_v61  ;;  %v1589_v62 = vmul.f32 %v2848_v13, %v1467_v57  ;;  %v2131_v63 = vpop.f32.mrb[6].mxu0  ;;  %v1608_v0 = vmul.f32 %v2147_v59, %v2848_v13  ;;  %v1534_v1 = vpop.f32.mrb[7].mxu1 }
 0x1e7   : > { %v1630_v2 = vadd.f32 %v2853_v14, %v1591_v47  ;;  %v1644_v5 = vadd.f32 %v2853_v14, %v1605_v58  ;;  %v1592_v7 = vmul.f32 %v2131_v63, %v2848_v13  ;;  %v1470_v8 = vpop.f32.mrb[7].mxu0  ;;  %v1606_v9 = vmul.f32 %v2848_v13, %v1534_v1 }
 0x1e8   : > { %vm1678_vm3 = vcmp.gt.f32.partialorder %v1646_v60, 0.0  ;;  %v1710_v10 = vmul.f32 0.1, %v1646_v60  ;;  %v1628_v11 = vadd.f32 %v2853_v14, %v1589_v62  ;;  %v1647_v12 = vadd.f32 %v2853_v14, %v1608_v0 }
 0x1e9   : > { %vm1662_vm4 = vcmp.gt.f32.partialorder %v1630_v2, 0.0  ;;  %v1694_v3 = vmul.f32 0.1, %v1630_v2  ;;  %vm1676_vm5 = vcmp.gt.f32.partialorder %v1644_v5, 0.0  ;;  %v1708_v15 = vmul.f32 0.1, %v1644_v5 }
 0x1ea   : > { %v1742_v16 = vsel %vm1678_vm3, %v1646_v60, %v1710_v10  ;;  %vm1660_vm6 = vcmp.gt.f32.partialorder %v1628_v11, 0.0  ;;  %v1692_v18 = vmul.f32 0.1, %v1628_v11  ;;  %v1631_v20 = vadd.f32 %v2853_v14, %v1592_v7 }
 0x1eb   : > { %v1726_v21 = vsel %vm1662_vm4, %v1630_v2, %v1694_v3  ;;  %1774 = vst [vmem:[%s2869_s21 + $0xb0] sm:$0xff] %v1742_v16  ;;  %v1740_v22 = vsel %vm1676_vm5, %v1644_v5, %v1708_v15  ;;  %vm1679_vm7 = vcmp.gt.f32.partialorder %v1647_v12, 0.0  ;;  %v1711_v23 = vmul.f32 0.1, %v1647_v12 }
 0x1ec   : > { %1758 = vst [vmem:[%s2869_s21 + $0x30] sm:$0xff] %v1726_v21  ;;  %v1724_v52 = vsel %vm1660_vm6, %v1628_v11, %v1692_v18  ;;  %1772 = vst [vmem:[%s2869_s21 + $0xa0] sm:$0xff] %v1740_v22  ;;  %vm1663_vm8 = vcmp.gt.f32.partialorder %v1631_v20, 0.0  ;;  %v1695_v24 = vmul.f32 0.1, %v1631_v20  ;;  %v1590_v17 = vmul.f32 %v2848_v13, %v1470_v8 }
 0x1ed   : > { %1756 = vst [vmem:[%s2869_s21 + $0x20] sm:$0xff] %v1724_v52  ;;  %v1743_v53 = vsel %vm1679_vm7, %v1647_v12, %v1711_v23  ;;  %v1645_v19 = vadd.f32 %v2853_v14, %v1606_v9 }
 0x1ee   : > { %v1727_v25 = vsel %vm1663_vm8, %v1631_v20, %v1695_v24  ;;  %1775 = vst [vmem:[%s2869_s21 + $0xb8] sm:$0xff] %v1743_v53  ;;  %v1629_v26 = vadd.f32 %v2853_v14, %v1590_v17 }
 0x1ef   : > { %1759 = vst [vmem:[%s2869_s21 + $0x38] sm:$0xff] %v1727_v25  ;;  %vm1677_vm9 = vcmp.gt.f32.partialorder %v1645_v19, 0.0  ;;  %v1709_v27 = vmul.f32 0.1, %v1645_v19 }
 0x1f0   : > { %vm1661_vm10 = vcmp.gt.f32.partialorder %v1629_v26, 0.0  ;;  %v1693_v28 = vmul.f32 0.1, %v1629_v26 }
 0x1f1   : > { %v1741_v29 = vsel %vm1677_vm9, %v1645_v19, %v1709_v27 }
 0x1f2   : > { %v1725_v30 = vsel %vm1661_vm10, %v1629_v26, %v1693_v28  ;;  %1773 = vst [vmem:[%s2869_s21 + $0xa8] sm:$0xff] %v1741_v29 }
 0x1f3   : > { %1757 = vst [vmem:[%s2869_s21 + $0x28] sm:$0xff] %v1725_v30 }
 0x223   : > { %v2150_v31 = vpop.f32.mrb[8].mxu1 }
 0x224   : > { %v2134_v32 = vpop.f32.mrb[8].mxu0  ;;  %v1611_v33 = vmul.f32 %v2150_v31, %v2848_v13  ;;  %v1547_v34 = vpop.f32.mrb[9].mxu1 }
 0x225   : > { %v1595_v35 = vmul.f32 %v2134_v32, %v2848_v13  ;;  %v1483_v36 = vpop.f32.mrb[9].mxu0  ;;  %v1609_v37 = vmul.f32 %v2848_v13, %v1547_v34  ;;  %v2151_v38 = vpop.f32.mrb[10].mxu1 }
 0x226   : > { %v1650_v39 = vadd.f32 %v2853_v14, %v1611_v33  ;;  %v1593_v42 = vmul.f32 %v2848_v13, %v1483_v36  ;;  %v2135_v40 = vpop.f32.mrb[10].mxu0  ;;  %v1612_v41 = vmul.f32 %v2151_v38, %v2848_v13  ;;  %v1550_v43 = vpop.f32.mrb[11].mxu1 }
 0x227   : > { %v1634_v44 = vadd.f32 %v2853_v14, %v1595_v35  ;;  %v1648_v45 = vadd.f32 %v2853_v14, %v1609_v37  ;;  %v1596_v4 = vmul.f32 %v2135_v40, %v2848_v13  ;;  %v1486_v48 = vpop.f32.mrb[11].mxu0  ;;  %v1610_v6 = vmul.f32 %v2848_v13, %v1550_v43 }
 0x228   : > { %vm1682_vm11 = vcmp.gt.f32.partialorder %v1650_v39, 0.0  ;;  %v1714_v49 = vmul.f32 0.1, %v1650_v39  ;;  %v1632_v50 = vadd.f32 %v2853_v14, %v1593_v42  ;;  %v1651_v51 = vadd.f32 %v2853_v14, %v1612_v41 }
 0x229   : > { %vm1666_vm12 = vcmp.gt.f32.partialorder %v1634_v44, 0.0  ;;  %v1698_v54 = vmul.f32 0.1, %v1634_v44  ;;  %vm1680_vm13 = vcmp.gt.f32.partialorder %v1648_v45, 0.0  ;;  %v1712_v55 = vmul.f32 0.1, %v1648_v45 }
 0x22a   : > { %v1746_v56 = vsel %vm1682_vm11, %v1650_v39, %v1714_v49  ;;  %vm1664_vm14 = vcmp.gt.f32.partialorder %v1632_v50, 0.0  ;;  %v1696_v61 = vmul.f32 0.1, %v1632_v50  ;;  %v1635_v46 = vadd.f32 %v2853_v14, %v1596_v4 }
 0x22b   : > { %v1730_v47 = vsel %vm1666_vm12, %v1634_v44, %v1698_v54  ;;  %1778 = vst [vmem:[%s2869_s21 + $0xd0] sm:$0xff] %v1746_v56  ;;  %v1744_v57 = vsel %vm1680_vm13, %v1648_v45, %v1712_v55  ;;  %vm1683_vm15 = vcmp.gt.f32.partialorder %v1651_v51, 0.0  ;;  %v1715_v58 = vmul.f32 0.1, %v1651_v51 }
 0x22c   : > { %1762 = vst [vmem:[%s2869_s21 + $0x50] sm:$0xff] %v1730_v47  ;;  %v1728_v59 = vsel %vm1664_vm14, %v1632_v50, %v1696_v61  ;;  %1776 = vst [vmem:[%s2869_s21 + $0xc0] sm:$0xff] %v1744_v57  ;;  %vm1667_vm0 = vcmp.gt.f32.partialorder %v1635_v46, 0.0  ;;  %v1699_v60 = vmul.f32 0.1, %v1635_v46  ;;  %v1594_v62 = vmul.f32 %v2848_v13, %v1486_v48 }
 0x22d   : > { %1760 = vst [vmem:[%s2869_s21 + $0x40] sm:$0xff] %v1728_v59  ;;  %v1747_v63 = vsel %vm1683_vm15, %v1651_v51, %v1715_v58  ;;  %v1649_v0 = vadd.f32 %v2853_v14, %v1610_v6 }
 0x22e   : > { %v1731_v1 = vsel %vm1667_vm0, %v1635_v46, %v1699_v60  ;;  %1779 = vst [vmem:[%s2869_s21 + $0xd8] sm:$0xff] %v1747_v63  ;;  %v1633_v2 = vadd.f32 %v2853_v14, %v1594_v62 }
 0x22f   : > { %1763 = vst [vmem:[%s2869_s21 + $0x58] sm:$0xff] %v1731_v1  ;;  %vm1681_vm1 = vcmp.gt.f32.partialorder %v1649_v0, 0.0  ;;  %v1713_v5 = vmul.f32 0.1, %v1649_v0 }
 0x230   : > { %vm1665_vm2 = vcmp.gt.f32.partialorder %v1633_v2, 0.0  ;;  %v1697_v7 = vmul.f32 0.1, %v1633_v2 }
 0x231   : > { %v1745_v8 = vsel %vm1681_vm1, %v1649_v0, %v1713_v5 }
 0x232   : > { %v1729_v9 = vsel %vm1665_vm2, %v1633_v2, %v1697_v7  ;;  %1777 = vst [vmem:[%s2869_s21 + $0xc8] sm:$0xff] %v1745_v8 }
 0x233   : > { %1761 = vst [vmem:[%s2869_s21 + $0x48] sm:$0xff] %v1729_v9 }
 0x25f   : > { %v2154_v10 = vpop.f32.mrb[12].mxu1 }
 0x260   : > { %v2138_v11 = vpop.f32.mrb[12].mxu0  ;;  %v1615_v12 = vmul.f32 %v2154_v10, %v2848_v13  ;;  %v1563_v3 = vpop.f32.mrb[13].mxu1 }
 0x261   : > { %v1599_v15 = vmul.f32 %v2138_v11, %v2848_v13  ;;  %v1499_v16 = vpop.f32.mrb[13].mxu0  ;;  %v1613_v18 = vmul.f32 %v2848_v13, %v1563_v3  ;;  %v2155_v20 = vpop.f32.mrb[14].mxu1 }
 0x262   : > { %v1654_v21 = vadd.f32 %v2853_v14, %v1615_v12  ;;  %v1597_v22 = vmul.f32 %v2848_v13, %v1499_v16  ;;  %v2139_v23 = vpop.f32.mrb[14].mxu0  ;;  %v1616_v52 = vmul.f32 %v2155_v20, %v2848_v13  ;;  %v1566_v24 = vpop.f32.mrb[15].mxu1 }
 0x263   : > { %v1638_v17 = vadd.f32 %v2853_v14, %v1599_v15  ;;  %v1652_v53 = vadd.f32 %v2853_v14, %v1613_v18  ;;  %v1600_v19 = vmul.f32 %v2139_v23, %v2848_v13  ;;  %v1502_v25 = vpop.f32.mrb[15].mxu0  ;;  %v1614_v26 = vmul.f32 %v2848_v13, %v1566_v24 }
 0x264   : > { %vm1686_vm3 = vcmp.gt.f32.partialorder %v1654_v21, 0.0  ;;  %v1718_v27 = vmul.f32 0.1, %v1654_v21  ;;  %v1636_v28 = vadd.f32 %v2853_v14, %v1597_v22  ;;  %v1655_v29 = vadd.f32 %v2853_v14, %v1616_v52 }
 0x265   : > { %vm1670_vm4 = vcmp.gt.f32.partialorder %v1638_v17, 0.0  ;;  %v1702_v30 = vmul.f32 0.1, %v1638_v17  ;;  %vm1684_vm5 = vcmp.gt.f32.partialorder %v1652_v53, 0.0  ;;  %v1716_v31 = vmul.f32 0.1, %v1652_v53 }
 0x266   : > { %v1750_v32 = vsel %vm1686_vm3, %v1654_v21, %v1718_v27  ;;  %vm1668_vm6 = vcmp.gt.f32.partialorder %v1636_v28, 0.0  ;;  %v1700_v33 = vmul.f32 0.1, %v1636_v28  ;;  %v1639_v34 = vadd.f32 %v2853_v14, %v1600_v19 }
 0x267   : > { %v1734_v35 = vsel %vm1670_vm4, %v1638_v17, %v1702_v30  ;;  %1782 = vst [vmem:[%s2869_s21 + $0xf0] sm:$0xff] %v1750_v32  ;;  %v1748_v36 = vsel %vm1684_vm5, %v1652_v53, %v1716_v31  ;;  %vm1687_vm7 = vcmp.gt.f32.partialorder %v1655_v29, 0.0  ;;  %v1719_v37 = vmul.f32 0.1, %v1655_v29 }
 0x268   : > { %1766 = vst [vmem:[%s2869_s21 + $0x70] sm:$0xff] %v1734_v35  ;;  %v1732_v38 = vsel %vm1668_vm6, %v1636_v28, %v1700_v33  ;;  %1780 = vst [vmem:[%s2869_s21 + $0xe0] sm:$0xff] %v1748_v36  ;;  %vm1671_vm8 = vcmp.gt.f32.partialorder %v1639_v34, 0.0  ;;  %v1703_v39 = vmul.f32 0.1, %v1639_v34  ;;  %v1598_v42 = vmul.f32 %v2848_v13, %v1502_v25 }
 0x269   : > { %1764 = vst [vmem:[%s2869_s21 + $0x60] sm:$0xff] %v1732_v38  ;;  %v1751_v40 = vsel %vm1687_vm7, %v1655_v29, %v1719_v37  ;;  %v1653_v41 = vadd.f32 %v2853_v14, %v1614_v26 }
 0x26a   : > { %v1735_v43 = vsel %vm1671_vm8, %v1639_v34, %v1703_v39  ;;  %1783 = vst [vmem:[%s2869_s21 + $0xf8] sm:$0xff] %v1751_v40  ;;  %v1637_v44 = vadd.f32 %v2853_v14, %v1598_v42 }
 0x26b   : > { %1767 = vst [vmem:[%s2869_s21 + $0x78] sm:$0xff] %v1735_v43  ;;  %vm1685_vm9 = vcmp.gt.f32.partialorder %v1653_v41, 0.0  ;;  %v1717_v45 = vmul.f32 0.1, %v1653_v41 }
 0x26c   : > { %vm1669_vm10 = vcmp.gt.f32.partialorder %v1637_v44, 0.0  ;;  %v1701_v4 = vmul.f32 0.1, %v1637_v44 }
 0x26d   : > { %v1749_v48 = vsel %vm1685_vm9, %v1653_v41, %v1717_v45 }
 0x26e   : > { %v1733_v6 = vsel %vm1669_vm10, %v1637_v44, %v1701_v4  ;;  %1781 = vst [vmem:[%s2869_s21 + $0xe8] sm:$0xff] %v1749_v48 }
 0x26f   : > { %1765 = vst [vmem:[%s2869_s21 + $0x68] sm:$0xff] %v1733_v6 }
 0x270 PF: > { %s14_s17 = sadd.s32 1, %s2222_s17   ;;  %s2971_s15 = smov %s2218_s16 }
 0x271   : > { %p11_p5 = scmp.ge.s32.totalorder %s14_s17, 4   ;;  %s2972_s16 = smov %s2974_s18 }
 0x273   :  { %13 = sbr.rel (!%p11_p5) target bundleno = 2 (0x2), region = 69 }

// kernel: conv_bn_relu.2
= control target key start
LH: loop header
LB: loop body
LE: loop exit
PB: predicated region body
PF: predicated region fallthrough
CT: control target
= control target key end

     0   :  { %s2112_s9 = smov 0   ;;  %s2114_s10 = smov 0   ;;  %s2796_s0 = inlined_call_operand.vmem [shape: f32[2,18,18,4], index: 0, kind: input, shape index: {}]   ;;  %s2797_s1 = inlined_call_operand.vmem [shape: bf16[36,128], index: 1, kind: input, shape index: {}]   ;;  %s2798_s2 = inlined_call_operand.vmem [shape: f32[2,1,8,128], index: 2, kind: output, shape index: {}]  }
   0x1   :  { %s2116_s11 = smov 0  }
   0x2 LB: > { %s24_s12 = sadd.s32 1, %s2083_s10  ;;  %p1748_p0 = scmp.ge.s32.totalorder %s2087_s11, 1  ;;  %s2087_s11 = sphi %s2116_s11, %s12_s11   ;;  %s2083_s10 = sphi %s2114_s10, %s2800_s10   ;;  %s2079_s9 = sphi %s2112_s9, %s2799_s9  }
   0x3   : > { %p26_p1 = scmp.ge.s32.totalorder %s24_s12, 2  ;;  %p126_p2 = scmp.lt.s32.totalorder %s2087_s11, 3 }
   0x5   : > { %s2802_s12 = smov (%p26_p1, %s24_s12), 0  ;;  %p127_p3 = pnand %p1748_p0, %p126_p2 }
   0x6   : > { %p150_p4 = scmp.lt.s32.totalorder (!%p127_p3), %s2079_s9, 1  ;;  %s2089_s17 = smov (!%p127_p3), 4   ;;  %vm214_vm0 = vcmask (!%p127_p3), 31744   ;;  %v2062_v53 = vld [vmem:[%s2797_s1] sm:$0xff] (!%p127_p3)   ;;  %v2063_v54 = vld [vmem:[%s2797_s1 + $0x8] sm:$0xff] (!%p127_p3)   ;;  %vm1354_vm1 = vcmask (!%p127_p3), 1041408  }
   0x7   : > { %130 = sbr.rel (%p127_p3) target bundleno = 713 (0x2c9), region = 28  ;;  %s2090_s18 = smov (!%p127_p3), 8   ;;  %1983 = vmatprep.subr.bf16.mxu0 (!%p127_p3), %v2062_v53  ;;  %v2064_v59 = vld [vmem:[%s2797_s1 + $0x10] ss:$0 sps:$4 sm:$0x33] (!%p127_p3)   ;;  %2021 = vmatprep.subr.bf16.mxu1 (!%p127_p3), %v2062_v53  ;;  %vm343_vm2 = vcmask (!%p127_p3), 64544  }
   0x8   : > { %s2091_s19 = smov (!%p127_p3), 12   ;;  %s2092_s20 = smov (!%p127_p3), 16   ;;  %1984 = vmatpush3.bf16.msra.mxu0 (!%p127_p3), %v2062_v53  ;;  %2024 = vmatpush3.bf16.msra.mxu1 (!%p127_p3), %v2062_v53  ;;  %v1356_v62 = vsel (!%p127_p3), %vm1354_vm1, %v2064_v59, 0  ;;  %vm472_vm3 = vcmask (!%p127_p3), 97344   ;;  %vm604_vm4 = vcmask (!%p127_p3), 130144   ;;  %vm733_vm5 = vcmask (!%p127_p3), 162944  }
   0x9   : > { %s2093_s21 = smov (!%p127_p3), 20   ;;  %s2094_s26 = smov (!%p127_p3), 24   ;;  %1985 = vmatprep.subr.bf16.mxu0 (!%p127_p3), %v2063_v54  ;;  %2022 = vmatprep.subr.bf16.mxu1 (!%p127_p3), %v2063_v54  ;;  %vm862_vm6 = vcmask (!%p127_p3), 195744   ;;  %vm994_vm7 = vcmask (!%p127_p3), 228544   ;;  %vm1123_vm8 = vcmask (!%p127_p3), 261344   ;;  %vm1252_vm9 = vcmask (!%p127_p3), 294144  }
   0xa   : > { %s2095_s29 = smov (!%p127_p3), 28   ;;  %s2096_s30 = smov (!%p127_p3), 32   ;;  %vm1305_vm10 = vcmask (!%p127_p3), 293888   ;;  %vm1659_vm11 = vcmask (!%p127_p3), 1040384  }
   0xc   : > { %1986 = vmatpush3.bf16.msra.mxu0 (!%p127_p3), %v2063_v54  ;;  %2025 = vmatpush3.bf16.msra.mxu1 (!%p127_p3), %v2063_v54 }
   0xd   : > { %2027 = vmatprep.subr.msk.bf16.mxu0 (!%p127_p3), %vm1354_vm1, %v2064_v59  ;;  %2028 = vmatprep.subr.msk.bf16.mxu1 (!%p127_p3), %vm1354_vm1, %v2064_v59 }
   0xe   : > { %s2804_s9 = smov (!%p150_p4, %s2079_s9), 1 }
   0xf   : > { %s2029_s13 = smul.u32 432, %s2804_s9  ;;  %s1750_s3 = sshll.u32 %s2804_s9, 3 }
  0x10   : > { %1988 = vmatpush3.bf16.msra.mxu0 %v1356_v62  ;;  %2026 = vmatpush3.bf16.msra.mxu1 %v1356_v62  ;;  %s161_s6 = scalar_lea.vmem %s2798_s2, %s1750_s3 }
  0x11   : > { %s2136_s16 = scalar_lea.vmem %s2796_s0, %s2029_s13 }
  0x12   : > { %v231_v0 = vld [vmem:[%s2136_s16 + $0x1] sm:$0xff]  ;;  %v232_v1 = vld [vmem:[%s2136_s16 + $0x9] sm:$0xff]  ;;  %v233_v5 = vld [vmem:[%s2136_s16 + $0x19] sm:$0xff] }
  0x13   : > { %v360_v2 = vld [vmem:[%s2136_s16 + $0x2] sm:$0xff]  ;;  %v263_v3 = vpack.c.bf16 %v232_v1, %v231_v0  ;;  %v361_v4 = vld [vmem:[%s2136_s16 + $0xa] sm:$0xff]  ;;  %v362_v8 = vld [vmem:[%s2136_s16 + $0x1a] sm:$0xff] }
  0x14   : > { %v234_v6 = vld [vmem:[%s2136_s16 + $0x21] sm:$0xff]  ;;  %v392_v7 = vpack.c.bf16 %v361_v4, %v360_v2  ;;  %v1751_v10 = vld [vmem:[%s2136_s16 + $0x18] sm:$0xff]  ;;  %v1753_v13 = vld [vmem:[%s2136_s16 + $0x30] sm:$0xff] }
  0x15   : > { %v363_v9 = vld [vmem:[%s2136_s16 + $0x22] sm:$0xff]  ;;  %295 = vrot.lane.b32.xlu0 %v263_v3, %s2089_s17  ;;  %v264_v11 = vpack.c.bf16 %v234_v6, %v233_v5  ;;  %v1754_v14 = vld [vmem:[%s2136_s16 + $0x38] sm:$0xff]  ;;  %v1850_v19 = vld [vmem:[%s2136_s16 + $0x50] sm:$0xff] }
  0x16   : > { %v1752_v12 = vld [vmem:[%s2136_s16 + $0x20] sm:$0xff]  ;;  %424 = vrot.lane.b32.xlu1 %v392_v7, %s2090_s18  ;;  %v393_v15 = vpack.c.bf16 %v363_v9, %v362_v8  ;;  %v525_v17 = vpack.c.bf16 %v1754_v14, %v1753_v13  ;;  %v1849_v18 = vld [vmem:[%s2136_s16 + $0x48] sm:$0xff]  ;;  %v1785_v23 = vld [vmem:[%s2136_s16 + $0x31] sm:$0xff] }
  0x17   : > { %v524_v16 = vpack.c.bf16 %v1752_v12, %v1751_v10  ;;  %v2154_v20 = vpack.c.bf16 %v1850_v19, %v1849_v18  ;;  %v1757_v21 = vld [vmem:[%s2136_s16 + $0x60] sm:$0xff]  ;;  %v1758_v22 = vld [vmem:[%s2136_s16 + $0x68] sm:$0xff]  ;;  %v1853_v26 = vld [vmem:[%s2136_s16 + $0x78] sm:$0xff] }
  0x18   : > { %217 = vst.msk [vmem:[#allocation2 + $0x10] sm:$0xff] %vm214_vm0, %v525_v17  ;;  %v2163_v24 = vpack.c.bf16 %v1758_v22, %v1757_v21  ;;  %v1786_v25 = vld [vmem:[%s2136_s16 + $0x39] sm:$0xff]  ;;  %v1761_v29 = vld [vmem:[%s2136_s16 + $0x90] sm:$0xff]  ;;  %v1857_v35 = vld [vmem:[%s2136_s16 + $0xa8] sm:$0xff] }
  0x19   : > { %216 = vst.msk [vmem:[#allocation2 + $0x8] sm:$0xff] %vm214_vm0, %v524_v16  ;;  %297 = vrot.lane.b32.xlu0 %v264_v11, %s2089_s17  ;;  %218 = vst.msk [vmem:[#allocation2 + $0x18] sm:$0xff] %vm214_vm0, %v2154_v20  ;;  %v1854_v27 = vld [vmem:[%s2136_s16 + $0x80] sm:$0xff]  ;;  %v1762_v30 = vld [vmem:[%s2136_s16 + $0x98] sm:$0xff]  ;;  %v2178_v31 = vpack.c.bf16 %v1786_v25, %v1785_v23 }
  0x1a   : > { %426 = vrot.lane.b32.xlu1 %v393_v15, %s2090_s18  ;;  %v2170_v28 = vpack.c.bf16 %v1854_v27, %v1853_v26  ;;  %219 = vst.msk [vmem:[#allocation2 + $0x20] sm:$0xff] %vm214_vm0, %v2163_v24  ;;  %v1817_v32 = vld [vmem:[%s2136_s16 + $0x32] sm:$0xff]  ;;  %v2181_v33 = vpack.c.bf16 %v1762_v30, %v1761_v29  ;;  %v1818_v34 = vld [vmem:[%s2136_s16 + $0x3a] sm:$0xff]  ;;  %v1766_v39 = vld [vmem:[%s2136_s16 + $0xc8] sm:$0xff] }
  0x1b   : > { %v1858_v36 = vld [vmem:[%s2136_s16 + $0xb0] sm:$0xff]  ;;  %v1765_v38 = vld [vmem:[%s2136_s16 + $0xc0] sm:$0xff]  ;;  %v783_v40 = vpack.c.bf16 %v1818_v34, %v1817_v32  ;;  %v167_v43 = vld [vmem:[%s2136_s16 + $0x8] sm:$0xff] }
  0x1c   : > { %220 = vst.msk [vmem:[#allocation2 + $0x28] sm:$0xff] %vm214_vm0, %v2170_v28  ;;  %v2188_v37 = vpack.c.bf16 %v1858_v36, %v1857_v35  ;;  %221 = vst.msk [vmem:[#allocation2 + $0x30] sm:$0xff] %vm214_vm0, %v2181_v33  ;;  %v2197_v41 = vpack.c.bf16 %v1766_v39, %v1765_v38  ;;  %v166_v42 = vld [vmem:[%s2136_s16] sm:$0xff]  ;;  %v1861_v45 = vld [vmem:[%s2136_s16 + $0xd8] sm:$0xff] }
  0x1d   : > { %556 = vrot.lane.b32.xlu0 %v524_v16, %s2091_s19  ;;  %v198_v44 = vpack.c.bf16 %v167_v43, %v166_v42  ;;  %v1862_v46 = vld [vmem:[%s2136_s16 + $0xe0] sm:$0xff]  ;;  %v1769_v48 = vld [vmem:[%s2136_s16 + $0xf0] sm:$0xff]  ;;  %v1770_v49 = vld [vmem:[%s2136_s16 + $0xf8] sm:$0xff] }
  0x1e   : > { %558 = vrot.lane.b32.xlu1 %v525_v17, %s2091_s19  ;;  %222 = vst.msk [vmem:[#allocation2 + $0x38] sm:$0xff] %vm214_vm0, %v2188_v37  ;;  %223 = vst.msk [vmem:[#allocation2 + $0x40] sm:$0xff] %vm214_vm0, %v2197_v41  ;;  %v2208_v47 = vpack.c.bf16 %v1862_v46, %v1861_v45  ;;  %v1881_v50 = vld [vmem:[%s2136_s16 + $0x49] sm:$0xff]  ;;  %v1882_v51 = vld [vmem:[%s2136_s16 + $0x51] sm:$0xff]  ;;  %v2216_v52 = vpack.c.bf16 %v1770_v49, %v1769_v48 }
  0x1f   : > { %215 = vst.msk [vmem:[#allocation2] sm:$0xff] %vm214_vm0, %v198_v44  ;;  %v1865_v55 = vld [vmem:[%s2136_s16 + $0x108] sm:$0xff]  ;;  %v1866_v56 = vld [vmem:[%s2136_s16 + $0x110] sm:$0xff]  ;;  %v1044_v57 = vpack.c.bf16 %v1882_v51, %v1881_v50  ;;  %v1773_v2 = vld [vmem:[%s2136_s16 + $0x120] sm:$0xff] }
  0x20   : > { %224 = vst.msk [vmem:[#allocation2 + $0x48] sm:$0xff] %vm214_vm0, %v2208_v47  ;;  %225 = vst.msk [vmem:[#allocation2 + $0x50] sm:$0xff] %vm214_vm0, %v2216_v52  ;;  %v2233_v58 = vpack.c.bf16 %v1866_v56, %v1865_v55  ;;  %v1913_v60 = vld [vmem:[%s2136_s16 + $0x4a] sm:$0xff]  ;;  %v1914_v61 = vld [vmem:[%s2136_s16 + $0x52] sm:$0xff] }
  0x21   : > { %685 = vrot.lane.b32.xlu0 %v264_v11, %s2092_s20  ;;  %v1173_v63 = vpack.c.bf16 %v1914_v61, %v1913_v60  ;;  %v1789_v0 = vld [vmem:[%s2136_s16 + $0x61] sm:$0xff]  ;;  %v1790_v1 = vld [vmem:[%s2136_s16 + $0x69] sm:$0xff]  ;;  %v1885_v9 = vld [vmem:[%s2136_s16 + $0x79] sm:$0xff] }
  0x22   : > { %687 = vrot.lane.b32.xlu1 %v2178_v31, %s2092_s20  ;;  %226 = vst.msk [vmem:[#allocation2 + $0x58] sm:$0xff] %vm214_vm0, %v2233_v58  ;;  %v1774_v3 = vld [vmem:[%s2136_s16 + $0x128] sm:$0xff]  ;;  %v656_v5 = vpack.c.bf16 %v1790_v1, %v1789_v0  ;;  %v1869_v11 = vld [vmem:[%s2136_s16 + $0x138] sm:$0xff]  ;;  %v1870_v12 = vld [vmem:[%s2136_s16 + $0x140] sm:$0xff] }
  0x23   : > { %v2259_v4 = vpack.c.bf16 %v1774_v3, %v1773_v2  ;;  %v1821_v6 = vld [vmem:[%s2136_s16 + $0x62] sm:$0xff]  ;;  %v1822_v7 = vld [vmem:[%s2136_s16 + $0x6a] sm:$0xff]  ;;  %v2277_v13 = vpack.c.bf16 %v1870_v12, %v1869_v11  ;;  %v1794_v19 = vld [vmem:[%s2136_s16 + $0x99] sm:$0xff] }
  0x24   : > { %v785_v8 = vpack.c.bf16 %v1822_v7, %v1821_v6  ;;  %v1886_v10 = vld [vmem:[%s2136_s16 + $0x81] sm:$0xff]  ;;  %v1793_v18 = vld [vmem:[%s2136_s16 + $0x91] sm:$0xff]  ;;  %v1889_v27 = vld [vmem:[%s2136_s16 + $0xa9] sm:$0xff] }
  0x25   : > { %814 = vrot.lane.b32.xlu0 %v393_v15, %s2093_s21  ;;  %227 = vst.msk [vmem:[#allocation2 + $0x60] sm:$0xff] %vm214_vm0, %v2259_v4  ;;  %v1046_v14 = vpack.c.bf16 %v1886_v10, %v1885_v9  ;;  %228 = vst.msk [vmem:[#allocation2 + $0x68] sm:$0xff] %vm214_vm0, %v2277_v13  ;;  %v1917_v15 = vld [vmem:[%s2136_s16 + $0x7a] sm:$0xff]  ;;  %v1918_v16 = vld [vmem:[%s2136_s16 + $0x82] sm:$0xff]  ;;  %v658_v23 = vpack.c.bf16 %v1794_v19, %v1793_v18 }
  0x26   : > { %816 = vrot.lane.b32.xlu1 %v783_v40, %s2093_s21  ;;  %v1778_v21 = vld [vmem:[%s2136_s16 + $0x158] sm:$0xff]  ;;  %v1873_v29 = vld [vmem:[%s2136_s16 + $0x168] sm:$0xff]  ;;  %v1874_v30 = vld [vmem:[%s2136_s16 + $0x170] sm:$0xff] }
  0x27   : > { %v1826_v25 = vld [vmem:[%s2136_s16 + $0x9a] sm:$0xff]  ;;  %v1921_v34 = vld [vmem:[%s2136_s16 + $0xaa] sm:$0xff]  ;;  %v1922_v35 = vld [vmem:[%s2136_s16 + $0xb2] sm:$0xff] }
  0x28   : > { %v1177_v36 = vpack.c.bf16 %v1922_v35, %v1921_v34  ;;  %v1798_v38 = vld [vmem:[%s2136_s16 + $0xc9] sm:$0xff]  ;;  %v1894_v45 = vld [vmem:[%s2136_s16 + $0xe1] sm:$0xff]  ;;  %v1801_v62 = vld [vmem:[%s2136_s16 + $0xf1] sm:$0xff] }
  0x29   : > { %946 = vrot.lane.b32.xlu0 %v525_v17, %s2094_s26  ;;  %v1175_v17 = vpack.c.bf16 %v1918_v16, %v1917_v15  ;;  %v1830_v42 = vld [vmem:[%s2136_s16 + $0xca] sm:$0xff]  ;;  %v1925_v51 = vld [vmem:[%s2136_s16 + $0xda] sm:$0xff]  ;;  %v1926_v53 = vld [vmem:[%s2136_s16 + $0xe2] sm:$0xff] }
  0x2a   : > { %948 = vrot.lane.b32.xlu1 %v2154_v20, %s2094_s26  ;;  %v1179_v55 = vpack.c.bf16 %v1926_v53, %v1925_v51  ;;  %v1833_v3 = vld [vmem:[%s2136_s16 + $0xf2] sm:$0xff]  ;;  %v1897_v10 = vld [vmem:[%s2136_s16 + $0x109] sm:$0xff] }
  0x2b   : > { %v1898_v11 = vld [vmem:[%s2136_s16 + $0x111] sm:$0xff]  ;;  %v1934_v51 = vld [vmem:[%s2136_s16 + $0x142] sm:$0xff] }
  0x2c   : > { %v1929_v18 = vld [vmem:[%s2136_s16 + $0x10a] sm:$0xff] }
  0x2d   : > { %1075 = vrot.lane.b32.xlu0 %v2178_v31, %s2095_s29 }
  0x2e   : > { %1077 = vrot.lane.b32.xlu1 %v1044_v57, %s2095_s29 }
  0x31   : > { %1204 = vrot.lane.b32.xlu0 %v783_v40, %s2096_s30 }
  0x32   : > { %299 = vrot.lane.b32.xlu1 %v2178_v31, %s2089_s17  ;;  %v2317_v31 = vpack.c.bf16 %v1874_v30, %v1873_v29  ;;  %v1805_v29 = vld [vmem:[%s2136_s16 + $0x121] sm:$0xff]  ;;  %v1806_v30 = vld [vmem:[%s2136_s16 + $0x129] sm:$0xff] }
  0x33   : > { %v664_v34 = vpack.c.bf16 %v1806_v30, %v1805_v29  ;;  %v1813_v29 = vld [vmem:[%s2136_s16 + $0x181] sm:$0xff]  ;;  %v1814_v30 = vld [vmem:[%s2136_s16 + $0x189] sm:$0xff] }
  0x34   : > { %230 = vst.msk [vmem:[#allocation2 + $0x78] sm:$0xff] %vm214_vm0, %v2317_v31 }
  0x35   : > { %1206 = vrot.lane.b32.xlu0 %v1173_v63, %s2096_s30 }
  0x36   : > { %301 = vrot.lane.b32.xlu1 %v1044_v57, %s2089_s17 }
  0x39   : > { %428 = vrot.lane.b32.xlu0 %v783_v40, %s2090_s18  ;;  %v1829_v40 = vld [vmem:[%s2136_s16 + $0xc2] sm:$0xff] }
  0x3a   : > { %430 = vrot.lane.b32.xlu1 %v1173_v63, %s2090_s18  ;;  %v789_v43 = vpack.c.bf16 %v1830_v42, %v1829_v40 }
  0x3d   : > { %560 = vrot.lane.b32.xlu0 %v2154_v20, %s2091_s19  ;;  %v1777_v20 = vld [vmem:[%s2136_s16 + $0x150] sm:$0xff] }
  0x3e   : > { %562 = vrot.lane.b32.xlu1 %v2163_v24, %s2091_s19  ;;  %v2299_v22 = vpack.c.bf16 %v1778_v21, %v1777_v20 }
  0x40   : > { %229 = vst.msk [vmem:[#allocation2 + $0x70] sm:$0xff] %vm214_vm0, %v2299_v22 }
  0x41   : > { %689 = vrot.lane.b32.xlu0 %v1044_v57, %s2092_s20 }
  0x42   : > { %691 = vrot.lane.b32.xlu1 %v656_v5, %s2092_s20 }
  0x45   : > { %818 = vrot.lane.b32.xlu0 %v1173_v63, %s2093_s21  ;;  %v1802_v63 = vld [vmem:[%s2136_s16 + $0xf9] sm:$0xff] }
  0x46   : > { %820 = vrot.lane.b32.xlu1 %v785_v8, %s2093_s21  ;;  %v662_v1 = vpack.c.bf16 %v1802_v63, %v1801_v62  ;;  %v1810_v62 = vld [vmem:[%s2136_s16 + $0x159] sm:$0xff] }
  0x49   : > { %950 = vrot.lane.b32.xlu0 %v2163_v24, %s2094_s26  ;;  %v1825_v24 = vld [vmem:[%s2136_s16 + $0x92] sm:$0xff] }
  0x4a   : > { %952 = vrot.lane.b32.xlu1 %v2170_v28, %s2094_s26  ;;  %v787_v26 = vpack.c.bf16 %v1826_v25, %v1825_v24 }
  0x4d   : > { %1079 = vrot.lane.b32.xlu0 %v656_v5, %s2095_s29 }
  0x4e   : > { %1081 = vrot.lane.b32.xlu1 %v1046_v14, %s2095_s29 }
  0x51   : > { %1208 = vrot.lane.b32.xlu0 %v785_v8, %s2096_s30 }
  0x52   : > { %303 = vrot.lane.b32.xlu1 %v656_v5, %s2089_s17  ;;  %v1834_v5 = vld [vmem:[%s2136_s16 + $0xfa] sm:$0xff] }
  0x55   : > { %1210 = vrot.lane.b32.xlu0 %v1175_v17, %s2096_s30 }
  0x56   : > { %305 = vrot.lane.b32.xlu1 %v1046_v14, %s2089_s17 }
  0x59   : > { %432 = vrot.lane.b32.xlu0 %v785_v8, %s2090_s18 }
  0x5a   : > { %434 = vrot.lane.b32.xlu1 %v1175_v17, %s2090_s18 }
  0x5d   : > { %564 = vrot.lane.b32.xlu0 %v2170_v28, %s2091_s19  ;;  %v1890_v28 = vld [vmem:[%s2136_s16 + $0xb1] sm:$0xff] }
  0x5e   : > { %566 = vrot.lane.b32.xlu1 %v2181_v33, %s2091_s19  ;;  %v1048_v32 = vpack.c.bf16 %v1890_v28, %v1889_v27 }
  0x61   : > { %693 = vrot.lane.b32.xlu0 %v1046_v14, %s2092_s20  ;;  %v1052_v14 = vpack.c.bf16 %v1898_v11, %v1897_v10 }
  0x62   : > { %695 = vrot.lane.b32.xlu1 %v658_v23, %s2092_s20 }
  0x65   : > { %822 = vrot.lane.b32.xlu0 %v1175_v17, %s2093_s21 }
  0x66   : > { %824 = vrot.lane.b32.xlu1 %v787_v26, %s2093_s21 }
  0x69   : > { %954 = vrot.lane.b32.xlu0 %v2181_v33, %s2094_s26  ;;  %v1797_v33 = vld [vmem:[%s2136_s16 + $0xc1] sm:$0xff] }
  0x6a   : > { %956 = vrot.lane.b32.xlu1 %v2188_v37, %s2094_s26  ;;  %v660_v39 = vpack.c.bf16 %v1798_v38, %v1797_v33  ;;  %v1838_v33 = vld [vmem:[%s2136_s16 + $0x12a] sm:$0xff] }
  0x6d   : > { %1083 = vrot.lane.b32.xlu0 %v658_v23, %s2095_s29 }
  0x6e   : > { %1085 = vrot.lane.b32.xlu1 %v1048_v32, %s2095_s29 }
  0x71   : > { %1212 = vrot.lane.b32.xlu0 %v787_v26, %s2096_s30 }
  0x72   : > { %307 = vrot.lane.b32.xlu1 %v658_v23, %s2089_s17 }
  0x75   : > { %1214 = vrot.lane.b32.xlu0 %v1177_v36, %s2096_s30 }
  0x76   : > { %309 = vrot.lane.b32.xlu1 %v1048_v32, %s2089_s17 }
  0x79   : > { %436 = vrot.lane.b32.xlu0 %v787_v26, %s2090_s18 }
  0x7a   : > { %438 = vrot.lane.b32.xlu1 %v1177_v36, %s2090_s18 }
  0x7d   : > { %568 = vrot.lane.b32.xlu0 %v2188_v37, %s2091_s19  ;;  %v1893_v37 = vld [vmem:[%s2136_s16 + $0xd9] sm:$0xff] }
  0x7e   : > { %570 = vrot.lane.b32.xlu1 %v2197_v41, %s2091_s19  ;;  %v1050_v48 = vpack.c.bf16 %v1894_v45, %v1893_v37 }
  0x81   : > { %697 = vrot.lane.b32.xlu0 %v1048_v32, %s2092_s20 }
  0x82   : > { %699 = vrot.lane.b32.xlu1 %v660_v39, %s2092_s20 }
  0x85   : > { %826 = vrot.lane.b32.xlu0 %v1177_v36, %s2093_s21  ;;  %v1837_v36 = vld [vmem:[%s2136_s16 + $0x122] sm:$0xff] }
  0x86   : > { %828 = vrot.lane.b32.xlu1 %v789_v43, %s2093_s21 }
  0x87   : > { %v296_v44 = vpop.permute.xlu0 %295 }
  0x88   : > { %344 = vst.msk [vmem:[#allocation2] sm:$0xff] %vm343_vm2, %v296_v44  ;;  %v425_v46 = vpop.permute.xlu1 %424  ;;  %v1902_v44 = vld [vmem:[%s2136_s16 + $0x141] sm:$0xff] }
  0x89   : > { %473 = vst.msk [vmem:[#allocation2] sm:$0xff] %vm472_vm3, %v425_v46  ;;  %958 = vrot.lane.b32.xlu0 %v2197_v41, %s2094_s26 }
  0x8a   : > { %960 = vrot.lane.b32.xlu1 %v2208_v47, %s2094_s26 }
  0x8b   : > { %v298_v49 = vpop.permute.xlu0 %297 }
  0x8c   : > { %345 = vst.msk [vmem:[#allocation2 + $0x8] sm:$0xff] %vm343_vm2, %v298_v49  ;;  %v427_v50 = vpop.permute.xlu1 %426 }
  0x8d   : > { %474 = vst.msk [vmem:[#allocation2 + $0x8] sm:$0xff] %vm472_vm3, %v427_v50  ;;  %1087 = vrot.lane.b32.xlu0 %v660_v39, %s2095_s29  ;;  %v1933_v50 = vld [vmem:[%s2136_s16 + $0x13a] sm:$0xff] }
  0x8e   : > { %1089 = vrot.lane.b32.xlu1 %v1050_v48, %s2095_s29 }
  0x8f   : > { %v557_v54 = vpop.permute.xlu0 %556 }
  0x90   : > { %605 = vst.msk [vmem:[#allocation2] sm:$0xff] %vm604_vm4, %v557_v54  ;;  %v559_v41 = vpop.permute.xlu1 %558 }
  0x91   : > { %606 = vst.msk [vmem:[#allocation2 + $0x8] sm:$0xff] %vm604_vm4, %v559_v41  ;;  %1216 = vrot.lane.b32.xlu0 %v789_v43, %s2096_s30  ;;  %v1183_v41 = vpack.c.bf16 %v1934_v51, %v1933_v50  ;;  %v1941_v51 = vld [vmem:[%s2136_s16 + $0x19a] sm:$0xff] }
  0x92   : > { %311 = vrot.lane.b32.xlu1 %v660_v39, %s2089_s17  ;;  %v793_v39 = vpack.c.bf16 %v1838_v33, %v1837_v36  ;;  %v1845_v36 = vld [vmem:[%s2136_s16 + $0x182] sm:$0xff]  ;;  %v1846_v33 = vld [vmem:[%s2136_s16 + $0x18a] sm:$0xff] }
  0x93   : > { %v686_v56 = vpop.permute.xlu0 %685 }
  0x94   : > { %734 = vst.msk [vmem:[#allocation2] sm:$0xff] %vm733_vm5, %v686_v56  ;;  %v688_v57 = vpop.permute.xlu1 %687 }
  0x95   : > { %735 = vst.msk [vmem:[#allocation2 + $0x8] sm:$0xff] %vm733_vm5, %v688_v57  ;;  %1218 = vrot.lane.b32.xlu0 %v1179_v55, %s2096_s30 }
  0x96   : > { %313 = vrot.lane.b32.xlu1 %v1050_v48, %s2089_s17 }
  0x97   : > { %v815_v59 = vpop.permute.xlu0 %814 }
  0x98   : > { %863 = vst.msk [vmem:[#allocation2] sm:$0xff] %vm862_vm6, %v815_v59  ;;  %v817_v60 = vpop.permute.xlu1 %816 }
  0x99   : > { %864 = vst.msk [vmem:[#allocation2 + $0x8] sm:$0xff] %vm862_vm6, %v817_v60  ;;  %440 = vrot.lane.b32.xlu0 %v789_v43, %s2090_s18  ;;  %v1901_v43 = vld [vmem:[%s2136_s16 + $0x139] sm:$0xff] }
  0x9a   : > { %442 = vrot.lane.b32.xlu1 %v1179_v55, %s2090_s18  ;;  %v1054_v45 = vpack.c.bf16 %v1902_v44, %v1901_v43 }
  0x9b   : > { %v947_v61 = vpop.permute.xlu0 %946 }
  0x9c   : > { %995 = vst.msk [vmem:[#allocation2] sm:$0xff] %vm994_vm7, %v947_v61  ;;  %v949_v0 = vpop.permute.xlu1 %948  ;;  %v1809_v61 = vld [vmem:[%s2136_s16 + $0x151] sm:$0xff] }
  0x9d   : > { %996 = vst.msk [vmem:[#allocation2 + $0x8] sm:$0xff] %vm994_vm7, %v949_v0  ;;  %572 = vrot.lane.b32.xlu0 %v2208_v47, %s2091_s19  ;;  %v791_v47 = vpack.c.bf16 %v1834_v5, %v1833_v3  ;;  %v666_v0 = vpack.c.bf16 %v1810_v62, %v1809_v61  ;;  %v1842_v3 = vld [vmem:[%s2136_s16 + $0x15a] sm:$0xff] }
  0x9e   : > { %574 = vrot.lane.b32.xlu1 %v2216_v52, %s2091_s19 }
  0x9f   : > { %v1076_v2 = vpop.permute.xlu0 %1075 }
  0xa0   : > { %1124 = vst.msk [vmem:[#allocation2] sm:$0xff] %vm1123_vm8, %v1076_v2  ;;  %v1078_v6 = vpop.permute.xlu1 %1077  ;;  %v1841_v2 = vld [vmem:[%s2136_s16 + $0x152] sm:$0xff] }
  0xa1   : > { %1125 = vst.msk [vmem:[#allocation2 + $0x8] sm:$0xff] %vm1123_vm8, %v1078_v6  ;;  %701 = vrot.lane.b32.xlu0 %v1050_v48, %s2092_s20  ;;  %v795_v6 = vpack.c.bf16 %v1842_v3, %v1841_v2 }
  0xa2   : > { %703 = vrot.lane.b32.xlu1 %v662_v1, %s2092_s20 }
  0xa3   : > { %v1205_v7 = vpop.permute.xlu0 %1204 }
  0xa4   : > { %1253 = vst.msk [vmem:[#allocation2] sm:$0xff] %vm1252_vm9, %v1205_v7  ;;  %v300_v8 = vpop.permute.xlu1 %299 }
  0xa5   : > { %346 = vst.msk [vmem:[#allocation2 + $0x10] sm:$0xff] %vm343_vm2, %v300_v8  ;;  %830 = vrot.lane.b32.xlu0 %v1179_v55, %s2093_s21  ;;  %v1905_v8 = vld [vmem:[%s2136_s16 + $0x169] sm:$0xff] }
  0xa6   : > { %832 = vrot.lane.b32.xlu1 %v791_v47, %s2093_s21 }
  0xa7   : > { %v1207_v9 = vpop.permute.xlu0 %1206 }
  0xa8   : > { %1254 = vst.msk [vmem:[#allocation2 + $0x8] sm:$0xff] %vm1252_vm9, %v1207_v9  ;;  %v302_v12 = vpop.permute.xlu1 %301  ;;  %v1906_v9 = vld [vmem:[%s2136_s16 + $0x171] sm:$0xff] }
  0xa9   : > { %347 = vst.msk [vmem:[#allocation2 + $0x18] sm:$0xff] %vm343_vm2, %v302_v12  ;;  %962 = vrot.lane.b32.xlu0 %v2216_v52, %s2094_s26  ;;  %v1930_v52 = vld [vmem:[%s2136_s16 + $0x112] sm:$0xff]  ;;  %v1056_v11 = vpack.c.bf16 %v1906_v9, %v1905_v8 }
  0xaa   : > { %964 = vrot.lane.b32.xlu1 %v2233_v58, %s2094_s26  ;;  %v1181_v23 = vpack.c.bf16 %v1930_v52, %v1929_v18 }
  0xab   : > { %v429_v15 = vpop.permute.xlu0 %428  ;;  %v1269_v16 = vld [vmem:[#allocation2] sm:$0xff] }
  0xac   : > { %475 = vst.msk [vmem:[#allocation2 + $0x10] sm:$0xff] %vm472_vm3, %v429_v15  ;;  %v431_v17 = vpop.permute.xlu1 %430  ;;  %1989 = vmatprep.mubr.msk.bf16.mxu0 %vm1305_vm10, %v1269_v16  ;;  %v1937_v16 = vld [vmem:[%s2136_s16 + $0x16a] sm:$0xff] }
  0xad   : > { %476 = vst.msk [vmem:[#allocation2 + $0x18] sm:$0xff] %vm472_vm3, %v431_v17  ;;  %1091 = vrot.lane.b32.xlu0 %v662_v1, %s2095_s29  ;;  %v1938_v17 = vld [vmem:[%s2136_s16 + $0x172] sm:$0xff] }
  0xae   : > { %1093 = vrot.lane.b32.xlu1 %v1052_v14, %s2095_s29 }
  0xaf   : > { %v561_v19 = vpop.permute.xlu0 %560  ;;  %v1270_v20 = vld [vmem:[#allocation2 + $0x8] sm:$0xff] }
  0xb0   : > { %607 = vst.msk [vmem:[#allocation2 + $0x10] sm:$0xff] %vm604_vm4, %v561_v19  ;;  %v563_v21 = vpop.permute.xlu1 %562  ;;  %1990 = vmatmul.mubr.msk.bf16.vlgmr.msra.gmra.mrb[0].mxu0 %vm1305_vm10, %v1270_v20  ;;  %v1185_v19 = vpack.c.bf16 %v1938_v17, %v1937_v16 }
  0xb1   : > { %608 = vst.msk [vmem:[#allocation2 + $0x18] sm:$0xff] %vm604_vm4, %v563_v21  ;;  %1220 = vrot.lane.b32.xlu0 %v791_v47, %s2096_s30 }
  0xb2   : > { %315 = vrot.lane.b32.xlu1 %v662_v1, %s2089_s17 }
  0xb3   : > { %v690_v24 = vpop.permute.xlu0 %689 }
  0xb4   : > { %736 = vst.msk [vmem:[#allocation2 + $0x10] sm:$0xff] %vm733_vm5, %v690_v24  ;;  %v692_v25 = vpop.permute.xlu1 %691  ;;  %v1781_v24 = vld [vmem:[%s2136_s16 + $0x180] sm:$0xff] }
  0xb5   : > { %737 = vst.msk [vmem:[#allocation2 + $0x18] sm:$0xff] %vm733_vm5, %v692_v25  ;;  %1222 = vrot.lane.b32.xlu0 %v1181_v23, %s2096_s30  ;;  %v1782_v25 = vld [vmem:[%s2136_s16 + $0x188] sm:$0xff] }
  0xb6   : > { %317 = vrot.lane.b32.xlu1 %v1052_v14, %s2089_s17 }
  0xb7   : > { %v819_v26 = vpop.permute.xlu0 %818 }
  0xb8   : > { %865 = vst.msk [vmem:[#allocation2 + $0x10] sm:$0xff] %vm862_vm6, %v819_v26  ;;  %v821_v27 = vpop.permute.xlu1 %820 }
  0xb9   : > { %866 = vst.msk [vmem:[#allocation2 + $0x18] sm:$0xff] %vm862_vm6, %v821_v27  ;;  %444 = vrot.lane.b32.xlu0 %v791_v47, %s2090_s18  ;;  %v539_v27 = vpack.c.bf16 %v1782_v25, %v1781_v24 }
  0xba   : > { %446 = vrot.lane.b32.xlu1 %v1181_v23, %s2090_s18 }
  0xbb   : > { %v951_v28 = vpop.permute.xlu0 %950 }
  0xbc   : > { %997 = vst.msk [vmem:[#allocation2 + $0x10] sm:$0xff] %vm994_vm7, %v951_v28  ;;  %v953_v32 = vpop.permute.xlu1 %952 }
  0xbd   : > { %998 = vst.msk [vmem:[#allocation2 + $0x18] sm:$0xff] %vm994_vm7, %v953_v32  ;;  %576 = vrot.lane.b32.xlu0 %v2233_v58, %s2091_s19 }
  0xbe   : > { %578 = vrot.lane.b32.xlu1 %v2259_v4, %s2091_s19 }
  0xbf   : > { %v1080_v35 = vpop.permute.xlu0 %1079 }
  0xc0   : > { %1126 = vst.msk [vmem:[#allocation2 + $0x10] sm:$0xff] %vm1123_vm8, %v1080_v35  ;;  %v1082_v38 = vpop.permute.xlu1 %1081 }
  0xc1   : > { %1127 = vst.msk [vmem:[#allocation2 + $0x18] sm:$0xff] %vm1123_vm8, %v1082_v38  ;;  %705 = vrot.lane.b32.xlu0 %v1052_v14, %s2092_s20 }
  0xc2   : > { %707 = vrot.lane.b32.xlu1 %v664_v34, %s2092_s20 }
  0xc3   : > { %v1209_v58 = vpop.permute.xlu0 %1208 }
  0xc4   : > { %1255 = vst.msk [vmem:[#allocation2 + $0x10] sm:$0xff] %vm1252_vm9, %v1209_v58  ;;  %v304_v40 = vpop.permute.xlu1 %303 }
  0xc5   : > { %348 = vst.msk [vmem:[#allocation2 + $0x20] sm:$0xff] %vm343_vm2, %v304_v40  ;;  %834 = vrot.lane.b32.xlu0 %v1181_v23, %s2093_s21  ;;  %v1878_v40 = vld [vmem:[%s2136_s16 + $0x1a0] sm:$0xff] }
  0xc6   : > { %836 = vrot.lane.b32.xlu1 %v793_v39, %s2093_s21 }
  0xc7   : > { %v1211_v42 = vpop.permute.xlu0 %1210 }
  0xc8   : > { %1256 = vst.msk [vmem:[#allocation2 + $0x18] sm:$0xff] %vm1252_vm9, %v1211_v42  ;;  %v306_v37 = vpop.permute.xlu1 %305 }
  0xc9   : > { %349 = vst.msk [vmem:[#allocation2 + $0x28] sm:$0xff] %vm343_vm2, %v306_v37  ;;  %966 = vrot.lane.b32.xlu0 %v2259_v4, %s2094_s26  ;;  %v1909_v37 = vld [vmem:[%s2136_s16 + $0x199] sm:$0xff] }
  0xca   : > { %968 = vrot.lane.b32.xlu1 %v2277_v13, %s2094_s26 }
  0xcb   : > { %v433_v46 = vpop.permute.xlu0 %432  ;;  %v1271_v48 = vld [vmem:[#allocation2 + $0x10] sm:$0xff] }
  0xcc   : > { %477 = vst.msk [vmem:[#allocation2 + $0x20] sm:$0xff] %vm472_vm3, %v433_v46  ;;  %v435_v49 = vpop.permute.xlu1 %434  ;;  %1993 = vmatprep.mubr.msk.bf16.mxu0 %vm1305_vm10, %v1271_v48 }
  0xcd   : > { %478 = vst.msk [vmem:[#allocation2 + $0x28] sm:$0xff] %vm472_vm3, %v435_v49  ;;  %1095 = vrot.lane.b32.xlu0 %v664_v34, %s2095_s29 }
  0xce   : > { %1097 = vrot.lane.b32.xlu1 %v1054_v45, %s2095_s29 }
  0xcf   : > { %v565_v4 = vpop.permute.xlu0 %564  ;;  %v1272_v53 = vld [vmem:[#allocation2 + $0x18] sm:$0xff] }
  0xd0   : > { %609 = vst.msk [vmem:[#allocation2 + $0x20] sm:$0xff] %vm604_vm4, %v565_v4  ;;  %v567_v54 = vpop.permute.xlu1 %566  ;;  %1994 = vmatmul.mubr.msk.bf16.gmra.mrb[4].mxu0 %vm1305_vm10, %v1272_v53  ;;  %v1942_v4 = vld [vmem:[%s2136_s16 + $0x1a2] sm:$0xff] }
  0xd1   : > { %610 = vst.msk [vmem:[#allocation2 + $0x28] sm:$0xff] %vm604_vm4, %v567_v54  ;;  %1224 = vrot.lane.b32.xlu0 %v793_v39, %s2096_s30  ;;  %v1187_v54 = vpack.c.bf16 %v1942_v4, %v1941_v51 }
  0xd2   : > { %319 = vrot.lane.b32.xlu1 %v664_v34, %s2089_s17  ;;  %v668_v34 = vpack.c.bf16 %v1814_v30, %v1813_v29 }
  0xd3   : > { %v694_v55 = vpop.permute.xlu0 %693 }
  0xd4   : > { %738 = vst.msk [vmem:[#allocation2 + $0x20] sm:$0xff] %vm733_vm5, %v694_v55  ;;  %v696_v56 = vpop.permute.xlu1 %695 }
  0xd5   : > { %739 = vst.msk [vmem:[#allocation2 + $0x28] sm:$0xff] %vm733_vm5, %v696_v56  ;;  %1226 = vrot.lane.b32.xlu0 %v1183_v41, %s2096_s30 }
  0xd6   : > { %321 = vrot.lane.b32.xlu1 %v1054_v45, %s2089_s17 }
  0xd7   : > { %v823_v57 = vpop.permute.xlu0 %822 }
  0xd8   : > { %867 = vst.msk [vmem:[#allocation2 + $0x20] sm:$0xff] %vm862_vm6, %v823_v57  ;;  %v825_v59 = vpop.permute.xlu1 %824 }
  0xd9   : > { %868 = vst.msk [vmem:[#allocation2 + $0x28] sm:$0xff] %vm862_vm6, %v825_v59  ;;  %448 = vrot.lane.b32.xlu0 %v793_v39, %s2090_s18  ;;  %v797_v39 = vpack.c.bf16 %v1846_v33, %v1845_v36 }
  0xda   : > { %450 = vrot.lane.b32.xlu1 %v1183_v41, %s2090_s18 }
  0xdb   : > { %v955_v60 = vpop.permute.xlu0 %954 }
  0xdc   : > { %999 = vst.msk [vmem:[#allocation2 + $0x20] sm:$0xff] %vm994_vm7, %v955_v60  ;;  %v957_v63 = vpop.permute.xlu1 %956 }
  0xdd   : > { %1000 = vst.msk [vmem:[#allocation2 + $0x28] sm:$0xff] %vm994_vm7, %v957_v63  ;;  %580 = vrot.lane.b32.xlu0 %v2277_v13, %s2091_s19 }
  0xde   : > { %582 = vrot.lane.b32.xlu1 %v2299_v22, %s2091_s19 }
  0xdf   : > { %v1084_v1 = vpop.permute.xlu0 %1083 }
  0xe0   : > { %1128 = vst.msk [vmem:[#allocation2 + $0x20] sm:$0xff] %vm1123_vm8, %v1084_v1  ;;  %v1086_v5 = vpop.permute.xlu1 %1085 }
  0xe1   : > { %1129 = vst.msk [vmem:[#allocation2 + $0x28] sm:$0xff] %vm1123_vm8, %v1086_v5  ;;  %709 = vrot.lane.b32.xlu0 %v1054_v45, %s2092_s20  ;;  %v1910_v45 = vld [vmem:[%s2136_s16 + $0x1a1] sm:$0xff] }
  0xe2   : > { %711 = vrot.lane.b32.xlu1 %v666_v0, %s2092_s20  ;;  %v1058_v48 = vpack.c.bf16 %v1910_v45, %v1909_v37 }
  0xe3   : > { %v1213_v13 = vpop.permute.xlu0 %1212 }
  0xe4   : > { %1257 = vst.msk [vmem:[#allocation2 + $0x20] sm:$0xff] %vm1252_vm9, %v1213_v13  ;;  %v308_v47 = vpop.permute.xlu1 %307 }
  0xe5   : > { %350 = vst.msk [vmem:[#allocation2 + $0x30] sm:$0xff] %vm343_vm2, %v308_v47  ;;  %838 = vrot.lane.b32.xlu0 %v1183_v41, %s2093_s21 }
  0xe6   : > { %840 = vrot.lane.b32.xlu1 %v795_v6, %s2093_s21 }
  0xe7   : > { %v1215_v7 = vpop.permute.xlu0 %1214 }
  0xe8   : > { %1258 = vst.msk [vmem:[#allocation2 + $0x28] sm:$0xff] %vm1252_vm9, %v1215_v7  ;;  %v310_v10 = vpop.permute.xlu1 %309 }
  0xe9   : > { %351 = vst.msk [vmem:[#allocation2 + $0x38] sm:$0xff] %vm343_vm2, %v310_v10  ;;  %970 = vrot.lane.b32.xlu0 %v2299_v22, %s2094_s26 }
  0xea   : > { %972 = vrot.lane.b32.xlu1 %v2317_v31, %s2094_s26 }
  0xeb   : > { %v437_v12 = vpop.permute.xlu0 %436  ;;  %v1273_v14 = vld [vmem:[#allocation2 + $0x20] sm:$0xff] }
  0xec   : > { %479 = vst.msk [vmem:[#allocation2 + $0x30] sm:$0xff] %vm472_vm3, %v437_v12  ;;  %v439_v15 = vpop.permute.xlu1 %438  ;;  %1997 = vmatprep.mubr.msk.bf16.mxu0 %vm1305_vm10, %v1273_v14 }
  0xed   : > { %480 = vst.msk [vmem:[#allocation2 + $0x38] sm:$0xff] %vm472_vm3, %v439_v15  ;;  %1099 = vrot.lane.b32.xlu0 %v666_v0, %s2095_s29 }
  0xee   : > { %1101 = vrot.lane.b32.xlu1 %v1056_v11, %s2095_s29 }
  0xef   : > { %v569_v22 = vpop.permute.xlu0 %568  ;;  %v1274_v18 = vld [vmem:[#allocation2 + $0x28] sm:$0xff] }
  0xf0   : > { %611 = vst.msk [vmem:[#allocation2 + $0x30] sm:$0xff] %vm604_vm4, %v569_v22  ;;  %v571_v52 = vpop.permute.xlu1 %570  ;;  %1998 = vmatmul.mubr.msk.bf16.gmra.mrb[8].mxu0 %vm1305_vm10, %v1274_v18 }
  0xf1   : > { %612 = vst.msk [vmem:[#allocation2 + $0x38] sm:$0xff] %vm604_vm4, %v571_v52  ;;  %1228 = vrot.lane.b32.xlu0 %v795_v6, %s2096_s30 }
  0xf2   : > { %323 = vrot.lane.b32.xlu1 %v666_v0, %s2089_s17 }
  0xf3   : > { %v698_v20 = vpop.permute.xlu0 %697 }
  0xf4   : > { %740 = vst.msk [vmem:[#allocation2 + $0x30] sm:$0xff] %vm733_vm5, %v698_v20  ;;  %v700_v21 = vpop.permute.xlu1 %699 }
  0xf5   : > { %741 = vst.msk [vmem:[#allocation2 + $0x38] sm:$0xff] %vm733_vm5, %v700_v21  ;;  %1230 = vrot.lane.b32.xlu0 %v1185_v19, %s2096_s30 }
  0xf6   : > { %325 = vrot.lane.b32.xlu1 %v1056_v11, %s2089_s17 }
  0xf7   : > { %v827_v23 = vpop.permute.xlu0 %826 }
  0xf8   : > { %869 = vst.msk [vmem:[#allocation2 + $0x30] sm:$0xff] %vm862_vm6, %v827_v23  ;;  %v829_v26 = vpop.permute.xlu1 %828 }
  0xf9   : > { %870 = vst.msk [vmem:[#allocation2 + $0x38] sm:$0xff] %vm862_vm6, %v829_v26  ;;  %452 = vrot.lane.b32.xlu0 %v795_v6, %s2090_s18 }
  0xfa   : > { %454 = vrot.lane.b32.xlu1 %v1185_v19, %s2090_s18 }
  0xfb   : > { %v959_v28 = vpop.permute.xlu0 %958 }
  0xfc   : > { %1001 = vst.msk [vmem:[#allocation2 + $0x30] sm:$0xff] %vm994_vm7, %v959_v28  ;;  %v961_v32 = vpop.permute.xlu1 %960 }
  0xfd   : > { %1002 = vst.msk [vmem:[#allocation2 + $0x38] sm:$0xff] %vm994_vm7, %v961_v32  ;;  %584 = vrot.lane.b32.xlu0 %v2317_v31, %s2091_s19  ;;  %v1877_v31 = vld [vmem:[%s2136_s16 + $0x198] sm:$0xff] }
  0xfe   : > { %586 = vrot.lane.b32.xlu1 %v539_v27, %s2091_s19  ;;  %v929_v43 = vpack.c.bf16 %v1878_v40, %v1877_v31 }
  0xff   : > { %v1088_v35 = vpop.permute.xlu0 %1087 }
 0x100   : > { %1130 = vst.msk [vmem:[#allocation2 + $0x30] sm:$0xff] %vm1123_vm8, %v1088_v35  ;;  %v1090_v38 = vpop.permute.xlu1 %1089 }
 0x101   : > { %1131 = vst.msk [vmem:[#allocation2 + $0x38] sm:$0xff] %vm1123_vm8, %v1090_v38  ;;  %713 = vrot.lane.b32.xlu0 %v1056_v11, %s2092_s20 }
 0x102   : > { %715 = vrot.lane.b32.xlu1 %v668_v34, %s2092_s20 }
 0x103   : > { %v1217_v58 = vpop.permute.xlu0 %1216 }
 0x104   : > { %1259 = vst.msk [vmem:[#allocation2 + $0x30] sm:$0xff] %vm1252_vm9, %v1217_v58  ;;  %v312_v42 = vpop.permute.xlu1 %311 }
 0x105   : > { %352 = vst.msk [vmem:[#allocation2 + $0x40] sm:$0xff] %vm343_vm2, %v312_v42  ;;  %842 = vrot.lane.b32.xlu0 %v1185_v19, %s2093_s21 }
 0x106   : > { %844 = vrot.lane.b32.xlu1 %v797_v39, %s2093_s21 }
 0x107   : > { %v1219_v44 = vpop.permute.xlu0 %1218 }
 0x108   : > { %1260 = vst.msk [vmem:[#allocation2 + $0x38] sm:$0xff] %vm1252_vm9, %v1219_v44  ;;  %v314_v46 = vpop.permute.xlu1 %313 }
 0x109   : > { %353 = vst.msk [vmem:[#allocation2 + $0x48] sm:$0xff] %vm343_vm2, %v314_v46  ;;  %974 = vrot.lane.b32.xlu0 %v539_v27, %s2094_s26 }
 0x10a   : > { %976 = vrot.lane.b32.xlu1 %v929_v43, %s2094_s26 }
 0x10b   : > { %v441_v49 = vpop.permute.xlu0 %440  ;;  %v1275_v50 = vld [vmem:[#allocation2 + $0x30] sm:$0xff] }
 0x10c   : > { %481 = vst.msk [vmem:[#allocation2 + $0x40] sm:$0xff] %vm472_vm3, %v441_v49  ;;  %v443_v53 = vpop.permute.xlu1 %442  ;;  %2001 = vmatprep.mubr.msk.bf16.mxu0 %vm1305_vm10, %v1275_v50 }
 0x10d   : > { %482 = vst.msk [vmem:[#allocation2 + $0x48] sm:$0xff] %vm472_vm3, %v443_v53  ;;  %1103 = vrot.lane.b32.xlu0 %v668_v34, %s2095_s29 }
 0x10e   : > { %1105 = vrot.lane.b32.xlu1 %v1058_v48, %s2095_s29 }
 0x10f   : > { %v573_v41 = vpop.permute.xlu0 %572  ;;  %v1276_v55 = vld [vmem:[#allocation2 + $0x38] sm:$0xff] }
 0x110   : > { %613 = vst.msk [vmem:[#allocation2 + $0x40] sm:$0xff] %vm604_vm4, %v573_v41  ;;  %v575_v56 = vpop.permute.xlu1 %574  ;;  %2002 = vmatmul.mubr.msk.bf16.gmra.mrb[12].mxu0 %vm1305_vm10, %v1276_v55 }
 0x111   : > { %614 = vst.msk [vmem:[#allocation2 + $0x48] sm:$0xff] %vm604_vm4, %v575_v56  ;;  %1232 = vrot.lane.b32.xlu0 %v797_v39, %s2096_s30 }
 0x112   : > { %1234 = vrot.lane.b32.xlu1 %v1187_v54, %s2096_s30 }
 0x113   : > { %v702_v57 = vpop.permute.xlu0 %701 }
 0x114   : > { %742 = vst.msk [vmem:[#allocation2 + $0x40] sm:$0xff] %vm733_vm5, %v702_v57  ;;  %v704_v59 = vpop.permute.xlu1 %703 }
 0x115   : > { %743 = vst.msk [vmem:[#allocation2 + $0x48] sm:$0xff] %vm733_vm5, %v704_v59 }
 0x117   : > { %v831_v60 = vpop.permute.xlu0 %830 }
 0x118   : > { %871 = vst.msk [vmem:[#allocation2 + $0x40] sm:$0xff] %vm862_vm6, %v831_v60  ;;  %v833_v61 = vpop.permute.xlu1 %832 }
 0x119   : > { %872 = vst.msk [vmem:[#allocation2 + $0x48] sm:$0xff] %vm862_vm6, %v833_v61 }
 0x11b   : > { %v963_v62 = vpop.permute.xlu0 %962 }
 0x11c   : > { %1003 = vst.msk [vmem:[#allocation2 + $0x40] sm:$0xff] %vm994_vm7, %v963_v62  ;;  %v965_v63 = vpop.permute.xlu1 %964 }
 0x11d   : > { %1004 = vst.msk [vmem:[#allocation2 + $0x48] sm:$0xff] %vm994_vm7, %v965_v63 }
 0x11f   : > { %v1092_v0 = vpop.permute.xlu0 %1091 }
 0x120   : > { %1132 = vst.msk [vmem:[#allocation2 + $0x40] sm:$0xff] %vm1123_vm8, %v1092_v0  ;;  %v1094_v1 = vpop.permute.xlu1 %1093 }
 0x121   : > { %1133 = vst.msk [vmem:[#allocation2 + $0x48] sm:$0xff] %vm1123_vm8, %v1094_v1 }
 0x123   : > { %v1221_v2 = vpop.permute.xlu0 %1220 }
 0x124   : > { %1261 = vst.msk [vmem:[#allocation2 + $0x40] sm:$0xff] %vm1252_vm9, %v1221_v2  ;;  %v316_v3 = vpop.permute.xlu1 %315 }
 0x125   : > { %354 = vst.msk [vmem:[#allocation2 + $0x50] sm:$0xff] %vm343_vm2, %v316_v3 }
 0x127   : > { %v1223_v5 = vpop.permute.xlu0 %1222 }
 0x128   : > { %1262 = vst.msk [vmem:[#allocation2 + $0x48] sm:$0xff] %vm1252_vm9, %v1223_v5  ;;  %v318_v6 = vpop.permute.xlu1 %317 }
 0x129   : > { %355 = vst.msk [vmem:[#allocation2 + $0x58] sm:$0xff] %vm343_vm2, %v318_v6 }
 0x12b   : > { %v445_v13 = vpop.permute.xlu0 %444  ;;  %v1277_v47 = vld [vmem:[#allocation2 + $0x40] sm:$0xff] }
 0x12c   : > { %483 = vst.msk [vmem:[#allocation2 + $0x50] sm:$0xff] %vm472_vm3, %v445_v13  ;;  %v447_v7 = vpop.permute.xlu1 %446  ;;  %2005 = vmatprep.mubr.msk.bf16.mxu1 %vm1305_vm10, %v1277_v47 }
 0x12d   : > { %484 = vst.msk [vmem:[#allocation2 + $0x58] sm:$0xff] %vm472_vm3, %v447_v7 }
 0x12f   : > { %v577_v8 = vpop.permute.xlu0 %576  ;;  %v1278_v9 = vld [vmem:[#allocation2 + $0x48] sm:$0xff] }
 0x130   : > { %615 = vst.msk [vmem:[#allocation2 + $0x50] sm:$0xff] %vm604_vm4, %v577_v8  ;;  %v579_v10 = vpop.permute.xlu1 %578  ;;  %2006 = vmatmul.mubr.msk.bf16.vlgmr.msra.gmra.mrb[0].mxu1 %vm1305_vm10, %v1278_v9 }
 0x131   : > { %616 = vst.msk [vmem:[#allocation2 + $0x58] sm:$0xff] %vm604_vm4, %v579_v10 }
 0x133   : > { %v706_v11 = vpop.permute.xlu0 %705 }
 0x134   : > { %744 = vst.msk [vmem:[#allocation2 + $0x50] sm:$0xff] %vm733_vm5, %v706_v11  ;;  %v708_v12 = vpop.permute.xlu1 %707 }
 0x135   : > { %745 = vst.msk [vmem:[#allocation2 + $0x58] sm:$0xff] %vm733_vm5, %v708_v12 }
 0x137   : > { %v835_v14 = vpop.permute.xlu0 %834 }
 0x138   : > { %873 = vst.msk [vmem:[#allocation2 + $0x50] sm:$0xff] %vm862_vm6, %v835_v14  ;;  %v837_v15 = vpop.permute.xlu1 %836 }
 0x139   : > { %874 = vst.msk [vmem:[#allocation2 + $0x58] sm:$0xff] %vm862_vm6, %v837_v15 }
 0x13b   : > { %v967_v16 = vpop.permute.xlu0 %966 }
 0x13c   : > { %1005 = vst.msk [vmem:[#allocation2 + $0x50] sm:$0xff] %vm994_vm7, %v967_v16  ;;  %v969_v17 = vpop.permute.xlu1 %968 }
 0x13d   : > { %1006 = vst.msk [vmem:[#allocation2 + $0x58] sm:$0xff] %vm994_vm7, %v969_v17 }
 0x13f   : > { %v1096_v22 = vpop.permute.xlu0 %1095 }
 0x140   : > { %1134 = vst.msk [vmem:[#allocation2 + $0x50] sm:$0xff] %vm1123_vm8, %v1096_v22  ;;  %v1098_v18 = vpop.permute.xlu1 %1097 }
 0x141   : > { %1135 = vst.msk [vmem:[#allocation2 + $0x58] sm:$0xff] %vm1123_vm8, %v1098_v18 }
 0x143   : > { %v1225_v52 = vpop.permute.xlu0 %1224 }
 0x144   : > { %1263 = vst.msk [vmem:[#allocation2 + $0x50] sm:$0xff] %vm1252_vm9, %v1225_v52  ;;  %v320_v19 = vpop.permute.xlu1 %319 }
 0x145   : > { %356 = vst.msk [vmem:[#allocation2 + $0x60] sm:$0xff] %vm343_vm2, %v320_v19 }
 0x147   : > { %v1227_v20 = vpop.permute.xlu0 %1226 }
 0x148   : > { %1264 = vst.msk [vmem:[#allocation2 + $0x58] sm:$0xff] %vm1252_vm9, %v1227_v20  ;;  %v322_v21 = vpop.permute.xlu1 %321 }
 0x149   : > { %357 = vst.msk [vmem:[#allocation2 + $0x68] sm:$0xff] %vm343_vm2, %v322_v21 }
 0x14b   : > { %v449_v23 = vpop.permute.xlu0 %448  ;;  %v1279_v24 = vld [vmem:[#allocation2 + $0x50] sm:$0xff] }
 0x14c   : > { %485 = vst.msk [vmem:[#allocation2 + $0x60] sm:$0xff] %vm472_vm3, %v449_v23  ;;  %v451_v25 = vpop.permute.xlu1 %450  ;;  %2009 = vmatprep.mubr.msk.bf16.mxu1 %vm1305_vm10, %v1279_v24 }
 0x14d   : > { %486 = vst.msk [vmem:[#allocation2 + $0x68] sm:$0xff] %vm472_vm3, %v451_v25 }
 0x14f   : > { %v581_v26 = vpop.permute.xlu0 %580  ;;  %v1280_v27 = vld [vmem:[#allocation2 + $0x58] sm:$0xff] }
 0x150   : > { %617 = vst.msk [vmem:[#allocation2 + $0x60] sm:$0xff] %vm604_vm4, %v581_v26  ;;  %v583_v28 = vpop.permute.xlu1 %582  ;;  %2010 = vmatmul.mubr.msk.bf16.gmra.mrb[4].mxu1 %vm1305_vm10, %v1280_v27 }
 0x151   : > { %618 = vst.msk [vmem:[#allocation2 + $0x68] sm:$0xff] %vm604_vm4, %v583_v28 }
 0x153   : > { %v710_v29 = vpop.permute.xlu0 %709 }
 0x154   : > { %746 = vst.msk [vmem:[#allocation2 + $0x60] sm:$0xff] %vm733_vm5, %v710_v29  ;;  %v712_v30 = vpop.permute.xlu1 %711 }
 0x155   : > { %747 = vst.msk [vmem:[#allocation2 + $0x68] sm:$0xff] %vm733_vm5, %v712_v30 }
 0x157   : > { %v839_v32 = vpop.permute.xlu0 %838 }
 0x158   : > { %875 = vst.msk [vmem:[#allocation2 + $0x60] sm:$0xff] %vm862_vm6, %v839_v32  ;;  %v841_v34 = vpop.permute.xlu1 %840 }
 0x159   : > { %876 = vst.msk [vmem:[#allocation2 + $0x68] sm:$0xff] %vm862_vm6, %v841_v34 }
 0x15b   : > { %v971_v35 = vpop.permute.xlu0 %970 }
 0x15c   : > { %1007 = vst.msk [vmem:[#allocation2 + $0x60] sm:$0xff] %vm994_vm7, %v971_v35  ;;  %v973_v36 = vpop.permute.xlu1 %972 }
 0x15d   : > { %1008 = vst.msk [vmem:[#allocation2 + $0x68] sm:$0xff] %vm994_vm7, %v973_v36 }
 0x15f   : > { %v1100_v33 = vpop.permute.xlu0 %1099 }
 0x160   : > { %1136 = vst.msk [vmem:[#allocation2 + $0x60] sm:$0xff] %vm1123_vm8, %v1100_v33  ;;  %v1102_v38 = vpop.permute.xlu1 %1101 }
 0x161   : > { %1137 = vst.msk [vmem:[#allocation2 + $0x68] sm:$0xff] %vm1123_vm8, %v1102_v38 }
 0x163   : > { %v1229_v39 = vpop.permute.xlu0 %1228 }
 0x164   : > { %1265 = vst.msk [vmem:[#allocation2 + $0x60] sm:$0xff] %vm1252_vm9, %v1229_v39  ;;  %v324_v58 = vpop.permute.xlu1 %323 }
 0x165   : > { %358 = vst.msk [vmem:[#allocation2 + $0x70] sm:$0xff] %vm343_vm2, %v324_v58 }
 0x167   : > { %v1231_v31 = vpop.permute.xlu0 %1230 }
 0x168   : > { %1266 = vst.msk [vmem:[#allocation2 + $0x68] sm:$0xff] %vm1252_vm9, %v1231_v31  ;;  %v326_v40 = vpop.permute.xlu1 %325 }
 0x169   : > { %359 = vst.msk [vmem:[#allocation2 + $0x78] sm:$0xff] %vm343_vm2, %v326_v40 }
 0x16b   : > { %v453_v42 = vpop.permute.xlu0 %452  ;;  %v1281_v43 = vld [vmem:[#allocation2 + $0x60] sm:$0xff] }
 0x16c   : > { %487 = vst.msk [vmem:[#allocation2 + $0x70] sm:$0xff] %vm472_vm3, %v453_v42  ;;  %v455_v44 = vpop.permute.xlu1 %454  ;;  %2013 = vmatprep.mubr.msk.bf16.mxu1 %vm1305_vm10, %v1281_v43 }
 0x16d   : > { %488 = vst.msk [vmem:[#allocation2 + $0x78] sm:$0xff] %vm472_vm3, %v455_v44 }
 0x16f   : > { %v585_v37 = vpop.permute.xlu0 %584  ;;  %v1282_v45 = vld [vmem:[#allocation2 + $0x68] sm:$0xff] }
 0x170   : > { %619 = vst.msk [vmem:[#allocation2 + $0x70] sm:$0xff] %vm604_vm4, %v585_v37  ;;  %v587_v46 = vpop.permute.xlu1 %586  ;;  %2014 = vmatmul.mubr.msk.bf16.gmra.mrb[8].mxu1 %vm1305_vm10, %v1282_v45 }
 0x171   : > { %620 = vst.msk [vmem:[#allocation2 + $0x78] sm:$0xff] %vm604_vm4, %v587_v46 }
 0x173   : > { %v714_v48 = vpop.permute.xlu0 %713 }
 0x174   : > { %748 = vst.msk [vmem:[#allocation2 + $0x70] sm:$0xff] %vm733_vm5, %v714_v48  ;;  %v716_v49 = vpop.permute.xlu1 %715 }
 0x175   : > { %749 = vst.msk [vmem:[#allocation2 + $0x78] sm:$0xff] %vm733_vm5, %v716_v49 }
 0x177   : > { %v843_v50 = vpop.permute.xlu0 %842 }
 0x178   : > { %877 = vst.msk [vmem:[#allocation2 + $0x70] sm:$0xff] %vm862_vm6, %v843_v50  ;;  %v845_v51 = vpop.permute.xlu1 %844 }
 0x179   : > { %878 = vst.msk [vmem:[#allocation2 + $0x78] sm:$0xff] %vm862_vm6, %v845_v51 }
 0x17b   : > { %v975_v4 = vpop.permute.xlu0 %974 }
 0x17c   : > { %1009 = vst.msk [vmem:[#allocation2 + $0x70] sm:$0xff] %vm994_vm7, %v975_v4  ;;  %v977_v53 = vpop.permute.xlu1 %976 }
 0x17d   : > { %1010 = vst.msk [vmem:[#allocation2 + $0x78] sm:$0xff] %vm994_vm7, %v977_v53 }
 0x17f   : > { %v1104_v54 = vpop.permute.xlu0 %1103 }
 0x180   : > { %1138 = vst.msk [vmem:[#allocation2 + $0x70] sm:$0xff] %vm1123_vm8, %v1104_v54  ;;  %v1106_v41 = vpop.permute.xlu1 %1105 }
 0x181   : > { %1139 = vst.msk [vmem:[#allocation2 + $0x78] sm:$0xff] %vm1123_vm8, %v1106_v41 }
 0x183   : > { %v1233_v55 = vpop.permute.xlu0 %1232  ;;  %v2612_v56 = vpop.f32.mrb[0].mxu0 }
 0x184   : > { %1267 = vst.msk [vmem:[#allocation2 + $0x70] sm:$0xff] %vm1252_vm9, %v1233_v55  ;;  %v1235_v57 = vpop.permute.xlu1 %1234  ;;  %v2615_v59 = vpop.f32.mrb[1].mxu0 }
 0x185   : > { %1268 = vst.msk [vmem:[#allocation2 + $0x78] sm:$0xff] %vm1252_vm9, %v1235_v57  ;;  %v2618_v60 = vpop.f32.mrb[2].mxu0 }
 0x186   : > { %v2620_v61 = vpop.f32.mrb[3].mxu0 }
 0x187   : > { %v1519_v62 = vadd.f32 %v2620_v61, %v2615_v59 }
 0x189   : > { %v1520_v63 = vadd.f32 %v2612_v56, %v1519_v62 }
 0x18b   : > { %v1283_v0 = vld [vmem:[#allocation2 + $0x70] sm:$0xff]  ;;  %v1521_v1 = vadd.f32 %v2618_v60, %v1520_v63 }
 0x18c   : > { %2017 = vmatprep.mubr.msk.bf16.mxu1 %vm1305_vm10, %v1283_v0  ;;  %v1284_v2 = vld [vmem:[#allocation2 + $0x78] sm:$0xff] }
 0x18d   : > { %2018 = vmatmul.mubr.msk.bf16.gmra.mrb[12].mxu1 %vm1305_vm10, %v1284_v2 }
 0x1a3   : > { %v2628_v3 = vpop.f32.mrb[4].mxu0 }
 0x1a4   : > { %v2630_v5 = vpop.f32.mrb[5].mxu0 }
 0x1a5   : > { %v1522_v6 = vadd.f32 %v1521_v1, %v2630_v5  ;;  %v2633_v13 = vpop.f32.mrb[6].mxu0 }
 0x1a6   : > { %v2635_v47 = vpop.f32.mrb[7].mxu0 }
 0x1a7   : > { %v1523_v7 = vadd.f32 %v1522_v6, %v2635_v47 }
 0x1a9   : > { %v1524_v8 = vadd.f32 %v2628_v3, %v1523_v7 }
 0x1ab   : > { %v1525_v9 = vadd.f32 %v2633_v13, %v1524_v8 }
 0x1c3   : > { %v2640_v10 = vpop.f32.mrb[8].mxu0 }
 0x1c4   : > { %v2642_v11 = vpop.f32.mrb[9].mxu0 }
 0x1c5   : > { %v1526_v12 = vadd.f32 %v1525_v9, %v2642_v11  ;;  %v2645_v14 = vpop.f32.mrb[10].mxu0 }
 0x1c6   : > { %v2647_v15 = vpop.f32.mrb[11].mxu0 }
 0x1c7   : > { %v1527_v16 = vadd.f32 %v1526_v12, %v2647_v15 }
 0x1c9   : > { %v1528_v17 = vadd.f32 %v2640_v10, %v1527_v16 }
 0x1cb   : > { %v1529_v22 = vadd.f32 %v2645_v14, %v1528_v17 }
 0x1e3   : > { %v2652_v18 = vpop.f32.mrb[12].mxu0 }
 0x1e4   : > { %v2654_v52 = vpop.f32.mrb[13].mxu0 }
 0x1e5   : > { %v1530_v19 = vadd.f32 %v1529_v22, %v2654_v52  ;;  %v2657_v20 = vpop.f32.mrb[14].mxu0 }
 0x1e6   : > { %v2659_v21 = vpop.f32.mrb[15].mxu0 }
 0x1e7   : > { %v1531_v23 = vadd.f32 %v1530_v19, %v2659_v21 }
 0x1e9   : > { %v1532_v24 = vadd.f32 %v2652_v18, %v1531_v23 }
 0x1eb   : > { %v1533_v25 = vadd.f32 %v2657_v20, %v1532_v24 }
 0x203   : > { %v2664_v26 = vpop.f32.mrb[0].mxu1 }
 0x204   : > { %v2666_v27 = vpop.f32.mrb[1].mxu1 }
 0x205   : > { %v1534_v28 = vadd.f32 %v1533_v25, %v2666_v27  ;;  %v2669_v29 = vpop.f32.mrb[2].mxu1 }
 0x206   : > { %v2671_v30 = vpop.f32.mrb[3].mxu1 }
 0x207   : > { %v1535_v32 = vadd.f32 %v1534_v28, %v2671_v30 }
 0x209   : > { %v1536_v34 = vadd.f32 %v2664_v26, %v1535_v32 }
 0x20b   : > { %v1537_v35 = vadd.f32 %v2669_v29, %v1536_v34 }
 0x223   : > { %v2676_v36 = vpop.f32.mrb[4].mxu1 }
 0x224   : > { %v2678_v33 = vpop.f32.mrb[5].mxu1 }
 0x225   : > { %v1538_v38 = vadd.f32 %v1537_v35, %v2678_v33  ;;  %v2681_v39 = vpop.f32.mrb[6].mxu1 }
 0x226   : > { %v2683_v58 = vpop.f32.mrb[7].mxu1 }
 0x227   : > { %v1539_v31 = vadd.f32 %v1538_v38, %v2683_v58 }
 0x229   : > { %v1540_v40 = vadd.f32 %v2676_v36, %v1539_v31 }
 0x22b   : > { %v1541_v42 = vadd.f32 %v2681_v39, %v1540_v40 }
 0x243   : > { %v2688_v43 = vpop.f32.mrb[8].mxu1 }
 0x244   : > { %v2690_v44 = vpop.f32.mrb[9].mxu1 }
 0x245   : > { %v1542_v37 = vadd.f32 %v1541_v42, %v2690_v44  ;;  %v2693_v45 = vpop.f32.mrb[10].mxu1 }
 0x246   : > { %v2695_v46 = vpop.f32.mrb[11].mxu1 }
 0x247   : > { %v1543_v48 = vadd.f32 %v1542_v37, %v2695_v46 }
 0x249   : > { %v1544_v49 = vadd.f32 %v2688_v43, %v1543_v48 }
 0x24b   : > { %v1545_v50 = vadd.f32 %v2693_v45, %v1544_v49 }
 0x260   : > { %v2700_v51 = vpop.f32.mrb[12].mxu1 }
 0x261   : > { %v2702_v4 = vpop.f32.mrb[13].mxu1 }
 0x262   : > { %v1546_v53 = vadd.f32 %v1545_v50, %v2702_v4  ;;  %v2705_v54 = vpop.f32.mrb[14].mxu1 }
 0x263   : > { %v2707_v41 = vpop.f32.mrb[15].mxu1 }
 0x264   : > { %v1547_v55 = vadd.f32 %v1546_v53, %v2707_v41 }
 0x266   : > { %v1548_v57 = vadd.f32 %v2700_v51, %v1547_v55 }
 0x268   : > { %v1549_v62 = vadd.f32 %v2705_v54, %v1548_v57 }
 0x26a   : > { %v1550_v63 = vrot.slane %v1549_v62, 4 }
 0x26c   : > { %v1551_v0 = vadd.f32 %v1550_v63, %v1549_v62 }
 0x26e   : > { %v1552_v1 = vrot.slane %v1551_v0, 2 }
 0x270   : > { %v1553_v2 = vadd.f32 %v1552_v1, %v1551_v0 }
 0x272   : > { %v1554_v6 = vrot.slane %v1553_v2, 1 }
 0x274   : > { %v2712_v7 = vadd.f32 %v1554_v6, %v1553_v2 }
 0x276   : > { %v2715_v8 = vmul.f32 0.00390625, %v2712_v7 }
 0x278   : > { %v1558_v9 = vsub.f32 %v2615_v59, %v2715_v8  ;;  %v1559_v12 = vsub.f32 %v2620_v61, %v2715_v8  ;;  %v1560_v16 = vsub.f32 %v2612_v56, %v2715_v8  ;;  %v1561_v19 = vsub.f32 %v2618_v60, %v2715_v8 }
 0x279   : > { %v1562_v23 = vsub.f32 %v2630_v5, %v2715_v8  ;;  %v1563_v28 = vsub.f32 %v2635_v47, %v2715_v8  ;;  %v1564_v61 = vsub.f32 %v2628_v3, %v2715_v8  ;;  %v1565_v35 = vsub.f32 %v2633_v13, %v2715_v8 }
 0x27a   : > { %v1590_v17 = vmul.f32 %v1558_v9, %v1558_v9  ;;  %v1591_v22 = vmul.f32 %v1559_v12, %v1559_v12  ;;  %v1592_v24 = vmul.f32 %v1560_v16, %v1560_v16  ;;  %v1593_v59 = vmul.f32 %v1561_v19, %v1561_v19 }
 0x27b   : > { %v1594_v34 = vmul.f32 %v1562_v23, %v1562_v23  ;;  %v1595_v38 = vmul.f32 %v1563_v28, %v1563_v28  ;;  %v1566_v5 = vsub.f32 %v2642_v11, %v2715_v8  ;;  %v1596_v31 = vmul.f32 %v1564_v61, %v1564_v61 }
 0x27c   : > { %v1622_v25 = vadd.f32 %v1591_v22, %v1590_v17  ;;  %v1567_v47 = vsub.f32 %v2647_v15, %v2715_v8  ;;  %v1597_v42 = vmul.f32 %v1565_v35, %v1565_v35  ;;  %v1568_v3 = vsub.f32 %v2640_v10, %v2715_v8 }
 0x27d   : > { %v1598_v48 = vmul.f32 %v1566_v5, %v1566_v5  ;;  %v1569_v13 = vsub.f32 %v2645_v14, %v2715_v8  ;;  %v1570_v11 = vsub.f32 %v2654_v52, %v2715_v8  ;;  %v1571_v15 = vsub.f32 %v2659_v21, %v2715_v8 }
 0x27e   : > { %v1623_v32 = vadd.f32 %v1622_v25, %v1592_v24  ;;  %v1599_v50 = vmul.f32 %v1567_v47, %v1567_v47  ;;  %v1600_v55 = vmul.f32 %v1568_v3, %v1568_v3  ;;  %v1572_v10 = vsub.f32 %v2652_v18, %v2715_v8 }
 0x27f   : > { %v1601_v62 = vmul.f32 %v1569_v13, %v1569_v13  ;;  %v1602_v0 = vmul.f32 %v1570_v11, %v1570_v11  ;;  %v1573_v14 = vsub.f32 %v2657_v20, %v2715_v8  ;;  %v1603_v2 = vmul.f32 %v1571_v15, %v1571_v15 }
 0x280   : > { %v1624_v56 = vadd.f32 %v1623_v32, %v1593_v59  ;;  %v1574_v52 = vsub.f32 %v2666_v27, %v2715_v8  ;;  %v1604_v9 = vmul.f32 %v1572_v10, %v1572_v10  ;;  %v1575_v21 = vsub.f32 %v2671_v30, %v2715_v8 }
 0x281   : > { %v1605_v16 = vmul.f32 %v1573_v14, %v1573_v14  ;;  %v1576_v18 = vsub.f32 %v2664_v26, %v2715_v8  ;;  %v1577_v20 = vsub.f32 %v2669_v29, %v2715_v8  ;;  %v1578_v27 = vsub.f32 %v2678_v33, %v2715_v8 }
 0x282   : > { %v1625_v60 = vadd.f32 %v1624_v56, %v1594_v34  ;;  %v1606_v22 = vmul.f32 %v1574_v52, %v1574_v52  ;;  %v1607_v23 = vmul.f32 %v1575_v21, %v1575_v21  ;;  %v1579_v30 = vsub.f32 %v2683_v58, %v2715_v8 }
 0x283   : > { %v1608_v25 = vmul.f32 %v1576_v18, %v1576_v18  ;;  %v1609_v59 = vmul.f32 %v1577_v20, %v1577_v20  ;;  %v1580_v26 = vsub.f32 %v2676_v36, %v2715_v8  ;;  %v1610_v61 = vmul.f32 %v1578_v27, %v1578_v27 }
 0x284   : > { %v1626_v40 = vadd.f32 %v1625_v60, %v1595_v38  ;;  %v1581_v29 = vsub.f32 %v2681_v39, %v2715_v8  ;;  %v1611_v56 = vmul.f32 %v1579_v30, %v1579_v30  ;;  %v1582_v33 = vsub.f32 %v2690_v44, %v2715_v8 }
 0x285   : > { %v1612_v38 = vmul.f32 %v1580_v26, %v1580_v26  ;;  %v1583_v58 = vsub.f32 %v2695_v46, %v2715_v8  ;;  %v1584_v36 = vsub.f32 %v2688_v43, %v2715_v8  ;;  %v1585_v39 = vsub.f32 %v2693_v45, %v2715_v8 }
 0x286   : > { %v1627_v37 = vadd.f32 %v1626_v40, %v1596_v31  ;;  %v1613_v5 = vmul.f32 %v1581_v29, %v1581_v29  ;;  %v1614_v40 = vmul.f32 %v1582_v33, %v1582_v33  ;;  %v1586_v44 = vsub.f32 %v2702_v4, %v2715_v8 }
 0x287   : > { %v1616_v3 = vmul.f32 %v1584_v36, %v1584_v36  ;;  %v1587_v46 = vsub.f32 %v2707_v41, %v2715_v8  ;;  %v1588_v43 = vsub.f32 %v2700_v51, %v2715_v8  ;;  %v1589_v45 = vsub.f32 %v2705_v54, %v2715_v8 }
 0x288   : > { %v1628_v49 = vadd.f32 %v1627_v37, %v1597_v42  ;;  %v1615_v42 = vmul.f32 %v1583_v58, %v1583_v58 }
 0x289   : > { %v1619_v11 = vmul.f32 %v1587_v46, %v1587_v46  ;;  %v1621_v15 = vmul.f32 %v1589_v45, %v1589_v45 }
 0x28a   : > { %v1629_v53 = vadd.f32 %v1628_v49, %v1598_v48  ;;  %v1617_v49 = vmul.f32 %v1585_v39, %v1585_v39 }
 0x28c   : > { %v1630_v57 = vadd.f32 %v1629_v53, %v1599_v50  ;;  %v1618_v50 = vmul.f32 %v1586_v44, %v1586_v44 }
 0x28e   : > { %v1631_v63 = vadd.f32 %v1630_v57, %v1600_v55  ;;  %v1620_v57 = vmul.f32 %v1588_v43, %v1588_v43 }
 0x290   : > { %v1632_v1 = vadd.f32 %v1631_v63, %v1601_v62 }
 0x292   : > { %v1633_v6 = vadd.f32 %v1632_v1, %v1602_v0 }
 0x294   : > { %v1634_v12 = vadd.f32 %v1633_v6, %v1603_v2 }
 0x296   : > { %v1635_v17 = vadd.f32 %v1634_v12, %v1604_v9 }
 0x298   : > { %v1636_v19 = vadd.f32 %v1635_v17, %v1605_v16 }
 0x29a   : > { %v1637_v24 = vadd.f32 %v1636_v19, %v1606_v22 }
 0x29c   : > { %v1638_v28 = vadd.f32 %v1637_v24, %v1607_v23 }
 0x29e   : > { %v1639_v32 = vadd.f32 %v1638_v28, %v1608_v25 }
 0x2a0   : > { %v1640_v34 = vadd.f32 %v1639_v32, %v1609_v59 }
 0x2a2   : > { %v1641_v35 = vadd.f32 %v1640_v34, %v1610_v61 }
 0x2a4   : > { %v1642_v60 = vadd.f32 %v1641_v35, %v1611_v56 }
 0x2a6   : > { %v1643_v31 = vadd.f32 %v1642_v60, %v1612_v38 }
 0x2a8   : > { %v1644_v47 = vadd.f32 %v1643_v31, %v1613_v5 }
 0x2aa   : > { %v1645_v37 = vadd.f32 %v1644_v47, %v1614_v40 }
 0x2ac   : > { %v1646_v48 = vadd.f32 %v1645_v37, %v1615_v42 }
 0x2ae   : > { %v1647_v13 = vadd.f32 %v1646_v48, %v1616_v3 }
 0x2b0   : > { %v1648_v53 = vadd.f32 %v1647_v13, %v1617_v49 }
 0x2b2   : > { %v1649_v55 = vadd.f32 %v1648_v53, %v1618_v50 }
 0x2b4   : > { %v1650_v4 = vadd.f32 %v1649_v55, %v1619_v11 }
 0x2b6   : > { %v1651_v62 = vadd.f32 %v1650_v4, %v1620_v57 }
 0x2b8   : > { %v1652_v63 = vadd.f32 %v1651_v62, %v1621_v15 }
 0x2ba   : > { %v1653_v10 = vrot.slane %v1652_v63, 4 }
 0x2bc   : > { %v1654_v41 = vadd.f32 %v1653_v10, %v1652_v63 }
 0x2be   : > { %v1655_v0 = vrot.slane %v1654_v41, 2 }
 0x2c0   : > { %v1656_v1 = vadd.f32 %v1655_v0, %v1654_v41 }
 0x2c2   : > { %v1657_v14 = vrot.slane %v1656_v1, 1 }
 0x2c4   : > { %v1658_v51 = vadd.f32 %v1657_v14, %v1656_v1 }
 0x2c6   : > { %v1660_v54 = vsel %vm1659_vm11, %v2712_v7, %v1658_v51 }
 0x2c7   : > { %v1661_v8 = vsel %vm1354_vm1, %v1660_v54, 0.0 }
 0x2c8   : > { %1662 = vst [vmem:[%s161_s6] sm:$0xff] %v1661_v8 }
 0x2c9 PF: > { %s12_s11 = sadd.s32 1, %s2087_s11   ;;  %s2799_s9 = smov %s2083_s10 }
 0x2ca   : > { %p9_p5 = scmp.ge.s32.totalorder %s12_s11, 4   ;;  %s2800_s10 = smov %s2802_s12 }
 0x2cc   :  { %11 = sbr.rel (!%p9_p5) target bundleno = 2 (0x2), region = 61 }

</bundles_post_ra>
